<compile_context>
chip_gen: v7x
topology: tpu7x:2x2x1
jax: 0.10.0
libtpu: 0.0.40
codegen_flags: <defaults>
</compile_context>

<pallas_src>
import jax
import jax.numpy as jnp
from jax.experimental import pallas as pl
from jax.experimental.pallas import tpu as pltpu


def _attention_kernel(ctx_ref, mask_ref, w_ref, out_ref):
    # ctx_ref : (TB, L, D)  contexts for TB batch rows
    # mask_ref: (TB, L, 1)  additive mask with the bias folded in (bias | -inf)
    # w_ref   : (1, D)      Linear(d_model -> 1) weight (resident across grid)
    # out_ref : (TB, D)     code vectors (lane-dense rows)
    c = ctx_ref[...].astype(jnp.float32)                      # (TB, L, D)
    w = w_ref[...].astype(jnp.float32).reshape(1, 1, -1)      # (1, 1, D)

    # Linear(D -> 1) for all TB*L rows, plus additive mask (+bias).
    scores = jnp.sum(c * w, axis=-1, keepdims=True) + mask_ref[...]   # (TB, L, 1)

    # Softmax over the sequence axis (torch dim=1). Fully-masked rows give
    # NaN, exactly like the PyTorch reference.
    smax = jnp.max(scores, axis=1, keepdims=True)             # (TB, 1, 1)
    e = jnp.exp(scores - smax)                                # (TB, L, 1)
    denom = jnp.sum(e, axis=1, keepdims=True)                 # (TB, 1, 1)
    attn = e / denom                                          # (TB, L, 1)

    # code_vector[b, :] = sum_l attn[b, l] * contexts[b, l, :]
    out_ref[...] = jnp.sum(c * attn, axis=1).astype(out_ref.dtype)    # (TB, D)


def _choose_block_rows(batch, seq, d_model, itemsize, target_bytes=1 << 20):
    """Batch rows per grid step: big enough to amortize per-step overhead
    (MiB-class blocks sit on the HBM-roofline plateau), small enough that the
    double-buffered input block plus f32 temporaries stay far under the scoped
    VMEM default on every generation (including v7x's 64 MiB VMEM)."""
    tb = target_bytes // max(1, seq * d_model * itemsize)
    tb = max(8, (tb // 8) * 8)
    # Prefer >= 2 grid steps when the batch allows, so v7x's two TensorCores
    # both get work on the "parallel" batch axis.
    tb = min(tb, max(8, ((batch // 2) // 8) * 8))
    return tb


def attention_layer(contexts, mask_bool, weight, bias, *,
                    contexts_transfer_dtype=None, block_rows=None):
    """contexts: (B, L, D), mask_bool: (B, L) bool,
       weight: (1, D), bias: (1,)  ->  code_vector (B, D) float32."""
    B, L, D = contexts.shape

    ctx = contexts
    if contexts_transfer_dtype is not None:
        # e.g. jnp.bfloat16 on v6e/v7x: halves HBM traffic; kernel upcasts.
        ctx = ctx.astype(contexts_transfer_dtype)

    TB = block_rows or _choose_block_rows(B, L, D, ctx.dtype.itemsize)
    B_pad = ((B + TB - 1) // TB) * TB

    # Additive mask with the Linear bias folded in:
    #   unmasked -> bias, masked -> -inf.
    # Identical to (x @ w + b) + masked_fill(-inf):  (x.w + b) + 0 == x.w + b,
    # and -inf absorbs the bias on masked positions.
    neg_inf = jnp.asarray(-jnp.inf, jnp.float32)
    bias_f = bias.astype(jnp.float32)[0]
    mask_add = jnp.where(mask_bool, neg_inf, bias_f)[..., None]        # (B, L, 1)

    if B_pad != B:
        # Padded rows: unmasked (finite) scores over zero contexts -> their
        # (discarded) outputs are exactly zero, no NaNs leak in.
        ctx = jnp.pad(ctx, ((0, B_pad - B), (0, 0), (0, 0)))
        mask_add = jnp.pad(mask_add, ((0, B_pad - B), (0, 0), (0, 0)))

    w2 = weight.reshape(1, D).astype(jnp.float32)

    out = pl.pallas_call(
        _attention_kernel,
        out_shape=jax.ShapeDtypeStruct((B_pad, D), jnp.float32),
        grid_spec=pltpu.PrefetchScalarGridSpec(
            num_scalar_prefetch=0,
            grid=(B_pad // TB,),
            in_specs=[
                pl.BlockSpec((TB, L, D), lambda g: (g, 0, 0)),
                pl.BlockSpec((TB, L, 1), lambda g: (g, 0, 0)),
                pl.BlockSpec((1, D), lambda g: (0, 0)),   # constant -> resident
            ],
            out_specs=pl.BlockSpec((TB, D), lambda g: (g, 0)),
        ),
        compiler_params=pltpu.CompilerParams(
            dimension_semantics=("parallel",)),
    )(ctx, mask_add, w2)
    return out[:B]


def attention_layer_ref(contexts, mask_bool, weight, bias):
    """Pure-JAX reference mirroring the PyTorch forward."""
    contexts = contexts.astype(jnp.float32)
    scores = jnp.sum(contexts * weight.reshape(1, 1, -1), axis=-1,
                     keepdims=True) + bias                              # (B, L, 1)
    scores = scores + jnp.where(mask_bool, -jnp.inf, 0.0)[..., None]
    attn = jax.nn.softmax(scores, axis=1)
    return jnp.sum(contexts * attn, axis=1)                             # (B, D)


if __name__ == "__main__":
    key = jax.random.PRNGKey(0)
    k_ctx, k_mask, k_w, k_b = jax.random.split(key, 4)

    B, L, D = 32, 64, 128  # batch, input_length, d_model (context_sz)

    contexts = jax.random.normal(k_ctx, (B, L, D), dtype=jnp.float32)
    # Random boolean mask; ensure at least one unmasked position per row
    # (a fully-masked row would give NaN, exactly as in the PyTorch module).
    mask = jax.random.bernoulli(k_mask, p=0.3, shape=(B, L))
    mask = mask.at[:, 0].set(False)

    # nn.Linear(d_model, 1): weight (1, d_model), bias (1,)
    bound = 1.0 / jnp.sqrt(jnp.float32(D))
    weight = jax.random.uniform(k_w, (1, D), jnp.float32, -bound, bound)
    bias = jax.random.uniform(k_b, (1,), jnp.float32, -bound, bound)

    out = attention_layer(contexts, mask, weight, bias)
    out = jax.block_until_ready(out)

    ref = attention_layer_ref(contexts, mask, weight, bias)
    assert out.shape == (B, D)
    assert jnp.allclose(out, ref, atol=1e-5, rtol=1e-5), "mismatch vs reference"

    print("KERNEL_OK")
</pallas_src>

<mosaic_0001>
module attributes {stable_mosaic.version = 11 : i64} {
  func.func @_attention_kernel(%arg0: i32, %arg1: memref<16x64x128xf32, #tpu.memory_space<vmem>>, %arg2: memref<16x64x1xf32, #tpu.memory_space<vmem>>, %arg3: memref<1x128xf32, #tpu.memory_space<vmem>>, %arg4: memref<16x128xf32, #tpu.memory_space<vmem>>) attributes {dimension_semantics = [#tpu.dimension_semantics<parallel>], iteration_bounds = array<i64: 2>, scalar_prefetch = 0 : i64, scratch_operands = 0 : i64, tpu.core_type = #tpu.core_type<tc>, window_params = [{transform_indices = @transform_0, window_bounds = array<i64: 16, 64, 128>}, {transform_indices = @transform_1, window_bounds = array<i64: 16, 64, 1>}, {pipeline_mode = #tpu.pipeline_mode<synchronous>, transform_indices = @transform_2, window_bounds = array<i64: 1, 128>}, {transform_indices = @transform_3, window_bounds = array<i64: 16, 128>}]} {
    %c0 = arith.constant 0 : index
    %c0_0 = arith.constant 0 : index
    %c0_1 = arith.constant 0 : index
    %0 = vector.load %arg1[%c0, %c0_0, %c0_1] : memref<16x64x128xf32, #tpu.memory_space<vmem>>, vector<16x64x128xf32>
    %c0_2 = arith.constant 0 : index
    %c0_3 = arith.constant 0 : index
    %1 = vector.load %arg3[%c0_2, %c0_3] : memref<1x128xf32, #tpu.memory_space<vmem>>, vector<1x128xf32>
    %2 = vector.shape_cast %1 : vector<1x128xf32> to vector<1x1x128xf32>
    %3 = vector.broadcast %2 : vector<1x1x128xf32> to vector<16x64x128xf32>
    %4 = arith.mulf %0, %3 : vector<16x64x128xf32>
    %cst = arith.constant dense<0.000000e+00> : vector<16x64xf32>
    %5 = vector.multi_reduction <add>, %4, %cst [2] : vector<16x64x128xf32> to vector<16x64xf32>
    %6 = vector.shape_cast %5 : vector<16x64xf32> to vector<16x64x1xf32>
    %c0_4 = arith.constant 0 : index
    %c0_5 = arith.constant 0 : index
    %c0_6 = arith.constant 0 : index
    %7 = vector.load %arg2[%c0_4, %c0_5, %c0_6] : memref<16x64x1xf32, #tpu.memory_space<vmem>>, vector<16x64x1xf32>
    %8 = arith.addf %6, %7 : vector<16x64x1xf32>
    %cst_7 = arith.constant dense<0xFF800000> : vector<16x1xf32>
    %9 = vector.multi_reduction <maximumf>, %8, %cst_7 [1] : vector<16x64x1xf32> to vector<16x1xf32>
    %10 = vector.shape_cast %9 : vector<16x1xf32> to vector<16x1x1xf32>
    %11 = vector.broadcast %10 : vector<16x1x1xf32> to vector<16x64x1xf32>
    %12 = arith.subf %8, %11 : vector<16x64x1xf32>
    %13 = math.exp %12 : vector<16x64x1xf32>
    %cst_8 = arith.constant dense<0.000000e+00> : vector<16x1xf32>
    %14 = vector.multi_reduction <add>, %13, %cst_8 [1] : vector<16x64x1xf32> to vector<16x1xf32>
    %15 = vector.shape_cast %14 : vector<16x1xf32> to vector<16x1x1xf32>
    %16 = vector.broadcast %15 : vector<16x1x1xf32> to vector<16x64x1xf32>
    %17 = arith.divf %13, %16 : vector<16x64x1xf32>
    %18 = vector.broadcast %17 : vector<16x64x1xf32> to vector<16x64x128xf32>
    %19 = arith.mulf %0, %18 : vector<16x64x128xf32>
    %cst_9 = arith.constant dense<0.000000e+00> : vector<16x128xf32>
    %20 = vector.multi_reduction <add>, %19, %cst_9 [1] : vector<16x64x128xf32> to vector<16x128xf32>
    %c0_10 = arith.constant 0 : index
    %c0_11 = arith.constant 0 : index
    %21 = vector.load %arg4[%c0_10, %c0_11] : memref<16x128xf32, #tpu.memory_space<vmem>>, vector<16x128xf32>
    tpu.vector_store %arg4[%c0_10, %c0_11], %20 {strides = array<i32>} : memref<16x128xf32, #tpu.memory_space<vmem>>, vector<16x128xf32>,
    return
  }
  func.func @transform_0(%arg0: i32) -> (i32, i32, i32) {
    %c0_i32 = arith.constant 0 : i32
    %c0_i32_0 = arith.constant 0 : i32
    %c0_i32_1 = arith.constant 0 : i32
    return %arg0, %c0_i32, %c0_i32_0 : i32, i32, i32
  }
  func.func @transform_1(%arg0: i32) -> (i32, i32, i32) {
    %c0_i32 = arith.constant 0 : i32
    %c0_i32_0 = arith.constant 0 : i32
    %c0_i32_1 = arith.constant 0 : i32
    return %arg0, %c0_i32, %c0_i32_0 : i32, i32, i32
  }
  func.func @transform_2(%arg0: i32) -> (i32, i32) {
    %c0_i32 = arith.constant 0 : i32
    %c0_i32_0 = arith.constant 0 : i32
    %c0_i32_1 = arith.constant 0 : i32
    return %c0_i32, %c0_i32_0 : i32, i32
  }
  func.func @transform_3(%arg0: i32) -> (i32, i32) {
    %c0_i32 = arith.constant 0 : i32
    %c0_i32_0 = arith.constant 0 : i32
    return %arg0, %c0_i32 : i32, i32
  }
}

</mosaic_0001>

<bundles_post_ra>
// kernel: tpu_custom_call.1
= control target key start
LH: loop header
LB: loop body
LE: loop exit
PB: predicated region body
PF: predicated region fallthrough
CT: control target
= control target key end

     0   :  { %8 = vsyncpa [#allocation3], 0  ;;  %s6767_s0 = inlined_call_operand.vmem [shape: f32[32,64,128], index: 0, kind: input, shape index: {}]   ;;  %s6768_s1 = inlined_call_operand.vmem [shape: f32[32,64,1], index: 1, kind: input, shape index: {}]   ;;  %s6769_s2 = inlined_call_operand.vmem [shape: f32[1,128], index: 2, kind: input, shape index: {}]   ;;  %s6770_s3 = inlined_call_operand.hbm [shape: f32[32,128], index: 3, kind: output, shape index: {}]  }
   0x1   :  { %10 = vsyncpa [#allocation3 + $0x1], 0  ;;  %s3850_s12 = smov 0   ;;  %s3852_s13 = smov 0  }
   0x2   :  { %s3854_s14 = smov 0   ;;  %s3856_s15 = smov 0  }
   0x3 LB: > { %s3871_s16 = sadd.s32 4294967295, %s3824_s15   ;;  %s3281_s17 = sadd.s32 4294967294, %s3824_s15   ;;  %s3824_s15 = sphi %s3856_s15, %s7054_s15   ;;  %s3820_s14 = sphi %s3854_s14, %s7053_s14   ;;  %s3816_s13 = sphi %s3852_s13, %s7052_s13   ;;  %s3812_s12 = sphi %s3850_s12, %s7051_s12  }
   0x4   : > { %s3875_s18 = sadd.s32 1, %s3824_s15   ;;  %s96_s19 = sadd.s32 1, %s3820_s14 }
   0x5   : > { %s93_s20 = ssub.s32 %s3824_s15, %s3875_s18  ;;  %p106_p0 = scmp.ne.s32.totalorder %s3820_s14, %s3816_s13 }
   0x6   : > { %p94_p1 = scmp.eq.s32.totalorder %s93_s20, 0  ;;  %p107_p2 = scmp.eq.s32.totalorder %s3871_s16, 1 }
   0x7   : > { %p112_p3 = scmp.ne.s32.totalorder %s3816_s13, %s3812_s12  ;;  %p113_p4 = scmp.eq.s32.totalorder %s3281_s17, 1 }
   0x8   : > { %s3886_s21 = scalar_select %p94_p1, %s3820_s14, %s96_s19  }
   0x9   : > { %p3888_p5 = por %p107_p2, %p106_p0  ;;  %p3892_p6 = por %p113_p4, %p112_p3 }
   0xa   : > { %p3284_p7 = scmp.ge.s32.totalorder %s3824_s15, 1  ;;  %p154_p8 = scmp.lt.s32.totalorder %s3824_s15, 3 }
   0xc   : > { %p155_p9 = pnand %p3284_p7, %p154_p8 }
   0xe   : > { %158 = sbr.rel (%p155_p9) target bundleno = 780 (0x30c), region = 32 }
  0x15   : > { %s3286_s24 = sshll.u32 %s3871_s16, 4  ;;  %v3905_v0 = vld [vmem:[%s6769_s2] ss:$0 sm:$0xff]  ;;  %vm975_vm0 = vcmask 7168   ;;  %vm3168_vm1 = vcmask 1041409   ;;  %vm3170_vm2 = vcmask 1042434  }
  0x16   : > { %p186_p10 = scmp.lt.s32.totalorder %s3286_s24, 31  ;;  %vm3172_vm3 = vcmask 1043459   ;;  %s182_s9 = sand.u32 1, %s3816_s13   ;;  %vm3174_vm4 = vcmask 1044484   ;;  %vm3176_vm5 = vcmask 1045509   ;;  %vm3178_vm6 = vcmask 1046534  }
  0x17   : > { %s3285_s10 = sshll.u32 %s182_s9, 4  ;;  %vm3180_vm7 = vcmask 1047559   ;;  %s3300_s17 = sshll.u32 %s3871_s16, 8 }
  0x18   : > { %s7056_s24 = smov (!%p186_p10, %s3286_s24), 31  ;;  %s6600_s11 = scalar_lea.vmem [#allocation2], %s3285_s10 }
  0x19   : > { %s3298_s25 = sshll.u32 %s7056_s24, 6  ;;  %s3207_s19 = sshll.u32 %s6600_s11, 4  ;;  %s6719_s19 = int_to_ptr.vmem [resolvable:$true] %s3207_s19 }
  0x1a   : > { %s3912_s30 = scalar_lea.vmem %s6767_s0, %s3298_s25  ;;  %s4065_s6 = scalar_lea.vmem %s6768_s1, %s3298_s25 }
  0x1b   : > { %v202_v1 = vld [vmem:[%s3912_s30 + $0x10] sm:$0xff]  ;;  %v200_v2 = vld [vmem:[%s3912_s30] sm:$0xff]  ;;  %v203_v3 = vld [vmem:[%s3912_s30 + $0x18] sm:$0xff]  ;;  %s6717_s25 = scalar_lea.hbm %s6770_s3, %s3300_s17  ;;  %s6726_s16 = scalar_lea.sflag [#allocation3], %s182_s9 }
  0x1c   : > { %v337_v4 = vmul.f32 %v3905_v0, %v202_v1  ;;  %v335_v5 = vmul.f32 %v3905_v0, %v200_v2  ;;  %v201_v6 = vld [vmem:[%s3912_s30 + $0x8] sm:$0xff]  ;;  %v338_v7 = vmul.f32 %v3905_v0, %v203_v3  ;;  %v204_v10 = vld [vmem:[%s3912_s30 + $0x20] sm:$0xff]  ;;  %v207_v13 = vld [vmem:[%s3912_s30 + $0x38] sm:$0xff]  ;;  %s3762_s26 = scalar_lea.vmem %s6719_s19, 256  ;;  %s3827_s27 = smov [#allocation2]  }
  0x1d   : > { %v336_v8 = vmul.f32 %v3905_v0, %v201_v6  ;;  %v205_v9 = vld [vmem:[%s3912_s30 + $0x28] sm:$0xff]  ;;  %v339_v12 = vmul.f32 %v3905_v0, %v204_v10  ;;  %v206_v14 = vld [vmem:[%s3912_s30 + $0x30] sm:$0xff]  ;;  %v342_v15 = vmul.f32 %v3905_v0, %v207_v13  ;;  %v208_v18 = vld [vmem:[%s3912_s30 + $0x40] sm:$0xff]  ;;  %p3763_p11 = scmp.ne.s32.totalorder %s6719_s19, %s3762_s26  ;;  %s3766_s28 = sshll.u32 %s3827_s27, 4  ;;  %s3767_s28 = int_to_ptr.vmem [resolvable:$false] %s3766_s28 }
  0x1e   : > { %467 = vadd.xlane.f32.xlu1 %v337_v4  ;;  %463 = vadd.xlane.f32.xlu0 %v335_v5  ;;  %v340_v11 = vmul.f32 %v3905_v0, %v205_v9  ;;  %v341_v16 = vmul.f32 %v3905_v0, %v206_v14  ;;  %v209_v17 = vld [vmem:[%s3912_s30 + $0x48] sm:$0xff]  ;;  %v343_v20 = vmul.f32 %v3905_v0, %v208_v18  ;;  %v211_v21 = vld [vmem:[%s3912_s30 + $0x58] sm:$0xff]  ;;  %v210_v22 = vld [vmem:[%s3912_s30 + $0x50] sm:$0xff]  ;;  %s3768_s29 = scalar_lea.vmem %s3767_s28, 512  ;;  %p3769_p0 = scmp.lt.s32.totalorder %s6719_s19, %s3767_s28 }
  0x1f   : > { %v344_v19 = vmul.f32 %v3905_v0, %v209_v17  ;;  %v346_v23 = vmul.f32 %v3905_v0, %v211_v21  ;;  %v345_v24 = vmul.f32 %v3905_v0, %v210_v22  ;;  %v213_v25 = vld [vmem:[%s3912_s30 + $0x68] sm:$0xff]  ;;  %v212_v26 = vld [vmem:[%s3912_s30 + $0x60] sm:$0xff]  ;;  %v215_v29 = vld [vmem:[%s3912_s30 + $0x78] sm:$0xff]  ;;  %p3764_p12 = pnand %p3763_p11, %p3888_p5  ;;  %p3770_p1 = scmp.lt.s32.totalorder %s3768_s29, %s3762_s26 }
  0x20   : > { %v348_v27 = vmul.f32 %v3905_v0, %v213_v25  ;;  %v347_v28 = vmul.f32 %v3905_v0, %v212_v26  ;;  %v214_v30 = vld [vmem:[%s3912_s30 + $0x70] sm:$0xff]  ;;  %v350_v31 = vmul.f32 %v3905_v0, %v215_v29  ;;  %v217_v33 = vld [vmem:[%s3912_s30 + $0x88] sm:$0xff]  ;;  %v216_v34 = vld [vmem:[%s3912_s30 + $0x80] sm:$0xff] }
  0x21   : > { %v349_v32 = vmul.f32 %v3905_v0, %v214_v30  ;;  %v352_v35 = vmul.f32 %v3905_v0, %v217_v33  ;;  %v351_v36 = vmul.f32 %v3905_v0, %v216_v34  ;;  %v219_v37 = vld [vmem:[%s3912_s30 + $0x98] sm:$0xff]  ;;  %v218_v38 = vld [vmem:[%s3912_s30 + $0x90] sm:$0xff]  ;;  %v221_v41 = vld [vmem:[%s3912_s30 + $0xa8] sm:$0xff]  ;;  %p3765_p13 = pneg %p3764_p12  ;;  %p3771_p2 = por %p3770_p1, %p3769_p0 }
  0x22   : > { %469 = vadd.xlane.f32.xlu1 %v338_v7  ;;  %465 = vadd.xlane.f32.xlu0 %v336_v8  ;;  %v354_v39 = vmul.f32 %v3905_v0, %v219_v37  ;;  %v353_v40 = vmul.f32 %v3905_v0, %v218_v38  ;;  %v220_v42 = vld [vmem:[%s3912_s30 + $0xa0] sm:$0xff]  ;;  %v356_v43 = vmul.f32 %v3905_v0, %v221_v41  ;;  %v223_v45 = vld [vmem:[%s3912_s30 + $0xb8] sm:$0xff]  ;;  %v222_v46 = vld [vmem:[%s3912_s30 + $0xb0] sm:$0xff] }
  0x23   : > { %v355_v44 = vmul.f32 %v3905_v0, %v220_v42  ;;  %v358_v47 = vmul.f32 %v3905_v0, %v223_v45  ;;  %v357_v48 = vmul.f32 %v3905_v0, %v222_v46  ;;  %v225_v49 = vld [vmem:[%s3912_s30 + $0xc8] sm:$0xff]  ;;  %v224_v50 = vld [vmem:[%s3912_s30 + $0xc0] sm:$0xff]  ;;  %v227_v53 = vld [vmem:[%s3912_s30 + $0xd8] sm:$0xff]  ;;  %p3772_p3 = pnand %p3771_p2, %p3765_p13 }
  0x24   : > { %v360_v51 = vmul.f32 %v3905_v0, %v225_v49  ;;  %v359_v52 = vmul.f32 %v3905_v0, %v224_v50  ;;  %v226_v54 = vld [vmem:[%s3912_s30 + $0xd0] sm:$0xff]  ;;  %v362_v55 = vmul.f32 %v3905_v0, %v227_v53  ;;  %v229_v57 = vld [vmem:[%s3912_s30 + $0xe8] sm:$0xff]  ;;  %v228_v58 = vld [vmem:[%s3912_s30 + $0xe0] sm:$0xff] }
  0x25   : > { %v361_v56 = vmul.f32 %v3905_v0, %v226_v54  ;;  %v364_v59 = vmul.f32 %v3905_v0, %v229_v57  ;;  %v363_v60 = vmul.f32 %v3905_v0, %v228_v58  ;;  %v231_v61 = vld [vmem:[%s3912_s30 + $0xf8] sm:$0xff]  ;;  %v230_v62 = vld [vmem:[%s3912_s30 + $0xf0] sm:$0xff]  ;;  %v233_v2 = vld [vmem:[%s3912_s30 + $0x108] sm:$0xff] }
  0x26   : > { %473 = vadd.xlane.f32.xlu1 %v340_v11  ;;  %471 = vadd.xlane.f32.xlu0 %v339_v12  ;;  %v366_v63 = vmul.f32 %v3905_v0, %v231_v61  ;;  %v365_v1 = vmul.f32 %v3905_v0, %v230_v62  ;;  %v232_v3 = vld [vmem:[%s3912_s30 + $0x100] sm:$0xff]  ;;  %v368_v4 = vmul.f32 %v3905_v0, %v233_v2  ;;  %v235_v6 = vld [vmem:[%s3912_s30 + $0x118] sm:$0xff]  ;;  %v234_v7 = vld [vmem:[%s3912_s30 + $0x110] sm:$0xff] }
  0x27   : > { %v367_v5 = vmul.f32 %v3905_v0, %v232_v3  ;;  %v370_v8 = vmul.f32 %v3905_v0, %v235_v6  ;;  %v369_v9 = vmul.f32 %v3905_v0, %v234_v7  ;;  %v237_v10 = vld [vmem:[%s3912_s30 + $0x128] sm:$0xff]  ;;  %v236_v11 = vld [vmem:[%s3912_s30 + $0x120] sm:$0xff]  ;;  %v239_v14 = vld [vmem:[%s3912_s30 + $0x138] sm:$0xff] }
  0x28   : > { %v372_v12 = vmul.f32 %v3905_v0, %v237_v10  ;;  %v371_v13 = vmul.f32 %v3905_v0, %v236_v11  ;;  %v241_v18 = vld [vmem:[%s3912_s30 + $0x148] sm:$0xff]  ;;  %v243_v22 = vld [vmem:[%s3912_s30 + $0x158] sm:$0xff] }
  0x29   : > { %v245_v26 = vld [vmem:[%s3912_s30 + $0x168] sm:$0xff]  ;;  %v247_v30 = vld [vmem:[%s3912_s30 + $0x178] sm:$0xff] }
  0x2a   : > { %477 = vadd.xlane.f32.xlu1 %v342_v15  ;;  %475 = vadd.xlane.f32.xlu0 %v341_v16  ;;  %v238_v15 = vld [vmem:[%s3912_s30 + $0x130] sm:$0xff]  ;;  %v374_v16 = vmul.f32 %v3905_v0, %v239_v14  ;;  %v249_v34 = vld [vmem:[%s3912_s30 + $0x188] sm:$0xff]  ;;  %v251_v38 = vld [vmem:[%s3912_s30 + $0x198] sm:$0xff] }
  0x2b   : > { %v373_v17 = vmul.f32 %v3905_v0, %v238_v15  ;;  %v253_v42 = vld [vmem:[%s3912_s30 + $0x1a8] sm:$0xff]  ;;  %v255_v46 = vld [vmem:[%s3912_s30 + $0x1b8] sm:$0xff] }
  0x2c   : > { %v257_v50 = vld [vmem:[%s3912_s30 + $0x1c8] sm:$0xff]  ;;  %v259_v54 = vld [vmem:[%s3912_s30 + $0x1d8] sm:$0xff] }
  0x2d   : > { %v261_v58 = vld [vmem:[%s3912_s30 + $0x1e8] sm:$0xff]  ;;  %v263_v62 = vld [vmem:[%s3912_s30 + $0x1f8] sm:$0xff] }
  0x2e   : > { %481 = vadd.xlane.f32.xlu1 %v344_v19  ;;  %479 = vadd.xlane.f32.xlu0 %v343_v20  ;;  %v240_v19 = vld [vmem:[%s3912_s30 + $0x140] sm:$0xff]  ;;  %v376_v20 = vmul.f32 %v3905_v0, %v241_v18  ;;  %v265_v3 = vld [vmem:[%s3912_s30 + $0x208] sm:$0xff]  ;;  %v267_v7 = vld [vmem:[%s3912_s30 + $0x218] sm:$0xff] }
  0x2f   : > { %v375_v21 = vmul.f32 %v3905_v0, %v240_v19  ;;  %v269_v11 = vld [vmem:[%s3912_s30 + $0x228] sm:$0xff]  ;;  %v271_v15 = vld [vmem:[%s3912_s30 + $0x238] sm:$0xff] }
  0x30   : > { %v273_v19 = vld [vmem:[%s3912_s30 + $0x248] sm:$0xff] }
  0x32   : > { %485 = vadd.xlane.f32.xlu1 %v346_v23  ;;  %483 = vadd.xlane.f32.xlu0 %v345_v24  ;;  %v242_v23 = vld [vmem:[%s3912_s30 + $0x150] sm:$0xff]  ;;  %v378_v24 = vmul.f32 %v3905_v0, %v243_v22  ;;  %v408_v22 = vmul.f32 %v3905_v0, %v273_v19 }
  0x33   : > { %v377_v25 = vmul.f32 %v3905_v0, %v242_v23 }
  0x36   : > { %489 = vadd.xlane.f32.xlu1 %v348_v27  ;;  %487 = vadd.xlane.f32.xlu0 %v347_v28  ;;  %v244_v27 = vld [vmem:[%s3912_s30 + $0x160] sm:$0xff]  ;;  %v380_v28 = vmul.f32 %v3905_v0, %v245_v26  ;;  %v275_v26 = vld [vmem:[%s3912_s30 + $0x258] sm:$0xff] }
  0x37   : > { %v379_v29 = vmul.f32 %v3905_v0, %v244_v27  ;;  %v274_v27 = vld [vmem:[%s3912_s30 + $0x250] sm:$0xff] }
  0x3a   : > { %493 = vadd.xlane.f32.xlu1 %v350_v31  ;;  %491 = vadd.xlane.f32.xlu0 %v349_v32  ;;  %v246_v31 = vld [vmem:[%s3912_s30 + $0x170] sm:$0xff]  ;;  %v382_v32 = vmul.f32 %v3905_v0, %v247_v30  ;;  %v720_v30 = vld [vmem:[%s4065_s6 + $0x8] sm:$0xff] }
  0x3b   : > { %v381_v33 = vmul.f32 %v3905_v0, %v246_v31  ;;  %v410_v31 = vmul.f32 %v3905_v0, %v275_v26 }
  0x3e   : > { %497 = vadd.xlane.f32.xlu1 %v352_v35  ;;  %495 = vadd.xlane.f32.xlu0 %v351_v36  ;;  %v248_v35 = vld [vmem:[%s3912_s30 + $0x180] sm:$0xff]  ;;  %v384_v36 = vmul.f32 %v3905_v0, %v249_v34 }
  0x3f   : > { %v383_v37 = vmul.f32 %v3905_v0, %v248_v35 }
  0x42   : > { %501 = vadd.xlane.f32.xlu1 %v354_v39  ;;  %499 = vadd.xlane.f32.xlu0 %v353_v40  ;;  %v250_v39 = vld [vmem:[%s3912_s30 + $0x190] sm:$0xff]  ;;  %v386_v40 = vmul.f32 %v3905_v0, %v251_v38 }
  0x43   : > { %v385_v41 = vmul.f32 %v3905_v0, %v250_v39 }
  0x46   : > { %505 = vadd.xlane.f32.xlu1 %v356_v43  ;;  %503 = vadd.xlane.f32.xlu0 %v355_v44  ;;  %v252_v43 = vld [vmem:[%s3912_s30 + $0x1a0] sm:$0xff]  ;;  %v388_v44 = vmul.f32 %v3905_v0, %v253_v42 }
  0x47   : > { %v387_v45 = vmul.f32 %v3905_v0, %v252_v43 }
  0x4a   : > { %509 = vadd.xlane.f32.xlu1 %v358_v47  ;;  %507 = vadd.xlane.f32.xlu0 %v357_v48  ;;  %v254_v47 = vld [vmem:[%s3912_s30 + $0x1b0] sm:$0xff]  ;;  %v390_v48 = vmul.f32 %v3905_v0, %v255_v46  ;;  %v279_v46 = vld [vmem:[%s3912_s30 + $0x278] sm:$0xff] }
  0x4b   : > { %v389_v49 = vmul.f32 %v3905_v0, %v254_v47 }
  0x4e   : > { %513 = vadd.xlane.f32.xlu1 %v360_v51  ;;  %511 = vadd.xlane.f32.xlu0 %v359_v52  ;;  %v256_v51 = vld [vmem:[%s3912_s30 + $0x1c0] sm:$0xff]  ;;  %v392_v52 = vmul.f32 %v3905_v0, %v257_v50 }
  0x4f   : > { %v391_v53 = vmul.f32 %v3905_v0, %v256_v51  ;;  %v278_v51 = vld [vmem:[%s3912_s30 + $0x270] sm:$0xff] }
  0x52   : > { %517 = vadd.xlane.f32.xlu1 %v362_v55  ;;  %515 = vadd.xlane.f32.xlu0 %v361_v56  ;;  %v258_v55 = vld [vmem:[%s3912_s30 + $0x1d0] sm:$0xff]  ;;  %v394_v56 = vmul.f32 %v3905_v0, %v259_v54 }
  0x53   : > { %v393_v57 = vmul.f32 %v3905_v0, %v258_v55  ;;  %v725_v55 = vld [vmem:[%s4065_s6 + $0x30] sm:$0xff] }
  0x56   : > { %521 = vadd.xlane.f32.xlu1 %v364_v59  ;;  %519 = vadd.xlane.f32.xlu0 %v363_v60  ;;  %v260_v59 = vld [vmem:[%s3912_s30 + $0x1e0] sm:$0xff]  ;;  %v396_v60 = vmul.f32 %v3905_v0, %v261_v58 }
  0x57   : > { %v395_v61 = vmul.f32 %v3905_v0, %v260_v59 }
  0x5a   : > { %525 = vadd.xlane.f32.xlu1 %v366_v63  ;;  %523 = vadd.xlane.f32.xlu0 %v365_v1  ;;  %v262_v63 = vld [vmem:[%s3912_s30 + $0x1f0] sm:$0xff]  ;;  %v398_v1 = vmul.f32 %v3905_v0, %v263_v62 }
  0x5b   : > { %v397_v2 = vmul.f32 %v3905_v0, %v262_v63  ;;  %v726_v63 = vld [vmem:[%s4065_s6 + $0x38] sm:$0xff] }
  0x5e   : > { %529 = vadd.xlane.f32.xlu1 %v368_v4  ;;  %527 = vadd.xlane.f32.xlu0 %v367_v5  ;;  %v264_v4 = vld [vmem:[%s3912_s30 + $0x200] sm:$0xff]  ;;  %v400_v5 = vmul.f32 %v3905_v0, %v265_v3 }
  0x5f   : > { %v399_v6 = vmul.f32 %v3905_v0, %v264_v4  ;;  %v280_v3 = vld [vmem:[%s3912_s30 + $0x280] sm:$0xff] }
  0x62   : > { %533 = vadd.xlane.f32.xlu1 %v370_v8  ;;  %531 = vadd.xlane.f32.xlu0 %v369_v9  ;;  %v266_v8 = vld [vmem:[%s3912_s30 + $0x210] sm:$0xff]  ;;  %v402_v9 = vmul.f32 %v3905_v0, %v267_v7  ;;  %v727_v7 = vld [vmem:[%s4065_s6 + $0x40] sm:$0xff] }
  0x63   : > { %v401_v10 = vmul.f32 %v3905_v0, %v266_v8 }
  0x66   : > { %537 = vadd.xlane.f32.xlu1 %v372_v12  ;;  %535 = vadd.xlane.f32.xlu0 %v371_v13  ;;  %v268_v12 = vld [vmem:[%s3912_s30 + $0x220] sm:$0xff]  ;;  %v404_v13 = vmul.f32 %v3905_v0, %v269_v11 }
  0x67   : > { %v403_v14 = vmul.f32 %v3905_v0, %v268_v12  ;;  %v415_v12 = vmul.f32 %v3905_v0, %v280_v3  ;;  %v291_v3 = vld [vmem:[%s3912_s30 + $0x2d8] sm:$0xff] }
  0x6a   : > { %541 = vadd.xlane.f32.xlu1 %v374_v16  ;;  %539 = vadd.xlane.f32.xlu0 %v373_v17  ;;  %v270_v16 = vld [vmem:[%s3912_s30 + $0x230] sm:$0xff]  ;;  %v406_v17 = vmul.f32 %v3905_v0, %v271_v15 }
  0x6b   : > { %v405_v18 = vmul.f32 %v3905_v0, %v270_v16 }
  0x6e   : > { %545 = vadd.xlane.f32.xlu1 %v376_v20  ;;  %543 = vadd.xlane.f32.xlu0 %v375_v21  ;;  %v272_v20 = vld [vmem:[%s3912_s30 + $0x240] sm:$0xff] }
  0x6f   : > { %v719_v21 = vld [vmem:[%s4065_s6] sm:$0xff]  ;;  %v407_v23 = vmul.f32 %v3905_v0, %v272_v20 }
  0x72   : > { %549 = vadd.xlane.f32.xlu1 %v378_v24  ;;  %547 = vadd.xlane.f32.xlu0 %v377_v25 }
  0x76   : > { %553 = vadd.xlane.f32.xlu1 %v380_v28  ;;  %551 = vadd.xlane.f32.xlu0 %v379_v29  ;;  %v721_v29 = vld [vmem:[%s4065_s6 + $0x10] sm:$0xff] }
  0x7a   : > { %557 = vadd.xlane.f32.xlu1 %v382_v32  ;;  %555 = vadd.xlane.f32.xlu0 %v381_v33  ;;  %v409_v32 = vmul.f32 %v3905_v0, %v274_v27  ;;  %v722_v33 = vld [vmem:[%s4065_s6 + $0x18] sm:$0xff] }
  0x7e   : > { %561 = vadd.xlane.f32.xlu1 %v384_v36  ;;  %559 = vadd.xlane.f32.xlu0 %v383_v37  ;;  %v277_v36 = vld [vmem:[%s3912_s30 + $0x268] sm:$0xff]  ;;  %v276_v37 = vld [vmem:[%s3912_s30 + $0x260] sm:$0xff] }
  0x82   : > { %565 = vadd.xlane.f32.xlu1 %v386_v40  ;;  %563 = vadd.xlane.f32.xlu0 %v385_v41  ;;  %v723_v41 = vld [vmem:[%s4065_s6 + $0x20] sm:$0xff] }
  0x86   : > { %569 = vadd.xlane.f32.xlu1 %v388_v44  ;;  %567 = vadd.xlane.f32.xlu0 %v387_v45  ;;  %v412_v44 = vmul.f32 %v3905_v0, %v277_v36  ;;  %v411_v45 = vmul.f32 %v3905_v0, %v276_v37 }
  0x8a   : > { %573 = vadd.xlane.f32.xlu1 %v390_v48  ;;  %571 = vadd.xlane.f32.xlu0 %v389_v49  ;;  %v724_v48 = vld [vmem:[%s4065_s6 + $0x28] sm:$0xff] }
  0x8e   : > { %577 = vadd.xlane.f32.xlu1 %v392_v52  ;;  %575 = vadd.xlane.f32.xlu0 %v391_v53 }
  0x92   : > { %581 = vadd.xlane.f32.xlu1 %v394_v56  ;;  %579 = vadd.xlane.f32.xlu0 %v393_v57  ;;  %v414_v56 = vmul.f32 %v3905_v0, %v279_v46 }
  0x96   : > { %585 = vadd.xlane.f32.xlu1 %v396_v60  ;;  %583 = vadd.xlane.f32.xlu0 %v395_v61  ;;  %v413_v60 = vmul.f32 %v3905_v0, %v278_v51  ;;  %v281_v61 = vld [vmem:[%s3912_s30 + $0x288] sm:$0xff]  ;;  %v286_v51 = vld [vmem:[%s3912_s30 + $0x2b0] sm:$0xff] }
  0x97   : > { %v416_v8 = vmul.f32 %v3905_v0, %v281_v61  ;;  %v733_v61 = vld [vmem:[%s4065_s6 + $0x70] sm:$0xff] }
  0x9a   : > { %589 = vadd.xlane.f32.xlu1 %v398_v1  ;;  %587 = vadd.xlane.f32.xlu0 %v397_v2 }
  0x9e   : > { %593 = vadd.xlane.f32.xlu1 %v400_v5  ;;  %591 = vadd.xlane.f32.xlu0 %v399_v6  ;;  %v728_v6 = vld [vmem:[%s4065_s6 + $0x48] sm:$0xff] }
  0xa2   : > { %597 = vadd.xlane.f32.xlu1 %v402_v9  ;;  %595 = vadd.xlane.f32.xlu0 %v401_v10 }
  0xa6   : > { %601 = vadd.xlane.f32.xlu1 %v404_v13  ;;  %599 = vadd.xlane.f32.xlu0 %v403_v14  ;;  %v283_v13 = vld [vmem:[%s3912_s30 + $0x298] sm:$0xff] }
  0xaa   : > { %605 = vadd.xlane.f32.xlu1 %v406_v17  ;;  %603 = vadd.xlane.f32.xlu0 %v405_v18  ;;  %v282_v17 = vld [vmem:[%s3912_s30 + $0x290] sm:$0xff] }
  0xab   : > { %v468_v24 = vpop.xlane.xlu1 %467  ;;  %v464_v25 = vpop.xlane.xlu0 %463  ;;  %v417_v27 = vmul.f32 %v3905_v0, %v282_v17 }
  0xac   : > { %v4072_v28 = vadd.f32 %v719_v21, %v464_v25  ;;  %v4081_v38 = vadd.f32 %v721_v29, %v468_v24  ;;  %v730_v21 = vld [vmem:[%s4065_s6 + $0x58] sm:$0xff] }
  0xae   : > { %609 = vadd.xlane.f32.xlu1 %v408_v22  ;;  %607 = vadd.xlane.f32.xlu0 %v407_v23  ;;  %v976_v39 = vsel %vm975_vm0, %v4072_v28, -inf  ;;  %v979_v52 = vsel %vm975_vm0, %v4081_v38, -inf  ;;  %v729_v22 = vld [vmem:[%s4065_s6 + $0x50] sm:$0xff]  ;;  %v418_v23 = vmul.f32 %v3905_v0, %v283_v13  ;;  %v292_v13 = vld [vmem:[%s3912_s30 + $0x2e0] sm:$0xff] }
  0xaf   : > { %v470_v34 = vpop.xlane.xlu1 %469  ;;  %v466_v35 = vpop.xlane.xlu0 %465 }
  0xb0   : > { %v4085_v40 = vadd.f32 %v720_v30, %v466_v35  ;;  %v4088_v42 = vadd.f32 %v722_v33, %v470_v34  ;;  %v284_v33 = vld [vmem:[%s3912_s30 + $0x2a0] sm:$0xff] }
  0xb2   : > { %v977_v43 = vsel %vm975_vm0, %v4085_v40, -inf  ;;  %613 = vadd.xlane.f32.xlu1 %v410_v31  ;;  %611 = vadd.xlane.f32.xlu0 %v409_v32  ;;  %v981_v57 = vsel %vm975_vm0, %v4088_v42, -inf  ;;  %v285_v32 = vld [vmem:[%s3912_s30 + $0x2a8] sm:$0xff] }
  0xb3   : > { %v978_v47 = vmax.f32 %v976_v39, %v977_v43  ;;  %v474_v49 = vpop.xlane.xlu1 %473  ;;  %v472_v50 = vpop.xlane.xlu0 %471  ;;  %v732_v39 = vld [vmem:[%s4065_s6 + $0x68] sm:$0xff] }
  0xb4   : > { %v4099_v53 = vadd.f32 %v723_v41, %v472_v50  ;;  %v4105_v58 = vadd.f32 %v724_v48, %v474_v49  ;;  %v731_v41 = vld [vmem:[%s4065_s6 + $0x60] sm:$0xff]  ;;  %v287_v50 = vld [vmem:[%s3912_s30 + $0x2b8] sm:$0xff] }
  0xb5   : > { %v980_v54 = vmax.f32 %v978_v47, %v979_v52 }
  0xb6   : > { %v983_v59 = vsel %vm975_vm0, %v4099_v53, -inf  ;;  %617 = vadd.xlane.f32.xlu1 %v412_v44  ;;  %615 = vadd.xlane.f32.xlu0 %v411_v45  ;;  %v985_v9 = vsel %vm975_vm0, %v4105_v58, -inf  ;;  %v420_v44 = vmul.f32 %v3905_v0, %v285_v32  ;;  %v419_v45 = vmul.f32 %v3905_v0, %v284_v33 }
  0xb7   : > { %v982_v62 = vmax.f32 %v980_v54, %v981_v57  ;;  %v478_v1 = vpop.xlane.xlu1 %477  ;;  %v476_v2 = vpop.xlane.xlu0 %475 }
  0xb8   : > { %v4113_v4 = vadd.f32 %v725_v55, %v476_v2  ;;  %v4120_v10 = vadd.f32 %v726_v63, %v478_v1  ;;  %v422_v1 = vmul.f32 %v3905_v0, %v287_v50  ;;  %v421_v2 = vmul.f32 %v3905_v0, %v286_v51 }
  0xb9   : > { %v984_v5 = vmax.f32 %v982_v62, %v983_v59  ;;  %v288_v62 = vld [vmem:[%s3912_s30 + $0x2c0] sm:$0xff] }
  0xba   : > { %v987_v11 = vsel %vm975_vm0, %v4113_v4, -inf  ;;  %621 = vadd.xlane.f32.xlu1 %v414_v56  ;;  %619 = vadd.xlane.f32.xlu0 %v413_v60  ;;  %v989_v24 = vsel %vm975_vm0, %v4120_v10, -inf  ;;  %v289_v56 = vld [vmem:[%s3912_s30 + $0x2c8] sm:$0xff]  ;;  %v734_v60 = vld [vmem:[%s4065_s6 + $0x78] sm:$0xff] }
  0xbb   : > { %v986_v14 = vmax.f32 %v984_v5, %v985_v9  ;;  %v482_v15 = vpop.xlane.xlu1 %481  ;;  %v480_v16 = vpop.xlane.xlu0 %479  ;;  %v290_v5 = vld [vmem:[%s3912_s30 + $0x2d0] sm:$0xff] }
  0xbc   : > { %v4127_v18 = vadd.f32 %v728_v6, %v482_v15  ;;  %v4129_v19 = vadd.f32 %v727_v7, %v480_v16  ;;  %v3826_v15 = vmov 0  }
  0xbd   : > { %v988_v20 = vmax.f32 %v986_v14, %v987_v11  ;;  %v424_v11 = vmul.f32 %v3905_v0, %v289_v56  ;;  %v295_v14 = vld [vmem:[%s3912_s30 + $0x2f8] sm:$0xff]  ;;  %3344 = vset.pattern.permute.xlu1 %v3826_v15  ;;  %3343 = vset.pattern.permute.xlu0 %v3826_v15 }
  0xbe   : > { %v998_v25 = vsel %vm975_vm0, %v4127_v18, -inf  ;;  %v997_v26 = vsel %vm975_vm0, %v4129_v19, -inf  ;;  %625 = vadd.xlane.f32.xlu1 %v416_v8  ;;  %623 = vadd.xlane.f32.xlu0 %v415_v12  ;;  %v293_v12 = vld [vmem:[%s3912_s30 + $0x2e8] sm:$0xff] }
  0xbf   : > { %v990_v29 = vmax.f32 %v988_v20, %v989_v24  ;;  %v486_v30 = vpop.xlane.xlu1 %485  ;;  %v484_v31 = vpop.xlane.xlu0 %483  ;;  %v999_v37 = vmax.f32 %v997_v26, %v998_v25  ;;  %v426_v26 = vmul.f32 %v3905_v0, %v291_v3  ;;  %v4192_v33 = vmul.f32 %v3905_v0, %v293_v12 }
  0xc0   : > { %v4143_v34 = vadd.f32 %v730_v21, %v486_v30  ;;  %v4145_v35 = vadd.f32 %v729_v22, %v484_v31  ;;  %v423_v21 = vmul.f32 %v3905_v0, %v288_v62  ;;  %v294_v22 = vld [vmem:[%s3912_s30 + $0x2f0] sm:$0xff]  ;;  %v299_v30 = vld [vmem:[%s3912_s30 + $0x318] sm:$0xff]  ;;  %v300_v62 = vld [vmem:[%s3912_s30 + $0x320] sm:$0xff] }
  0xc1   : > { %v991_v36 = vrot.slane %v990_v29, 4  ;;  %v298_v31 = vld [vmem:[%s3912_s30 + $0x310] sm:$0xff]  ;;  %v4216_v51 = vmul.f32 %v3905_v0, %v299_v30 }
  0xc2   : > { %v1000_v43 = vsel %vm975_vm0, %v4145_v35, -inf  ;;  %629 = vadd.xlane.f32.xlu1 %v418_v23  ;;  %627 = vadd.xlane.f32.xlu0 %v417_v27  ;;  %v1002_v52 = vsel %vm975_vm0, %v4143_v34, -inf  ;;  %v297_v23 = vld [vmem:[%s3912_s30 + $0x308] sm:$0xff]  ;;  %v425_v27 = vmul.f32 %v3905_v0, %v290_v5 }
  0xc3   : > { %v992_v46 = vmax.f32 %v990_v29, %v991_v36  ;;  %v1001_v47 = vmax.f32 %v999_v37, %v1000_v43  ;;  %v490_v48 = vpop.xlane.xlu1 %489  ;;  %v488_v49 = vpop.xlane.xlu0 %487  ;;  %v296_v29 = vld [vmem:[%s3912_s30 + $0x300] sm:$0xff]  ;;  %v4195_v36 = vmul.f32 %v3905_v0, %v292_v13  ;;  %v4198_v37 = vmul.f32 %v3905_v0, %v295_v14  ;;  %v736_v43 = vld [vmem:[%s4065_s6 + $0x88] sm:$0xff] }
  0xc4   : > { %v4157_v54 = vadd.f32 %v732_v39, %v490_v48  ;;  %v4159_v55 = vadd.f32 %v731_v41, %v488_v49  ;;  %v4208_v48 = vmul.f32 %v3905_v0, %v297_v23  ;;  %v4213_v50 = vmul.f32 %v3905_v0, %v296_v29 }
  0xc5   : > { %v993_v57 = vrot.slane %v992_v46, 2  ;;  %v1003_v59 = vmax.f32 %v1001_v47, %v1002_v52  ;;  %v4205_v47 = vmul.f32 %v3905_v0, %v294_v22  ;;  %v4219_v52 = vmul.f32 %v3905_v0, %v298_v31 }
  0xc6   : > { %v1004_v63 = vsel %vm975_vm0, %v4159_v55, -inf  ;;  %633 = vadd.xlane.f32.xlu1 %v420_v44  ;;  %631 = vadd.xlane.f32.xlu0 %v419_v45  ;;  %v1006_v16 = vsel %vm975_vm0, %v4157_v54, -inf  ;;  %v735_v45 = vld [vmem:[%s4065_s6 + $0x80] sm:$0xff] }
  0xc7   : > { %v994_v6 = vmax.f32 %v992_v46, %v993_v57  ;;  %v1005_v7 = vmax.f32 %v1003_v59, %v1004_v63  ;;  %v494_v8 = vpop.xlane.xlu1 %493  ;;  %v492_v9 = vpop.xlane.xlu0 %491  ;;  %v303_v63 = vld [vmem:[%s3912_s30 + $0x338] sm:$0xff] }
  0xc8   : > { %v4177_v17 = vadd.f32 %v734_v60, %v494_v8  ;;  %v4179_v20 = vadd.f32 %v733_v61, %v492_v9  ;;  %v301_v61 = vld [vmem:[%s3912_s30 + $0x328] sm:$0xff] }
  0xc9   : > { %v995_v24 = vrot.slane %v994_v6, 1  ;;  %v1007_v25 = vmax.f32 %v1005_v7, %v1006_v16  ;;  %v4243_v12 = vmul.f32 %v3905_v0, %v301_v61  ;;  %v739_v16 = vld [vmem:[%s4065_s6 + $0xa0] sm:$0xff]  ;;  %v309_v61 = vld [vmem:[%s3912_s30 + $0x368] sm:$0xff] }
  0xca   : > { %v1008_v32 = vsel %vm975_vm0, %v4179_v20, -inf  ;;  %637 = vadd.xlane.f32.xlu1 %v422_v1  ;;  %635 = vadd.xlane.f32.xlu0 %v421_v2  ;;  %v1010_v49 = vsel %vm975_vm0, %v4177_v17, -inf }
  0xcb   : > { %v4200_v39 = vmax.f32 %v994_v6, %v995_v24  ;;  %v1009_v41 = vmax.f32 %v1007_v25, %v1008_v32  ;;  %v498_v44 = vpop.xlane.xlu1 %497  ;;  %v496_v46 = vpop.xlane.xlu0 %495  ;;  %v302_v24 = vld [vmem:[%s3912_s30 + $0x330] sm:$0xff]  ;;  %v305_v32 = vld [vmem:[%s3912_s30 + $0x348] sm:$0xff] }
  0xcc   : > { %v4238_v3 = vadd.f32 %v735_v45, %v496_v46 }
  0xcd   : > { %v1312_v56 = vsub.f32 %v4072_v28, %v4200_v39  ;;  %v1313_v57 = vsub.f32 %v4085_v40, %v4200_v39  ;;  %v1314_v59 = vsub.f32 %v4081_v38, %v4200_v39  ;;  %v1315_v60 = vsub.f32 %v4088_v42, %v4200_v39  ;;  %v738_v40 = vld [vmem:[%s4065_s6 + $0x98] sm:$0xff] }
  0xce   : > { %v1316_v1 = vsub.f32 %v4099_v53, %v4200_v39  ;;  %v1317_v2 = vsub.f32 %v4105_v58, %v4200_v39  ;;  %v4236_v28 = vadd.f32 %v736_v43, %v498_v44  ;;  %641 = vadd.xlane.f32.xlu1 %v424_v11  ;;  %v1011_v6 = vmax.f32 %v1009_v41, %v1010_v49  ;;  %v737_v53 = vld [vmem:[%s4065_s6 + $0x90] sm:$0xff] }
  0xcf   : > { %v1440_v38 = vmul.f32 1.442695, %v1312_v56  ;;  %v1442_v5 = vmul.f32 1.442695, %v1313_v57  ;;  %v1444_v42 = vmul.f32 1.442695, %v1314_v59  ;;  %639 = vadd.xlane.f32.xlu0 %v423_v21  ;;  %v502_v7 = vpop.xlane.xlu1 %501  ;;  %v500_v8 = vpop.xlane.xlu0 %499  ;;  %v4246_v58 = vmul.f32 %v3905_v0, %v300_v62 }
  0xd0   : > { %v1446_v9 = vmul.f32 1.442695, %v1315_v60  ;;  %v4249_v11 = vmul.f32 %v3905_v0, %v303_v63  ;;  %v1318_v13 = vsub.f32 %v4113_v4, %v4200_v39  ;;  %v1448_v14 = vmul.f32 1.442695, %v1316_v1  ;;  %v304_v56 = vld [vmem:[%s3912_s30 + $0x340] sm:$0xff]  ;;  %v307_v57 = vld [vmem:[%s3912_s30 + $0x358] sm:$0xff] }
  0xd1   : > { %3345 = vpow2.f32 %v1440_v38  ;;  %v1012_v15 = vrot.slane %v1011_v6, 4  ;;  %v1019_v21 = vsel %vm975_vm0, %v4236_v28, -inf  ;;  %v1018_v22 = vsel %vm975_vm0, %v4238_v3, -inf  ;;  %v306_v60 = vld [vmem:[%s3912_s30 + $0x350] sm:$0xff]  ;;  %v308_v38 = vld [vmem:[%s3912_s30 + $0x360] sm:$0xff] }
  0xd2   : > { %3347 = vpow2.f32 %v1442_v5  ;;  %v4258_v23 = vadd.f32 %v738_v40, %v502_v7  ;;  %645 = vadd.xlane.f32.xlu1 %v426_v26  ;;  %v1450_v25 = vmul.f32 1.442695, %v1317_v2  ;;  %v4261_v29 = vadd.f32 %v737_v53, %v500_v8  ;;  %v740_v26 = vld [vmem:[%s4065_s6 + $0xa8] sm:$0xff]  ;;  %v741_v40 = vld [vmem:[%s4065_s6 + $0xb0] sm:$0xff]  ;;  %v311_v5 = vld [vmem:[%s3912_s30 + $0x378] sm:$0xff] }
  0xd3   : > { %3349 = vpow2.f32 %v1444_v42  ;;  %v1013_v4 = vmax.f32 %v1011_v6, %v1012_v15  ;;  %643 = vadd.xlane.f32.xlu0 %v425_v27  ;;  %v506_v30 = vpop.xlane.xlu1 %505  ;;  %v504_v31 = vpop.xlane.xlu0 %503  ;;  %v1319_v41 = vsub.f32 %v4120_v10, %v4200_v39  ;;  %v1020_v43 = vmax.f32 %v1018_v22, %v1019_v21  ;;  %v313_v53 = vld [vmem:[%s3912_s30 + $0x388] sm:$0xff]  ;;  %v312_v15 = vld [vmem:[%s3912_s30 + $0x380] sm:$0xff] }
  0xd4   : > { %3351 = vpow2.f32 %v1446_v9  ;;  %v4267_v44 = vadd.f32 %v739_v16, %v504_v31  ;;  %v1452_v45 = vmul.f32 1.442695, %v1318_v13  ;;  %v1021_v49 = vsel %vm975_vm0, %v4261_v29, -inf  ;;  %v310_v9 = vld [vmem:[%s3912_s30 + $0x370] sm:$0xff]  ;;  %v742_v31 = vld [vmem:[%s4065_s6 + $0xb8] sm:$0xff] }
  0xd5   : > { %v1014_v46 = vrot.slane %v1013_v4, 2  ;;  %v4272_v27 = vmul.f32 %v3905_v0, %v302_v24  ;;  %3353 = vpow2.f32 %v1448_v14  ;;  %v1023_v10 = vsel %vm975_vm0, %v4258_v23, -inf }
  0xd6   : > { %v1022_v39 = vmax.f32 %v1020_v43, %v1021_v49  ;;  %649 = vadd.xlane.f32.xlu1 %v4192_v33  ;;  %v4280_v59 = vmul.f32 %v3905_v0, %v305_v32  ;;  %3355 = vpow2.f32 %v1450_v25  ;;  %v4284_v63 = vadd.f32 %v740_v26, %v506_v30  ;;  %v744_v49 = vld [vmem:[%s4065_s6 + $0xc8] sm:$0xff] }
  0xd7   : > { %v1015_v62 = vmax.f32 %v1013_v4, %v1014_v46  ;;  %v1025_v1 = vsel %vm975_vm0, %v4267_v44, -inf  ;;  %647 = vadd.xlane.f32.xlu0 %v4195_v36  ;;  %v510_v2 = vpop.xlane.xlu1 %509  ;;  %v508_v33 = vpop.xlane.xlu0 %507  ;;  %v1454_v42 = vmul.f32 1.442695, %v1319_v41  ;;  %v4293_v7 = vmul.f32 %v3905_v0, %v304_v56  ;;  %v743_v56 = vld [vmem:[%s4065_s6 + $0xc0] sm:$0xff] }
  0xd8   : > { %v1024_v6 = vmax.f32 %v1022_v39, %v1023_v10  ;;  %v4296_v8 = vmul.f32 %v3905_v0, %v307_v57  ;;  %3357 = vpow2.f32 %v1452_v45  ;;  %v4301_v36 = vmul.f32 %v3905_v0, %v306_v60 }
  0xd9   : > { %v1016_v13 = vrot.slane %v1015_v62, 1  ;;  %v4304_v14 = vmul.f32 %v3905_v0, %v309_v61  ;;  %v4307_v21 = vadd.f32 %v741_v40, %v508_v33  ;;  %v4311_v22 = vmul.f32 %v3905_v0, %v308_v38 }
  0xda   : > { %v1026_v16 = vmax.f32 %v1024_v6, %v1025_v1  ;;  %653 = vadd.xlane.f32.xlu1 %v4198_v37  ;;  %v4314_v24 = vmul.f32 %v3905_v0, %v311_v5  ;;  %v1027_v30 = vsel %vm975_vm0, %v4284_v63, -inf  ;;  %v4325_v41 = vmul.f32 %v3905_v0, %v310_v9 }
  0xdb   : > { %v4316_v25 = vpop.eup %3345  ;;  %v4318_v4 = vmax.f32 %v1015_v62, %v1016_v13  ;;  %651 = vadd.xlane.f32.xlu0 %v4205_v47  ;;  %v514_v32 = vpop.xlane.xlu1 %513  ;;  %v4328_v43 = vmul.f32 %v3905_v0, %v313_v53  ;;  %3359 = vpow2.f32 %v1454_v42  ;;  %v4337_v57 = vmul.f32 %v3905_v0, %v312_v15 }
  0xdc   : > { %v512_v37 = vpop.xlane.xlu0 %511  ;;  %v4330_v26 = vpop.eup %3347  ;;  %v1696_v45 = vsel %vm975_vm0, %v4316_v25, 0.0  ;;  %v1028_v46 = vmax.f32 %v1026_v16, %v1027_v30  ;;  %v4353_v40 = vadd.f32 %v742_v31, %v510_v2  ;;  %v1029_v33 = vsel %vm975_vm0, %v4307_v21, -inf }
  0xdd   : > { %v4339_v47 = vpop.eup %3349  ;;  %v1697_v10 = vsel %vm975_vm0, %v4330_v26, 0.0  ;;  %v1320_v39 = vsub.f32 %v4129_v19, %v4318_v4  ;;  %v1321_v60 = vsub.f32 %v4127_v18, %v4318_v4  ;;  %v1322_v61 = vsub.f32 %v4145_v35, %v4318_v4 }
  0xde   : > { %v4349_v62 = vpop.eup %3351  ;;  %v1698_v1 = vadd.f32 %v1697_v10, %v1696_v45  ;;  %v1323_v0 = vsub.f32 %v4143_v34, %v4318_v4  ;;  %657 = vadd.xlane.f32.xlu1 %v4208_v48  ;;  %v1699_v19 = vsel %vm975_vm0, %v4339_v47, 0.0  ;;  %v1324_v18 = vsub.f32 %v4159_v55, %v4318_v4  ;;  %v746_v10 = vld [vmem:[%s4065_s6 + $0xd8] sm:$0xff] }
  0xdf   : > { %v4362_v35 = vadd.f32 %v744_v49, %v514_v32  ;;  %v4364_v38 = vadd.f32 %v743_v56, %v512_v37  ;;  %655 = vadd.xlane.f32.xlu0 %v4213_v50  ;;  %v518_v34 = vpop.xlane.xlu1 %517  ;;  %v4367_v5 = vpop.eup %3353  ;;  %v1701_v48 = vsel %vm975_vm0, %v4349_v62, 0.0  ;;  %v1456_v6 = vmul.f32 1.442695, %v1320_v39  ;;  %v745_v39 = vld [vmem:[%s4065_s6 + $0xd0] sm:$0xff] }
  0xe0   : > { %v516_v2 = vpop.xlane.xlu0 %515  ;;  %6854 = vst [vmem:[#allocation5_spill] sm:$0xff] %v4367_v5  ;;  %v1700_v42 = vadd.f32 %v1699_v19, %v1698_v1  ;;  %v1458_v9 = vmul.f32 1.442695, %v1321_v60  ;;  %v4371_v53 = vpop.eup %3355  ;;  %v1325_v55 = vsub.f32 %v4157_v54, %v4318_v4  ;;  %v1460_v13 = vmul.f32 1.442695, %v1322_v61 }
  0xe1   : > { %6855 = vst [vmem:[#allocation6_spill] sm:$0xff] %v4371_v53  ;;  %v1462_v15 = vmul.f32 1.442695, %v1323_v0  ;;  %v1030_v16 = vmax.f32 %v1028_v46, %v1029_v33  ;;  %v1326_v50 = vsub.f32 %v4179_v20, %v4318_v4  ;;  %3361 = vpow2.f32 %v1456_v6 }
  0xe2   : > { %v1702_v30 = vadd.f32 %v1701_v48, %v1700_v42  ;;  %v1031_v31 = vsel %vm975_vm0, %v4353_v40, -inf  ;;  %661 = vadd.xlane.f32.xlu1 %v4216_v51  ;;  %v4380_v32 = vpop.eup %3357  ;;  %v1703_v54 = vsel %vm975_vm0, %v4367_v5, 0.0  ;;  %v1327_v37 = vsub.f32 %v4177_v17, %v4318_v4  ;;  %v315_v4 = vld [vmem:[%s3912_s30 + $0x398] sm:$0xff]  ;;  %v314_v42 = vld [vmem:[%s3912_s30 + $0x390] sm:$0xff] }
  0xe3   : > { %6856 = vst [vmem:[#allocation7_spill] sm:$0xff] %v4380_v32  ;;  %3363 = vpow2.f32 %v1458_v9  ;;  %v1464_v45 = vmul.f32 1.442695, %v1324_v18  ;;  %659 = vadd.xlane.f32.xlu0 %v4219_v52  ;;  %v522_v20 = vpop.xlane.xlu1 %521  ;;  %v1705_v51 = vsel %vm975_vm0, %v4371_v53, 0.0  ;;  %v1032_v56 = vmax.f32 %v1030_v16, %v1031_v31  ;;  %v747_v18 = vld [vmem:[%s4065_s6 + $0xe0] sm:$0xff]  ;;  %v748_v31 = vld [vmem:[%s4065_s6 + $0xe8] sm:$0xff] }
  0xe4   : > { %v520_v46 = vpop.xlane.xlu0 %519  ;;  %v1704_v49 = vadd.f32 %v1703_v54, %v1702_v30  ;;  %3365 = vpow2.f32 %v1460_v13  ;;  %v1466_v60 = vmul.f32 1.442695, %v1325_v55  ;;  %v1040_v17 = vsel %vm975_vm0, %v4362_v35, -inf }
  0xe5   : > { %3367 = vpow2.f32 %v1462_v15  ;;  %v1039_v52 = vsel %vm975_vm0, %v4364_v38, -inf  ;;  %v4396_v61 = vpop.eup %3359  ;;  %v1707_v0 = vsel %vm975_vm0, %v4380_v32, 0.0  ;;  %v1468_v33 = vmul.f32 1.442695, %v1326_v50  ;;  %v317_v15 = vld [vmem:[%s3912_s30 + $0x3a8] sm:$0xff] }
  0xe6   : > { %6857 = vst [vmem:[#allocation8_spill] sm:$0xff] %v4396_v61  ;;  %v1706_v1 = vadd.f32 %v1705_v51, %v1704_v49  ;;  %v1033_v19 = vrot.slane %v1032_v56, 4  ;;  %665 = vadd.xlane.f32.xlu1 %v4243_v12  ;;  %3369 = vpow2.f32 %v1464_v45  ;;  %v1470_v48 = vmul.f32 1.442695, %v1327_v37  ;;  %v4412_v12 = vld [vmem:[%s6769_s2] ss:$0 sm:$0xff] }
  0xe7   : > { %v4403_v6 = vadd.f32 %v746_v10, %v518_v34  ;;  %v4405_v9 = vadd.f32 %v745_v39, %v516_v2  ;;  %663 = vadd.xlane.f32.xlu0 %v4246_v58  ;;  %v526_v55 = vpop.xlane.xlu1 %525  ;;  %v1041_v50 = vmax.f32 %v1039_v52, %v1040_v17  ;;  %v4415_v34 = vmul.f32 %v4412_v12, %v315_v4  ;;  %v316_v2 = vld [vmem:[%s3912_s30 + $0x3a0] sm:$0xff]  ;;  %v752_v51 = vld [vmem:[%s4065_s6 + $0x108] sm:$0xff]  ;;  %v319_v4 = vld [vmem:[%s3912_s30 + $0x3b8] sm:$0xff] }
  0xe8   : > { %v524_v13 = vpop.xlane.xlu0 %523  ;;  %v1708_v16 = vadd.f32 %v1707_v0, %v1706_v1  ;;  %v1034_v30 = vmax.f32 %v1032_v56, %v1033_v19  ;;  %3371 = vpow2.f32 %v1466_v60  ;;  %v4421_v54 = vadd.f32 %v747_v18, %v520_v46  ;;  %v751_v56 = vld [vmem:[%s4065_s6 + $0x100] sm:$0xff]  ;;  %v750_v60 = vld [vmem:[%s4065_s6 + $0xf8] sm:$0xff] }
  0xe9   : > { %v1042_v58 = vsel %vm975_vm0, %v4405_v9, -inf  ;;  %v4424_v37 = vmul.f32 %v4412_v12, %v314_v42  ;;  %3373 = vpow2.f32 %v1468_v33  ;;  %v4430_v10 = vmul.f32 %v4412_v12, %v317_v15  ;;  %v749_v42 = vld [vmem:[%s4065_s6 + $0xf0] sm:$0xff]  ;;  %v321_v15 = vld [vmem:[%s3912_s30 + $0x3c8] sm:$0xff] }
  0xea   : > { %v1035_v45 = vrot.slane %v1034_v30, 2  ;;  %v1043_v49 = vmax.f32 %v1041_v50, %v1042_v58  ;;  %669 = vadd.xlane.f32.xlu1 %v4249_v11  ;;  %v1709_v46 = vsel %vm975_vm0, %v4396_v61, 0.0  ;;  %3375 = vpow2.f32 %v1470_v48  ;;  %v318_v48 = vld [vmem:[%s3912_s30 + $0x3b0] sm:$0xff] }
  0xeb   : > { %v1044_v39 = vsel %vm975_vm0, %v4403_v6, -inf  ;;  %667 = vadd.xlane.f32.xlu0 %v4272_v27  ;;  %v530_v17 = vpop.xlane.xlu1 %529  ;;  %v4439_v52 = vmul.f32 %v4412_v12, %v316_v2  ;;  %v4442_v1 = vpop.eup %3361  ;;  %v1710_v0 = vadd.f32 %v1709_v46, %v1708_v16  ;;  %v4444_v19 = vadd.f32 %v748_v31, %v522_v20 }
  0xec   : > { %v528_v11 = vpop.xlane.xlu0 %527  ;;  %6858 = vst [vmem:[#allocation9_spill] sm:$0xff] %v4442_v1  ;;  %v1036_v33 = vmax.f32 %v1034_v30, %v1035_v45  ;;  %v1045_v18 = vmax.f32 %v1043_v49, %v1044_v39  ;;  %v1717_v27 = vsel %vm975_vm0, %v4442_v1, 0.0  ;;  %v1046_v2 = vsel %vm975_vm0, %v4421_v54, -inf }
  0xed   : > { %v4449_v50 = vpop.eup %3363  ;;  %v4455_v58 = vadd.f32 %v752_v51, %v530_v17  ;;  %v4457_v61 = vadd.f32 %v751_v56, %v528_v11  ;;  %v4463_v31 = vadd.f32 %v750_v60, %v526_v55  ;;  %v4467_v45 = vmul.f32 %v4412_v12, %v319_v4 }
  0xee   : > { %v4459_v16 = vpop.eup %3365  ;;  %v1718_v20 = vsel %vm975_vm0, %v4449_v50, 0.0  ;;  %v1037_v30 = vrot.slane %v1036_v33, 1  ;;  %673 = vadd.xlane.f32.xlu1 %v4280_v59  ;;  %v4471_v51 = vadd.f32 %v749_v42, %v524_v13  ;;  %v4475_v17 = vmul.f32 %v4412_v12, %v318_v48 }
  0xef   : > { %6859 = vst [vmem:[#allocation10_spill] sm:$0xff] %v4459_v16  ;;  %v4469_v49 = vpop.eup %3367  ;;  %v1719_v46 = vadd.f32 %v1718_v20, %v1717_v27  ;;  %671 = vadd.xlane.f32.xlu0 %v4293_v7  ;;  %v534_v56 = vpop.xlane.xlu1 %533  ;;  %v4478_v55 = vmul.f32 %v4412_v12, %v321_v15  ;;  %v1711_v59 = vrot.slane %v1710_v0, 4  ;;  %v1720_v60 = vsel %vm975_vm0, %v4459_v16, 0.0  ;;  %v754_v20 = vld [vmem:[%s4065_s6 + $0x118] sm:$0xff] }
  0xf0   : > { %6860 = vst [vmem:[#allocation11_spill] sm:$0xff] %v4469_v49  ;;  %v532_v39 = vpop.xlane.xlu0 %531  ;;  %v4482_v11 = vmax.f32 %v1036_v33, %v1037_v30  ;;  %v1047_v4 = vmax.f32 %v1045_v18, %v1046_v2  ;;  %v4484_v13 = vpop.eup %3369  ;;  %v1048_v7 = vsel %vm975_vm0, %v4444_v19, -inf  ;;  %v4490_v48 = vsel %vm975_vm0, %v4455_v58, -inf }
  0xf1   : > { %6861 = vst [vmem:[#allocation12_spill] sm:$0xff] %v4484_v13  ;;  %v1721_v42 = vadd.f32 %v1720_v60, %v1719_v46  ;;  %v4494_v15 = vsel %vm975_vm0, %v4457_v61, -inf  ;;  %v1722_v27 = vsel %vm975_vm0, %v4469_v49, 0.0  ;;  %v1052_v2 = vsel %vm975_vm0, %v4463_v31, -inf }
  0xf2   : > { %v1328_v33 = vsub.f32 %v4238_v3, %v4482_v11  ;;  %v1329_v18 = vsub.f32 %v4236_v28, %v4482_v11  ;;  %677 = vadd.xlane.f32.xlu1 %v4296_v8  ;;  %v4506_v30 = vpop.eup %3371  ;;  %v1330_v60 = vsub.f32 %v4261_v29, %v4482_v11  ;;  %v1331_v16 = vsub.f32 %v4258_v23, %v4482_v11 }
  0xf3   : > { %6862 = vst [vmem:[#allocation13_spill] sm:$0xff] %v4506_v30  ;;  %v1723_v46 = vadd.f32 %v1722_v27, %v1721_v42  ;;  %v1050_v3 = vsel %vm975_vm0, %v4471_v51, -inf  ;;  %675 = vadd.xlane.f32.xlu0 %v4301_v36  ;;  %v538_v28 = vpop.xlane.xlu1 %537  ;;  %v4515_v32 = vpop.eup %3373  ;;  %v4517_v8 = vadd.f32 %v1711_v59, %v1710_v0  ;;  %v1724_v42 = vsel %vm975_vm0, %v4484_v13, 0.0  ;;  %v753_v13 = vld [vmem:[%s4065_s6 + $0x110] sm:$0xff] }
  0xf4   : > { %v536_v1 = vpop.xlane.xlu0 %535  ;;  %6863 = vst [vmem:[#allocation14_spill] sm:$0xff] %v4515_v32  ;;  %v1049_v27 = vmax.f32 %v1047_v4, %v1048_v7  ;;  %v1062_v29 = vmax.f32 %v4494_v15, %v4490_v48  ;;  %v4523_v23 = vpop.eup %3375  ;;  %v1332_v36 = vsub.f32 %v4267_v44, %v4482_v11  ;;  %v1472_v49 = vmul.f32 1.442695, %v1328_v33 }
  0xf5   : > { %6864 = vst [vmem:[#allocation15_spill] sm:$0xff] %v4523_v23  ;;  %v1725_v53 = vadd.f32 %v1724_v42, %v1723_v46  ;;  %v4527_v5 = vadd.f32 %v754_v20, %v534_v56  ;;  %v1726_v0 = vsel %vm975_vm0, %v4506_v30, 0.0  ;;  %v1333_v59 = vsub.f32 %v4284_v63, %v4482_v11  ;;  %v755_v56 = vld [vmem:[%s4065_s6 + $0x120] sm:$0xff] }
  0xf6   : > { %v1474_v4 = vmul.f32 1.442695, %v1329_v18  ;;  %v1476_v7 = vmul.f32 1.442695, %v1330_v60  ;;  %681 = vadd.xlane.f32.xlu1 %v4304_v14  ;;  %v1334_v15 = vsub.f32 %v4307_v21, %v4482_v11  ;;  %3377 = vpow2.f32 %v1472_v49  ;;  %v756_v49 = vld [vmem:[%s4065_s6 + $0x128] sm:$0xff] }
  0xf7   : > { %v1727_v48 = vadd.f32 %v1726_v0, %v1725_v53  ;;  %v1478_v44 = vmul.f32 1.442695, %v1331_v16  ;;  %679 = vadd.xlane.f32.xlu0 %v4311_v22  ;;  %v4539_v33 = vpop.xlane.xlu1 %541  ;;  %v1728_v63 = vsel %vm975_vm0, %v4515_v32, 0.0  ;;  %v1730_v18 = vsel %vm975_vm0, %v4523_v23, 0.0 }
  0xf8   : > { %v540_v20 = vpop.xlane.xlu0 %539  ;;  %v1335_v14 = vsub.f32 %v4353_v40, %v4482_v11  ;;  %v1051_v53 = vmax.f32 %v1049_v27, %v1050_v3  ;;  %3379 = vpow2.f32 %v1474_v4  ;;  %v1480_v21 = vmul.f32 1.442695, %v1332_v36  ;;  %v759_v4 = vld [vmem:[%s4065_s6 + $0x140] sm:$0xff] }
  0xf9   : > { %v1729_v46 = vadd.f32 %v1728_v63, %v1727_v48  ;;  %v4547_v16 = vadd.f32 %v753_v13, %v532_v39  ;;  %3381 = vpow2.f32 %v1476_v7  ;;  %v1482_v22 = vmul.f32 1.442695, %v1333_v59  ;;  %v760_v59 = vld [vmem:[%s4065_s6 + $0x148] sm:$0xff] }
  0xfa   : > { %v1053_v60 = vmax.f32 %v1051_v53, %v1052_v2  ;;  %v4550_v42 = vadd.f32 %v755_v56, %v536_v1  ;;  %685 = vadd.xlane.f32.xlu1 %v4314_v24  ;;  %3383 = vpow2.f32 %v1478_v44  ;;  %v1484_v40 = vmul.f32 1.442695, %v1334_v15  ;;  %v757_v1 = vld [vmem:[%s4065_s6 + $0x130] sm:$0xff] }
  0xfb   : > { %v1731_v0 = vadd.f32 %v1730_v18, %v1729_v46  ;;  %v1063_v11 = vsel %vm975_vm0, %v4547_v16, -inf  ;;  %683 = vadd.xlane.f32.xlu0 %v4325_v41  ;;  %v546_v39 = vpop.xlane.xlu1 %545  ;;  %v1486_v3 = vmul.f32 1.442695, %v1335_v14  ;;  %v4556_v2 = vadd.f32 %v756_v49, %v538_v28  ;;  %v761_v28 = vld [vmem:[%s4065_s6 + $0x150] sm:$0xff]  ;;  %v320_v49 = vld [vmem:[%s3912_s30 + $0x3c0] sm:$0xff] }
  0xfc   : > { %v544_v13 = vpop.xlane.xlu0 %543  ;;  %v1054_v27 = vrot.slane %v1053_v60, 4  ;;  %v1064_v36 = vmax.f32 %v1062_v29, %v1063_v11  ;;  %3385 = vpow2.f32 %v1480_v21  ;;  %v1065_v7 = vsel %vm975_vm0, %v4527_v5, -inf }
  0xfd   : > { %v1732_v24 = vrot.slane %v1731_v0, 4  ;;  %v1067_v48 = vsel %vm975_vm0, %v4550_v42, -inf  ;;  %v1713_v41 = vrot.slane %v4517_v8, 2  ;;  %3387 = vpow2.f32 %v1482_v22  ;;  %v323_v22 = vld [vmem:[%s3912_s30 + $0x3d8] sm:$0xff] }
  0xfe   : > { %v1055_v15 = vmax.f32 %v1053_v60, %v1054_v27  ;;  %v1066_v29 = vmax.f32 %v1064_v36, %v1065_v7  ;;  %689 = vadd.xlane.f32.xlu1 %v4328_v43  ;;  %v4568_v56 = vadd.f32 %v757_v1, %v540_v20  ;;  %v4570_v63 = vadd.f32 %v760_v59, %v546_v39  ;;  %v322_v20 = vld [vmem:[%s3912_s30 + $0x3d0] sm:$0xff]  ;;  %v762_v1 = vld [vmem:[%s4065_s6 + $0x158] sm:$0xff] }
  0xff   : > { %v1733_v44 = vadd.f32 %v1732_v24, %v1731_v0  ;;  %v4572_v18 = vadd.f32 %v759_v4, %v544_v13  ;;  %687 = vadd.xlane.f32.xlu0 %v4337_v57  ;;  %v550_v14 = vpop.xlane.xlu1 %549  ;;  %3389 = vpow2.f32 %v1484_v40  ;;  %v1069_v21 = vsel %vm975_vm0, %v4556_v2, -inf  ;;  %v758_v13 = vld [vmem:[%s4065_s6 + $0x138] sm:$0xff] }
 0x100   : > { %v548_v53 = vpop.xlane.xlu0 %547  ;;  %v1056_v46 = vrot.slane %v1055_v15, 2  ;;  %v1068_v43 = vmax.f32 %v1066_v29, %v1067_v48  ;;  %v4580_v60 = vpop.eup %3377  ;;  %3391 = vpow2.f32 %v1486_v3  ;;  %v1082_v57 = vsel %vm975_vm0, %v4570_v63, -inf }
 0x101   : > { %6865 = vst [vmem:[#allocation16_spill] sm:$0xff] %v4580_v60  ;;  %v1734_v0 = vrot.slane %v1733_v44, 2  ;;  %v4584_v11 = vadd.f32 %v761_v28, %v548_v53  ;;  %v1738_v40 = vsel %vm975_vm0, %v4580_v60, 0.0  ;;  %v1081_v36 = vsel %vm975_vm0, %v4572_v18, -inf }
 0x102   : > { %v1057_v39 = vmax.f32 %v1055_v15, %v1056_v46  ;;  %v1070_v27 = vmax.f32 %v1068_v43, %v1069_v21  ;;  %693 = vadd.xlane.f32.xlu1 %v4415_v34  ;;  %v4593_v3 = vpop.eup %3379  ;;  %v1071_v59 = vsel %vm975_vm0, %v4568_v56, -inf  ;;  %v4599_v7 = vmul.f32 %v4412_v12, %v320_v49  ;;  %v764_v46 = vld [vmem:[%s4065_s6 + $0x168] sm:$0xff] }
 0x103   : > { %6866 = vst [vmem:[#allocation17_spill] sm:$0xff] %v4593_v3  ;;  %691 = vadd.xlane.f32.xlu0 %v4424_v37  ;;  %v554_v4 = vpop.xlane.xlu1 %553  ;;  %v4602_v48 = vmul.f32 %v4412_v12, %v323_v22  ;;  %v4605_v15 = vmul.f32 %v4412_v12, %v322_v20  ;;  %v4607_v29 = vpop.eup %3381  ;;  %v4610_v34 = vadd.f32 %v1713_v41, %v4517_v8  ;;  %v1739_v28 = vsel %vm975_vm0, %v4593_v3, 0.0  ;;  %v325_v21 = vld [vmem:[%s3912_s30 + $0x3e8] sm:$0xff] }
 0x104   : > { %v552_v24 = vpop.xlane.xlu0 %551  ;;  %v1058_v37 = vrot.slane %v1057_v39, 1  ;;  %v1084_v53 = vsel %vm975_vm0, %v4584_v11, -inf  ;;  %v4618_v43 = vpop.eup %3383  ;;  %v1740_v49 = vadd.f32 %v1739_v28, %v1738_v40  ;;  %v4621_v22 = vadd.f32 %v758_v13, %v4539_v33 }
 0x105   : > { %v1083_v20 = vmax.f32 %v1081_v36, %v1082_v57  ;;  %v4623_v60 = vadd.f32 %v762_v1, %v550_v14  ;;  %v4625_v8 = vadd.f32 %v1734_v0, %v1733_v44  ;;  %v1741_v41 = vsel %vm975_vm0, %v4607_v29, 0.0 }
 0x106   : > { %v4629_v32 = vmax.f32 %v1057_v39, %v1058_v37  ;;  %v1072_v3 = vmax.f32 %v1070_v27, %v1071_v59  ;;  %697 = vadd.xlane.f32.xlu1 %v4430_v10  ;;  %v4632_v23 = vpop.eup %3385  ;;  %v1742_v30 = vadd.f32 %v1741_v41, %v1740_v49  ;;  %v4634_v33 = vadd.f32 %v764_v46, %v554_v4  ;;  %v763_v4 = vld [vmem:[%s4065_s6 + $0x160] sm:$0xff] }
 0x107   : > { %6867 = vst [vmem:[#allocation18_spill] sm:$0xff] %v4632_v23  ;;  %v1085_v40 = vmax.f32 %v1083_v20, %v1084_v53  ;;  %695 = vadd.xlane.f32.xlu0 %v4439_v52  ;;  %v558_v14 = vpop.xlane.xlu1 %557  ;;  %v4638_v0 = vmul.f32 %v4412_v12, %v325_v21  ;;  %v4640_v57 = vpop.eup %3387  ;;  %v1743_v39 = vsel %vm975_vm0, %v4618_v43, 0.0  ;;  %v1715_v52 = vrot.slane %v4610_v34, 1 }
 0x108   : > { %v556_v44 = vpop.xlane.xlu0 %555  ;;  %v1336_v10 = vsub.f32 %v4364_v38, %v4629_v32  ;;  %v1337_v13 = vsub.f32 %v4362_v35, %v4629_v32  ;;  %v1338_v27 = vsub.f32 %v4405_v9, %v4629_v32  ;;  %v1744_v36 = vadd.f32 %v1743_v39, %v1742_v30 }
 0x109   : > { %v1073_v1 = vsel %vm975_vm0, %v4621_v22, -inf  ;;  %v1086_v59 = vsel %vm975_vm0, %v4623_v60, -inf  ;;  %v4656_v28 = vpop.eup %3389  ;;  %v1736_v38 = vrot.slane %v4625_v8, 1  ;;  %v1745_v35 = vsel %vm975_vm0, %v4632_v23, 0.0 }
 0x10a   : > { %6868 = vst [vmem:[#allocation19_spill] sm:$0xff] %v4656_v28  ;;  %v1339_v9 = vsub.f32 %v4403_v6, %v4629_v32  ;;  %v1074_v37 = vmax.f32 %v1072_v3, %v1073_v1  ;;  %701 = vadd.xlane.f32.xlu1 %v4467_v45  ;;  %v4664_v30 = vpop.eup %3391  ;;  %v1746_v53 = vadd.f32 %v1745_v35, %v1744_v36  ;;  %v1488_v46 = vmul.f32 1.442695, %v1336_v10  ;;  %v765_v10 = vld [vmem:[%s4065_s6 + $0x170] sm:$0xff] }
 0x10b   : > { %v1490_v21 = vmul.f32 1.442695, %v1337_v13  ;;  %v1087_v49 = vmax.f32 %v1085_v40, %v1086_v59  ;;  %699 = vadd.xlane.f32.xlu0 %v4475_v17  ;;  %v562_v20 = vpop.xlane.xlu1 %561  ;;  %v1747_v39 = vsel %vm975_vm0, %v4640_v57, 0.0  ;;  %v1492_v23 = vmul.f32 1.442695, %v1338_v27  ;;  %v766_v17 = vld [vmem:[%s4065_s6 + $0x178] sm:$0xff] }
 0x10c   : > { %v560_v41 = vpop.xlane.xlu0 %559  ;;  %v1090_v6 = vsel %vm975_vm0, %v4634_v33, -inf  ;;  %v4671_v45 = vadd.f32 %v763_v4, %v552_v24  ;;  %v1748_v3 = vadd.f32 %v1747_v39, %v1746_v53  ;;  %v1749_v36 = vsel %vm975_vm0, %v4656_v28, 0.0 }
 0x10d   : > { %v1340_v40 = vsub.f32 %v4421_v54, %v4629_v32  ;;  %3393 = vpow2.f32 %v1488_v46  ;;  %v1494_v13 = vmul.f32 1.442695, %v1339_v9  ;;  %v1075_v1 = vrot.slane %v1074_v37, 4 }
 0x10e   : > { %3395 = vpow2.f32 %v1490_v21  ;;  %v1088_v27 = vsel %vm975_vm0, %v4671_v45, -inf  ;;  %705 = vadd.xlane.f32.xlu1 %v4478_v55  ;;  %v1750_v24 = vadd.f32 %v1749_v36, %v1748_v3  ;;  %v1751_v59 = vsel %vm975_vm0, %v4664_v30, 0.0  ;;  %v324_v21 = vld [vmem:[%s3912_s30 + $0x3e0] sm:$0xff] }
 0x10f   : > { %3397 = vpow2.f32 %v1492_v23  ;;  %v1089_v4 = vmax.f32 %v1087_v49, %v1088_v27  ;;  %703 = vadd.xlane.f32.xlu0 %v4599_v7  ;;  %v4685_v54 = vpop.xlane.xlu1 %565  ;;  %v1341_v9 = vsub.f32 %v4444_v19, %v4629_v32  ;;  %v1076_v53 = vmax.f32 %v1074_v37, %v1075_v1  ;;  %v768_v7 = vld [vmem:[%s4065_s6 + $0x188] sm:$0xff] }
 0x110   : > { %v564_v35 = vpop.xlane.xlu0 %563  ;;  %v4689_v46 = vadd.f32 %v766_v17, %v558_v14  ;;  %v4691_v55 = vadd.f32 %v765_v10, %v556_v44  ;;  %v1716_v39 = vadd.f32 %v1715_v52, %v4610_v34  ;;  %v1752_v3 = vadd.f32 %v1751_v59, %v1750_v24  ;;  %v767_v14 = vld [vmem:[%s4065_s6 + $0x180] sm:$0xff]  ;;  %v326_v24 = vld [vmem:[%s3912_s30 + $0x3f0] sm:$0xff] }
 0x111   : > { %v1496_v23 = vmul.f32 1.442695, %v1340_v40  ;;  %v1091_v49 = vmax.f32 %v1089_v4, %v1090_v6  ;;  %v1342_v36 = vsub.f32 %v4471_v51, %v4629_v32  ;;  %3399 = vpow2.f32 %v1494_v13  ;;  %v327_v40 = vld [vmem:[%s3912_s30 + $0x3f8] sm:$0xff] }
 0x112   : > { %v1077_v27 = vrot.slane %v1076_v53, 2  ;;  %v1092_v19 = vsel %vm975_vm0, %v4691_v55, -inf  ;;  %709 = vadd.xlane.f32.xlu1 %v4602_v48  ;;  %v1737_v34 = vadd.f32 %v1736_v38, %v4625_v8  ;;  %v1753_v44 = vrot.slane %v1752_v3, 4  ;;  %v769_v48 = vld [vmem:[%s4065_s6 + $0x190] sm:$0xff] }
 0x113   : > { %v1093_v52 = vmax.f32 %v1091_v49, %v1092_v19  ;;  %707 = vadd.xlane.f32.xlu0 %v4605_v15  ;;  %v4704_v37 = vpop.xlane.xlu1 %569  ;;  %v459_v51 = vmul.f32 %v4412_v12, %v324_v21  ;;  %v1498_v17 = vmul.f32 1.442695, %v1341_v9  ;;  %v1094_v13 = vsel %vm975_vm0, %v4689_v46, -inf  ;;  %v771_v19 = vld [vmem:[%s4065_s6 + $0x1a0] sm:$0xff] }
 0x114   : > { %v568_v6 = vpop.xlane.xlu0 %567  ;;  %v1078_v10 = vmax.f32 %v1076_v53, %v1077_v27  ;;  %v4710_v1 = vadd.f32 %v768_v7, %v562_v20  ;;  %v1754_v8 = vadd.f32 %v1753_v44, %v1752_v3  ;;  %3401 = vpow2.f32 %v1496_v23  ;;  %v770_v27 = vld [vmem:[%s4065_s6 + $0x198] sm:$0xff] }
 0x115   : > { %v1095_v38 = vmax.f32 %v1093_v52, %v1094_v13  ;;  %v4714_v59 = vadd.f32 %v767_v14, %v560_v41  ;;  %3403 = vrcp.f32 %v1716_v39  ;;  %v1500_v15 = vmul.f32 1.442695, %v1342_v36 }
 0x116   : > { %v1079_v4 = vrot.slane %v1078_v10, 1  ;;  %713 = vadd.xlane.f32.xlu1 %v4638_v0  ;;  %v462_v9 = vmul.f32 %v4412_v12, %v327_v40  ;;  %3405 = vrcp.f32 %v1737_v34  ;;  %v1343_v20 = vsub.f32 %v4463_v31, %v4629_v32 }
 0x117   : > { %v4718_v53 = vpop.eup %3393  ;;  %v4722_v21 = vadd.f32 %v769_v48, %v564_v35  ;;  %711 = vadd.xlane.f32.xlu0 %v459_v51  ;;  %v4724_v41 = vpop.xlane.xlu1 %573  ;;  %v461_v3 = vmul.f32 %v4412_v12, %v326_v24  ;;  %3407 = vpow2.f32 %v1498_v17  ;;  %v1103_v32 = vsel %vm975_vm0, %v4710_v1, -inf }
 0x118   : > { %6869 = vst [vmem:[#allocation20_spill] sm:$0xff] %v4718_v53  ;;  %v4726_v39 = vpop.xlane.xlu0 %571  ;;  %v4729_v0 = vpop.eup %3395  ;;  %v1759_v23 = vsel %vm975_vm0, %v4718_v53, 0.0  ;;  %v4733_v49 = vmax.f32 %v1078_v10, %v1079_v4  ;;  %v1755_v35 = vrot.slane %v1754_v8, 2  ;;  %v1096_v36 = vrot.slane %v1095_v38, 4  ;;  %v772_v10 = vld [vmem:[%s4065_s6 + $0x1a8] sm:$0xff] }
 0x119   : > { %v4737_v31 = vpop.eup %3397  ;;  %v1760_v7 = vsel %vm975_vm0, %v4729_v0, 0.0  ;;  %v1102_v12 = vsel %vm975_vm0, %v4714_v59, -inf  ;;  %3409 = vpow2.f32 %v1500_v15  ;;  %v1105_v17 = vsel %vm975_vm0, %v4722_v21, -inf }
 0x11a   : > { %6870 = vst [vmem:[#allocation21_spill] sm:$0xff] %v4737_v31  ;;  %v1761_v14 = vadd.f32 %v1760_v7, %v1759_v23  ;;  %v1344_v34 = vsub.f32 %v4457_v61, %v4733_v49  ;;  %v1345_v44 = vsub.f32 %v4455_v58, %v4733_v49  ;;  %717 = vadd.xlane.f32.xlu1 %v462_v9  ;;  %v1762_v52 = vsel %vm975_vm0, %v4737_v31, 0.0 }
 0x11b   : > { %v1346_v51 = vsub.f32 %v4547_v16, %v4733_v49  ;;  %v1347_v40 = vsub.f32 %v4527_v5, %v4733_v49  ;;  %715 = vadd.xlane.f32.xlu0 %v461_v3  ;;  %v4758_v13 = vpop.xlane.xlu1 %577  ;;  %v4762_v58 = vpop.eup %3399  ;;  %v1104_v24 = vmax.f32 %v1102_v12, %v1103_v32  ;;  %v4765_v15 = vadd.f32 %v770_v27, %v4685_v54 }
 0x11c   : > { %v4760_v61 = vpop.xlane.xlu0 %575  ;;  %v1763_v48 = vadd.f32 %v1762_v52, %v1761_v14  ;;  %v4767_v16 = vadd.f32 %v771_v19, %v568_v6  ;;  %v1756_v4 = vadd.f32 %v1755_v35, %v1754_v8  ;;  %v1502_v5 = vmul.f32 1.442695, %v1343_v20 }
 0x11d   : > { %v1348_v9 = vsub.f32 %v4550_v42, %v4733_v49  ;;  %v1097_v23 = vmax.f32 %v1095_v38, %v1096_v36  ;;  %v1504_v3 = vmul.f32 1.442695, %v1344_v34  ;;  %v1506_v7 = vmul.f32 1.442695, %v1345_v44 }
 0x11e   : > { %v1106_v31 = vmax.f32 %v1104_v24, %v1105_v17  ;;  %v4772_v53 = vadd.f32 %v772_v10, %v4704_v37  ;;  %v4774_v28 = vpop.eup %3401  ;;  %v1764_v54 = vsel %vm975_vm0, %v4762_v58, 0.0  ;;  %v1349_v6 = vsub.f32 %v4556_v2, %v4733_v49  ;;  %v774_v10 = vld [vmem:[%s4065_s6 + $0x1b8] sm:$0xff] }
 0x11f   : > { %6871 = vst [vmem:[#allocation22_spill] sm:$0xff] %v4774_v28  ;;  %v1508_v8 = vmul.f32 1.442695, %v1346_v51  ;;  %v1510_v20 = vmul.f32 1.442695, %v1347_v40  ;;  %v4780_v32 = vpop.xlane.xlu1 %581  ;;  %v4784_v38 = vpop.eup %3403  ;;  %v1765_v35 = vadd.f32 %v1764_v54, %v1763_v48  ;;  %3411 = vpow2.f32 %v1504_v3  ;;  %v773_v48 = vld [vmem:[%s4065_s6 + $0x1b0] sm:$0xff] }
 0x120   : > { %v4782_v42 = vpop.xlane.xlu0 %579  ;;  %v1107_v37 = vsel %vm975_vm0, %v4765_v15, -inf  ;;  %v1109_v36 = vsel %vm975_vm0, %v4767_v16, -inf  ;;  %v4790_v12 = vpop.eup %3405  ;;  %v1757_v2 = vrot.slane %v1756_v4, 1  ;;  %3413 = vpow2.f32 %v1506_v7 }
 0x121   : > { %v1512_v27 = vmul.f32 1.442695, %v1348_v9  ;;  %v1098_v19 = vrot.slane %v1097_v23, 2  ;;  %v4792_v14 = vpop.eup %3407  ;;  %v1766_v34 = vsel %vm975_vm0, %v4774_v28, 0.0  ;;  %v1350_v44 = vsub.f32 %v4568_v56, %v4733_v49 }
 0x122   : > { %3415 = vpow2.f32 %v1508_v8  ;;  %v1108_v52 = vmax.f32 %v1106_v31, %v1107_v37  ;;  %v1351_v51 = vsub.f32 %v4621_v22, %v4733_v49  ;;  %v1514_v40 = vmul.f32 1.442695, %v1349_v6  ;;  %v776_v49 = vld [vmem:[%s4065_s6 + $0x1c8] sm:$0xff] }
 0x123   : > { %3417 = vpow2.f32 %v1510_v20  ;;  %v1099_v17 = vmax.f32 %v1097_v23, %v1098_v19  ;;  %v4802_v24 = vpop.xlane.xlu1 %585  ;;  %v4806_v3 = vpop.eup %3409  ;;  %v1767_v56 = vadd.f32 %v1766_v34, %v1765_v35  ;;  %v1111_v22 = vsel %vm975_vm0, %v4772_v53, -inf }
 0x124   : > { %v4804_v9 = vpop.xlane.xlu0 %583  ;;  %6872 = vst [vmem:[#allocation23_spill] sm:$0xff] %v4806_v3  ;;  %3419 = vpow2.f32 %v1502_v5  ;;  %v1110_v7 = vmax.f32 %v1108_v52, %v1109_v36  ;;  %v2034_v23 = vmul.f32 %v4784_v38, %v4330_v26  ;;  %v4813_v54 = vadd.f32 %v1757_v2, %v1756_v4  ;;  %v775_v36 = vld [vmem:[%s4065_s6 + $0x1c0] sm:$0xff] }
 0x125   : > { %3421 = vpow2.f32 %v1512_v27  ;;  %v1100_v31 = vrot.slane %v1099_v17, 1  ;;  %v1516_v6 = vmul.f32 1.442695, %v1350_v44  ;;  %v4816_v8 = vadd.f32 %v774_v10, %v4724_v41 }
 0x126   : > { %v4819_v5 = vadd.f32 %v773_v48, %v4726_v39  ;;  %v1768_v20 = vsel %vm975_vm0, %v4792_v14, 0.0  ;;  %3423 = vpow2.f32 %v1514_v40  ;;  %v1518_v35 = vmul.f32 1.442695, %v1351_v51 }
 0x127   : > { %v4823_v37 = vmax.f32 %v1099_v17, %v1100_v31  ;;  %v4826_v27 = vpop.xlane.xlu1 %589  ;;  %v1769_v4 = vadd.f32 %v1768_v20, %v1767_v56  ;;  %v1770_v41 = vsel %vm975_vm0, %v4806_v3, 0.0  ;;  %v1112_v2 = vmax.f32 %v1110_v7, %v1111_v22  ;;  %v777_v22 = vld [vmem:[%s4065_s6 + $0x1d0] sm:$0xff] }
 0x128   : > { %v4828_v26 = vpop.xlane.xlu0 %587  ;;  %v4833_v39 = vadd.f32 %v776_v49, %v4758_v13  ;;  %3425 = vpow2.f32 %v1516_v6  ;;  %v1113_v13 = vsel %vm975_vm0, %v4819_v5, -inf }
 0x129   : > { %v1352_v19 = vsub.f32 %v4572_v18, %v4823_v37  ;;  %v1353_v34 = vsub.f32 %v4570_v63, %v4823_v37  ;;  %v1354_v44 = vsub.f32 %v4584_v11, %v4823_v37  ;;  %v1355_v52 = vsub.f32 %v4623_v60, %v4823_v37  ;;  %v4843_v51 = vpop.eup %3411 }
 0x12a   : > { %6873 = vst [vmem:[#allocation24_spill] sm:$0xff] %v4843_v51  ;;  %v1356_v40 = vsub.f32 %v4671_v45, %v4823_v37  ;;  %v4850_v18 = vadd.f32 %v775_v36, %v4760_v61  ;;  %v4852_v63 = vpop.eup %3413  ;;  %3427 = vpow2.f32 %v1518_v35  ;;  %v1780_v11 = vsel %vm975_vm0, %v4843_v51, 0.0  ;;  %v780_v51 = vld [vmem:[%s4065_s6 + $0x1e8] sm:$0xff] }
 0x12b   : > { %6874 = vst [vmem:[#allocation25_spill] sm:$0xff] %v4852_v63  ;;  %v1520_v60 = vmul.f32 1.442695, %v1352_v19  ;;  %v1522_v17 = vmul.f32 1.442695, %v1353_v34  ;;  %v4856_v10 = vpop.xlane.xlu1 %593  ;;  %2183 = vperm.xlu1 %3344, %v2034_v23   ;;  %v1781_v61 = vsel %vm975_vm0, %v4852_v63, 0.0  ;;  %v1357_v56 = vsub.f32 %v4634_v33, %v4823_v37 }
 0x12c   : > { %v4858_v48 = vpop.xlane.xlu0 %591  ;;  %v4860_v45 = vpop.eup %3415  ;;  %v1524_v7 = vmul.f32 1.442695, %v1354_v44  ;;  %v1526_v31 = vmul.f32 1.442695, %v1355_v52  ;;  %v1782_v6 = vadd.f32 %v1781_v61, %v1780_v11  ;;  %v1528_v20 = vmul.f32 1.442695, %v1356_v40 }
 0x12d   : > { %6875 = vst [vmem:[#allocation26_spill] sm:$0xff] %v4860_v45  ;;  %v4867_v49 = vpop.eup %3417  ;;  %3429 = vpow2.f32 %v1520_v60  ;;  %v1114_v23 = vmax.f32 %v1112_v2, %v1113_v13  ;;  %v1783_v36 = vsel %vm975_vm0, %v4860_v45, 0.0  ;;  %v1124_v19 = vsel %vm975_vm0, %v4833_v39, -inf  ;;  %v778_v34 = vld [vmem:[%s4065_s6 + $0x1d8] sm:$0xff] }
 0x12e   : > { %6876 = vst [vmem:[#allocation27_spill] sm:$0xff] %v4867_v49  ;;  %v4869_v35 = vpop.eup %3419  ;;  %3431 = vpow2.f32 %v1522_v17  ;;  %v1123_v33 = vsel %vm975_vm0, %v4850_v18, -inf  ;;  %v1784_v52 = vadd.f32 %v1783_v36, %v1782_v6  ;;  %v1358_v2 = vsub.f32 %v4691_v55, %v4823_v37 }
 0x12f   : > { %6877 = vst [vmem:[#allocation28_spill] sm:$0xff] %v4869_v35  ;;  %v4878_v44 = vpop.eup %3421  ;;  %3433 = vpow2.f32 %v1524_v7  ;;  %v4883_v40 = vadd.f32 %v777_v22, %v4782_v42  ;;  %v4885_v13 = vpop.xlane.xlu1 %597  ;;  %v1785_v60 = vsel %vm975_vm0, %v4867_v49, 0.0  ;;  %v1530_v17 = vmul.f32 1.442695, %v1357_v56  ;;  %v779_v22 = vld [vmem:[%s4065_s6 + $0x1e0] sm:$0xff] }
 0x130   : > { %6878 = vst [vmem:[#allocation29_spill] sm:$0xff] %v4878_v44  ;;  %v4887_v11 = vpop.xlane.xlu0 %595  ;;  %3435 = vpow2.f32 %v1526_v31  ;;  %v1115_v61 = vsel %vm975_vm0, %v4816_v8, -inf  ;;  %v4893_v6 = vpop.eup %3423  ;;  %v1786_v55 = vadd.f32 %v1785_v60, %v1784_v52  ;;  %v4896_v7 = vadd.f32 %v778_v34, %v4780_v32 }
 0x131   : > { %6879 = vst [vmem:[#allocation30_spill] sm:$0xff] %v4893_v6  ;;  %3437 = vpow2.f32 %v1528_v20  ;;  %v1116_v42 = vmax.f32 %v1114_v23, %v1115_v61  ;;  %v1771_v36 = vadd.f32 %v1770_v41, %v1769_v4  ;;  %v1787_v45 = vsel %vm975_vm0, %v4878_v44, 0.0  ;;  %v781_v23 = vld [vmem:[%s4065_s6 + $0x1f0] sm:$0xff] }
 0x132   : > { %v1359_v56 = vsub.f32 %v4689_v46, %v4823_v37  ;;  %v1125_v31 = vmax.f32 %v1123_v33, %v1124_v19  ;;  %v1788_v3 = vadd.f32 %v1787_v45, %v1786_v55  ;;  %v1532_v28 = vmul.f32 1.442695, %v1358_v2  ;;  %v4911_v4 = vpop.eup %3425 }
 0x133   : > { %v1117_v49 = vrot.slane %v1116_v42, 4  ;;  %v1126_v20 = vsel %vm975_vm0, %v4883_v40, -inf  ;;  %v4907_v52 = vpop.xlane.xlu1 %601  ;;  %6880 = vst [vmem:[#allocation31_spill] sm:$0xff] %v4911_v4  ;;  %v1789_v41 = vsel %vm975_vm0, %v4893_v6, 0.0  ;;  %3439 = vpow2.f32 %v1530_v17 }
 0x134   : > { %v4909_v32 = vpop.xlane.xlu0 %599  ;;  %v1127_v46 = vmax.f32 %v1125_v31, %v1126_v20  ;;  %v4916_v37 = vadd.f32 %v779_v22, %v4804_v9  ;;  %v4918_v45 = vpop.eup %3427  ;;  %v1790_v19 = vadd.f32 %v1789_v41, %v1788_v3  ;;  %v1128_v34 = vsel %vm975_vm0, %v4896_v7, -inf  ;;  %v784_v22 = vld [vmem:[%s4065_s6 + $0x208] sm:$0xff] }
 0x135   : > { %6881 = vst [vmem:[#allocation32_spill] sm:$0xff] %v4918_v45  ;;  %v1118_v33 = vmax.f32 %v1116_v42, %v1117_v49  ;;  %v4923_v2 = vadd.f32 %v780_v51, %v4802_v24  ;;  %v1772_v60 = vsel %vm975_vm0, %v4869_v35, 0.0  ;;  %v4930_v9 = vadd.f32 %v781_v23, %v4828_v26  ;;  %v782_v51 = vld [vmem:[%s4065_s6 + $0x1f8] sm:$0xff] }
 0x136   : > { %v1129_v17 = vmax.f32 %v1127_v46, %v1128_v34  ;;  %v1130_v61 = vsel %vm975_vm0, %v4916_v37, -inf  ;;  %v1773_v3 = vadd.f32 %v1772_v60, %v1771_v36  ;;  %v1791_v49 = vsel %vm975_vm0, %v4911_v4, 0.0  ;;  %v783_v36 = vld [vmem:[%s4065_s6 + $0x200] sm:$0xff] }
 0x137   : > { %v4932_v55 = vpop.eup %3429  ;;  %v1534_v42 = vmul.f32 1.442695, %v1359_v56  ;;  %v1119_v24 = vrot.slane %v1118_v33, 2  ;;  %v4938_v31 = vpop.xlane.xlu1 %605  ;;  %v1792_v46 = vadd.f32 %v1791_v49, %v1790_v19  ;;  %3441 = vpow2.f32 %v1532_v28 }
 0x138   : > { %6882 = vst [vmem:[#allocation33_spill] sm:$0xff] %v4932_v55  ;;  %v4940_v20 = vpop.xlane.xlu0 %603  ;;  %v4942_v41 = vpop.eup %3431  ;;  %v1801_v26 = vsel %vm975_vm0, %v4932_v55, 0.0  ;;  %v1131_v23 = vmax.f32 %v1129_v17, %v1130_v61  ;;  %v1132_v4 = vsel %vm975_vm0, %v4923_v2, -inf  ;;  %v1134_v44 = vsel %vm975_vm0, %v4930_v9, -inf }
 0x139   : > { %6883 = vst [vmem:[#allocation34_spill] sm:$0xff] %v4942_v41  ;;  %v4947_v34 = vpop.eup %3433  ;;  %v1802_v56 = vsel %vm975_vm0, %v4942_v41, 0.0  ;;  %v1120_v60 = vmax.f32 %v1118_v33, %v1119_v24  ;;  %v4958_v19 = vadd.f32 %v782_v51, %v4826_v27  ;;  %v4961_v61 = vadd.f32 %v784_v22, %v4856_v10 }
 0x13a   : > { %6884 = vst [vmem:[#allocation35_spill] sm:$0xff] %v4947_v34  ;;  %v4955_v6 = vpop.eup %3435  ;;  %v1803_v28 = vadd.f32 %v1802_v56, %v1801_v26  ;;  %v1133_v17 = vmax.f32 %v1131_v23, %v1132_v4  ;;  %v1793_v33 = vsel %vm975_vm0, %v4918_v45, 0.0  ;;  %v1804_v24 = vsel %vm975_vm0, %v4947_v34, 0.0 }
 0x13b   : > { %6885 = vst [vmem:[#allocation36_spill] sm:$0xff] %v4955_v6  ;;  %v4963_v49 = vpop.eup %3437  ;;  %v1121_v55 = vrot.slane %v1120_v60, 1  ;;  %v4970_v41 = vadd.f32 %v783_v36, %v4858_v48  ;;  %v4972_v26 = vpop.xlane.xlu1 %609  ;;  %v1794_v4 = vadd.f32 %v1793_v33, %v1792_v46  ;;  %v2035_v22 = vmul.f32 %v4784_v38, %v4339_v47 }
 0x13c   : > { %6886 = vst [vmem:[#allocation37_spill] sm:$0xff] %v4963_v49  ;;  %v4974_v27 = vpop.xlane.xlu0 %607  ;;  %v1805_v10 = vadd.f32 %v1804_v24, %v1803_v28  ;;  %v1135_v51 = vmax.f32 %v1133_v17, %v1134_v44  ;;  %v1774_v23 = vrot.slane %v1773_v3, 4  ;;  %3443 = vpow2.f32 %v1534_v42  ;;  %v785_v42 = vld [vmem:[%s4065_s6 + $0x210] sm:$0xff] }
 0x13d   : > { %v1806_v56 = vsel %vm975_vm0, %v4955_v6, 0.0  ;;  %v4980_v34 = vmax.f32 %v1120_v60, %v1121_v55  ;;  %v4982_v48 = vpop.eup %3439  ;;  %v1808_v45 = vsel %vm975_vm0, %v4963_v49, 0.0  ;;  %v1136_v44 = vsel %vm975_vm0, %v4958_v19, -inf  ;;  %2188 = vperm.xlu1 %3344, %v2035_v22  }
 0x13e   : > { %6887 = vst [vmem:[#allocation38_spill] sm:$0xff] %v4982_v48  ;;  %v1807_v36 = vadd.f32 %v1806_v56, %v1805_v10  ;;  %v1145_v47 = vsel %vm975_vm0, %v4961_v61, -inf  ;;  %v1137_v28 = vmax.f32 %v1135_v51, %v1136_v44  ;;  %v1795_v24 = vrot.slane %v1794_v4, 4 }
 0x13f   : > { %v1360_v46 = vsub.f32 %v4714_v59, %v4980_v34  ;;  %v1361_v55 = vsub.f32 %v4710_v1, %v4980_v34  ;;  %v1362_v60 = vsub.f32 %v4722_v21, %v4980_v34  ;;  %v4997_v17 = vpop.xlane.xlu1 %613  ;;  %v1363_v22 = vsub.f32 %v4765_v15, %v4980_v34  ;;  %v786_v59 = vld [vmem:[%s4065_s6 + $0x218] sm:$0xff] }
 0x140   : > { %v4999_v33 = vpop.xlane.xlu0 %611  ;;  %v1809_v10 = vadd.f32 %v1808_v45, %v1807_v36  ;;  %v1144_v56 = vsel %vm975_vm0, %v4970_v41, -inf  ;;  %v5006_v49 = vadd.f32 %v1774_v23, %v1773_v3  ;;  %v1810_v1 = vsel %vm975_vm0, %v4982_v48, 0.0 }
 0x141   : > { %v1364_v21 = vsub.f32 %v4767_v16, %v4980_v34  ;;  %v5013_v51 = vadd.f32 %v785_v42, %v4887_v11  ;;  %v5015_v44 = vpop.eup %3441  ;;  %v1365_v15 = vsub.f32 %v4772_v53, %v4980_v34  ;;  %v1536_v45 = vmul.f32 1.442695, %v1360_v46 }
 0x142   : > { %6888 = vst [vmem:[#allocation39_spill] sm:$0xff] %v5015_v44  ;;  %v1538_v36 = vmul.f32 1.442695, %v1361_v55  ;;  %v1540_v6 = vmul.f32 1.442695, %v1362_v60  ;;  %v1811_v3 = vadd.f32 %v1810_v1, %v1809_v10  ;;  %v1138_v23 = vrot.slane %v1137_v28, 4 }
 0x143   : > { %v1146_v63 = vmax.f32 %v1144_v56, %v1145_v47  ;;  %v5020_v48 = vadd.f32 %v786_v59, %v4885_v13  ;;  %v5022_v35 = vpop.xlane.xlu1 %617  ;;  %v1796_v11 = vadd.f32 %v1795_v24, %v1794_v4  ;;  %v1366_v42 = vsub.f32 %v4819_v5, %v4980_v34  ;;  %v787_v47 = vld [vmem:[%s4065_s6 + $0x220] sm:$0xff] }
 0x144   : > { %v5024_v16 = vpop.xlane.xlu0 %615  ;;  %3445 = vpow2.f32 %v1536_v45  ;;  %v1542_v53 = vmul.f32 1.442695, %v1363_v22  ;;  %v1812_v46 = vsel %vm975_vm0, %v5015_v44, 0.0  ;;  %v1544_v55 = vmul.f32 1.442695, %v1364_v21 }
 0x145   : > { %3447 = vpow2.f32 %v1538_v36  ;;  %v1139_v60 = vmax.f32 %v1137_v28, %v1138_v23  ;;  %v1546_v13 = vmul.f32 1.442695, %v1365_v15  ;;  %v1147_v10 = vsel %vm975_vm0, %v5013_v51, -inf  ;;  %v788_v36 = vld [vmem:[%s4065_s6 + $0x228] sm:$0xff] }
 0x146   : > { %3449 = vpow2.f32 %v1540_v6  ;;  %v2033_v4 = vmul.f32 %v4784_v38, %v4316_v25  ;;  %v5035_v24 = vpop.eup %3443  ;;  %v1776_v5 = vrot.slane %v5006_v49, 2  ;;  %v1813_v22 = vadd.f32 %v1812_v46, %v1811_v3 }
 0x147   : > { %6889 = vst [vmem:[#allocation40_spill] sm:$0xff] %v5035_v24  ;;  %v1140_v56 = vrot.slane %v1139_v60, 2  ;;  %v1148_v59 = vmax.f32 %v1146_v63, %v1147_v10  ;;  %v5038_v1 = vpop.xlane.xlu1 %621  ;;  %3451 = vpow2.f32 %v1542_v53  ;;  %v1548_v6 = vmul.f32 1.442695, %v1366_v42 }
 0x148   : > { %v5040_v28 = vpop.xlane.xlu0 %619  ;;  %2178 = vperm.xlu0 %3343, %v2033_v4   ;;  %v2036_v21 = vmul.f32 %v4784_v38, %v4349_v62  ;;  %v5045_v25 = vadd.f32 %v787_v47, %v4909_v32  ;;  %v1367_v15 = vsub.f32 %v4816_v8, %v4980_v34  ;;  %3453 = vpow2.f32 %v1544_v55  ;;  %v789_v47 = vld [vmem:[%s4065_s6 + $0x230] sm:$0xff] }
 0x149   : > { %v1141_v45 = vmax.f32 %v1139_v60, %v1140_v56  ;;  %v1149_v63 = vsel %vm975_vm0, %v5020_v48, -inf  ;;  %v1797_v3 = vrot.slane %v1796_v11, 2  ;;  %3455 = vpow2.f32 %v1546_v13  ;;  %v6890_v60 = vld [vmem:[#allocation5_spill] sm:$0xff] }
 0x14a   : > { %2193 = vperm.xlu1 %3344, %v2036_v21   ;;  %v1150_v23 = vmax.f32 %v1148_v59, %v1149_v63  ;;  %v2043_v62 = vmul.f32 %v4790_v12, %v4449_v50  ;;  %v1814_v32 = vsel %vm975_vm0, %v5035_v24, 0.0  ;;  %v1151_v8 = vsel %vm975_vm0, %v5045_v25, -inf }
 0x14b   : > { %v1142_v42 = vrot.slane %v1141_v45, 1  ;;  %v5058_v34 = vpop.xlane.xlu1 %625  ;;  %v1815_v46 = vadd.f32 %v1814_v32, %v1813_v22  ;;  %3457 = vpow2.f32 %v1548_v6  ;;  %v5063_v55 = vadd.f32 %v788_v36, %v4907_v52  ;;  %v790_v52 = vld [vmem:[%s4065_s6 + $0x238] sm:$0xff]  ;;  %v6892_v6 = vld [vmem:[#allocation11_spill] sm:$0xff] }
 0x14c   : > { %v5060_v53 = vpop.xlane.xlu0 %623  ;;  %2223 = vperm.xlu0 %3343, %v2043_v62   ;;  %v2037_v50 = vmul.f32 %v4784_v38, %v6890_v60  ;;  %3459 = vrcp.f32 %v4813_v54  ;;  %v1550_v13 = vmul.f32 1.442695, %v1367_v15  ;;  %v5074_v56 = vadd.f32 %v1776_v5, %v5006_v49 }
 0x14d   : > { %v5069_v10 = vmax.f32 %v1141_v45, %v1142_v42  ;;  %v5076_v22 = vadd.f32 %v1797_v3, %v1796_v11  ;;  %v1152_v59 = vmax.f32 %v1150_v23, %v1151_v8  ;;  %v2045_v21 = vmul.f32 %v4790_v12, %v6892_v6  ;;  %v792_v8 = vld [vmem:[%s4065_s6 + $0x248] sm:$0xff] }
 0x14e   : > { %v5071_v4 = vpop.eup %3445  ;;  %2198 = vperm.xlu1 %3344, %v2037_v50   ;;  %v5090_v11 = vadd.f32 %v789_v47, %v4940_v20  ;;  %v1816_v3 = vrot.slane %v1815_v46, 4  ;;  %v1153_v62 = vsel %vm975_vm0, %v5063_v55, -inf  ;;  %3461 = vpow2.f32 %v1550_v13 }
 0x14f   : > { %6891 = vst [vmem:[#allocation5_spill] sm:$0xff] %v5071_v4  ;;  %v5081_v63 = vpop.eup %3447  ;;  %v1822_v54 = vsel %vm975_vm0, %v5071_v4, 0.0  ;;  %v1368_v15 = vsub.f32 %v4850_v18, %v5069_v10  ;;  %v1369_v49 = vsub.f32 %v4833_v39, %v5069_v10  ;;  %v5092_v5 = vpop.xlane.xlu1 %629  ;;  %v6895_v18 = vld [vmem:[#allocation6_spill] sm:$0xff]  ;;  %v1370_v32 = vsub.f32 %v4883_v40, %v5069_v10 }
 0x150   : > { %6893 = vst [vmem:[#allocation11_spill] sm:$0xff] %v5081_v63  ;;  %v5094_v45 = vpop.xlane.xlu0 %627  ;;  %v5096_v36 = vpop.eup %3449  ;;  %v1823_v23 = vsel %vm975_vm0, %v5081_v63, 0.0  ;;  %2233 = vperm.xlu0 %3343, %v2045_v21   ;;  %v2038_v39 = vmul.f32 %v4784_v38, %v6895_v18  ;;  %v5107_v42 = vadd.f32 %v790_v52, %v4938_v31  ;;  %v1154_v21 = vmax.f32 %v1152_v59, %v1153_v62  ;;  %v794_v59 = vld [vmem:[%s4065_s6 + $0x258] sm:$0xff]  ;;  %v796_v63 = vld [vmem:[%s4065_s6 + $0x268] sm:$0xff] }
 0x151   : > { %6894 = vst [vmem:[#allocation41_spill] sm:$0xff] %v5096_v36  ;;  %v1824_v20 = vadd.f32 %v1823_v23, %v1822_v54  ;;  %v5110_v60 = vpop.eup %3451  ;;  %v1825_v50 = vsel %vm975_vm0, %v5096_v36, 0.0  ;;  %v1552_v47 = vmul.f32 1.442695, %v1368_v15  ;;  %v1554_v6 = vmul.f32 1.442695, %v1369_v49 }
 0x152   : > { %6896 = vst [vmem:[#allocation6_spill] sm:$0xff] %v5110_v60  ;;  %2203 = vperm.xlu1 %3344, %v2038_v39   ;;  %v5114_v4 = vpop.eup %3453  ;;  %v1371_v40 = vsub.f32 %v4896_v7, %v5069_v10  ;;  %v1155_v31 = vsel %vm975_vm0, %v5090_v11, -inf  ;;  %v5128_v49 = vadd.f32 %v1816_v3, %v1815_v46  ;;  %v1827_v62 = vsel %vm975_vm0, %v5110_v60, 0.0  ;;  %v793_v36 = vld [vmem:[%s4065_s6 + $0x250] sm:$0xff] }
 0x153   : > { %6897 = vst [vmem:[#allocation42_spill] sm:$0xff] %v5114_v4  ;;  %v1826_v54 = vadd.f32 %v1825_v50, %v1824_v20  ;;  %v5121_v52 = vpop.xlane.xlu1 %633  ;;  %v5125_v15 = vpop.eup %3455  ;;  %v5133_v18 = vadd.f32 %v792_v8, %v4972_v26  ;;  %3463 = vpow2.f32 %v1552_v47  ;;  %v1556_v39 = vmul.f32 1.442695, %v1370_v32  ;;  %v791_v50 = vld [vmem:[%s4065_s6 + $0x240] sm:$0xff] }
 0x154   : > { %v5123_v23 = vpop.xlane.xlu0 %631  ;;  %6898 = vst [vmem:[#allocation43_spill] sm:$0xff] %v5125_v15  ;;  %v1157_v20 = vsel %vm975_vm0, %v5107_v42, -inf  ;;  %v1829_v46 = vsel %vm975_vm0, %v5114_v4, 0.0  ;;  %v1372_v3 = vsub.f32 %v4916_v37, %v5069_v10  ;;  %3465 = vpow2.f32 %v1554_v6 }
 0x155   : > { %v1828_v7 = vadd.f32 %v1827_v62, %v1826_v54  ;;  %v5138_v13 = vpop.eup %3457  ;;  %v1156_v26 = vmax.f32 %v1154_v21, %v1155_v31  ;;  %v1831_v32 = vsel %vm975_vm0, %v5125_v15, 0.0  ;;  %v1373_v47 = vsub.f32 %v4923_v2, %v5069_v10  ;;  %v6900_v21 = vld [vmem:[#allocation13_spill] sm:$0xff] }
 0x156   : > { %6899 = vst [vmem:[#allocation44_spill] sm:$0xff] %v5138_v13  ;;  %v5144_v8 = vpop.eup %3459  ;;  %v1558_v62 = vmul.f32 1.442695, %v1371_v40  ;;  %v1166_v37 = vsel %vm975_vm0, %v5133_v18, -inf  ;;  %v5159_v6 = vadd.f32 %v791_v50, %v4974_v27  ;;  %v2047_v31 = vmul.f32 %v4790_v12, %v6900_v21  ;;  %v6901_v40 = vld [vmem:[#allocation7_spill] sm:$0xff] }
 0x157   : > { %v1830_v54 = vadd.f32 %v1829_v46, %v1828_v7  ;;  %v5152_v44 = vpop.xlane.xlu1 %637  ;;  %v1158_v60 = vmax.f32 %v1156_v26, %v1157_v20  ;;  %v1833_v2 = vsel %vm975_vm0, %v5138_v13, 0.0  ;;  %3467 = vpow2.f32 %v1556_v39 }
 0x158   : > { %v5154_v4 = vpop.xlane.xlu0 %635  ;;  %v2039_v46 = vmul.f32 %v4784_v38, %v6901_v40  ;;  %v1165_v20 = vsel %vm975_vm0, %v5159_v6, -inf  ;;  %2243 = vperm.xlu0 %3343, %v2047_v31   ;;  %v5170_v27 = vadd.f32 %v794_v59, %v4997_v17  ;;  %v5173_v50 = vadd.f32 %v793_v36, %v4999_v33  ;;  %v5175_v26 = vpop.eup %3461  ;;  %v795_v40 = vld [vmem:[%s4065_s6 + $0x260] sm:$0xff]  ;;  %v6903_v36 = vld [vmem:[#allocation15_spill] sm:$0xff] }
 0x159   : > { %v1832_v7 = vadd.f32 %v1831_v32, %v1830_v54  ;;  %v1159_v15 = vrot.slane %v1158_v60, 4  ;;  %6902 = vst [vmem:[#allocation13_spill] sm:$0xff] %v5175_v26  ;;  %v1818_v54 = vrot.slane %v5128_v49, 2  ;;  %v1560_v32 = vmul.f32 1.442695, %v1372_v3 }
 0x15a   : > { %v1167_v21 = vmax.f32 %v1165_v20, %v1166_v37  ;;  %2208 = vperm.xlu1 %3344, %v2039_v46   ;;  %v1374_v31 = vsub.f32 %v4930_v9, %v5069_v10  ;;  %v1168_v33 = vsel %vm975_vm0, %v5173_v50, -inf  ;;  %v2049_v59 = vmul.f32 %v4790_v12, %v6903_v36  ;;  %v797_v20 = vld [vmem:[%s4065_s6 + $0x270] sm:$0xff] }
 0x15b   : > { %v1834_v39 = vadd.f32 %v1833_v2, %v1832_v7  ;;  %v5179_v13 = vpop.xlane.xlu1 %641  ;;  %v1160_v17 = vmax.f32 %v1158_v60, %v1159_v15  ;;  %3469 = vpow2.f32 %v1558_v62  ;;  %v1562_v3 = vmul.f32 1.442695, %v1373_v47  ;;  %v6904_v7 = vld [vmem:[#allocation8_spill] sm:$0xff] }
 0x15c   : > { %v5188_v24 = vpop.xlane.xlu0 %639  ;;  %v1169_v37 = vmax.f32 %v1167_v21, %v1168_v33  ;;  %v2040_v2 = vmul.f32 %v4784_v38, %v6904_v7  ;;  %v1835_v46 = vsel %vm975_vm0, %v5175_v26, 0.0  ;;  %v1170_v60 = vsel %vm975_vm0, %v5170_v27, -inf  ;;  %2253 = vperm.xlu0 %3343, %v2049_v59  }
 0x15d   : > { %v1161_v9 = vrot.slane %v1160_v17, 2  ;;  %v5197_v15 = vadd.f32 %v795_v40, %v5024_v16  ;;  %v5200_v36 = vpop.eup %3463  ;;  %v1836_v62 = vadd.f32 %v1835_v46, %v1834_v39  ;;  %3471 = vpow2.f32 %v1560_v32  ;;  %v6907_v40 = vld [vmem:[#allocation17_spill] sm:$0xff] }
 0x15e   : > { %6905 = vst [vmem:[#allocation7_spill] sm:$0xff] %v5200_v36  ;;  %v5203_v47 = vadd.f32 %v796_v63, %v5022_v35  ;;  %2213 = vperm.xlu1 %3344, %v2040_v2   ;;  %v1171_v38 = vmax.f32 %v1169_v37, %v1170_v60  ;;  %v5207_v33 = vpop.eup %3465  ;;  %v1843_v59 = vsel %vm975_vm0, %v5200_v36, 0.0  ;;  %v2052_v39 = vmul.f32 %v5144_v8, %v6907_v40  ;;  %v6908_v37 = vld [vmem:[#allocation9_spill] sm:$0xff] }
 0x15f   : > { %v5205_v21 = vpop.xlane.xlu1 %645  ;;  %6906 = vst [vmem:[#allocation15_spill] sm:$0xff] %v5207_v33  ;;  %v1162_v7 = vmax.f32 %v1160_v17, %v1161_v9  ;;  %v1172_v16 = vsel %vm975_vm0, %v5197_v15, -inf  ;;  %v1844_v35 = vsel %vm975_vm0, %v5207_v33, 0.0  ;;  %v2042_v2 = vmul.f32 %v4790_v12, %v6908_v37 }
 0x160   : > { %v5215_v32 = vpop.xlane.xlu0 %643  ;;  %v1173_v63 = vmax.f32 %v1171_v38, %v1172_v16  ;;  %v5222_v46 = vadd.f32 %v797_v20, %v5040_v28  ;;  %v6909_v17 = vrot.slane %v5074_v56, 1  ;;  %2263 = vperm.xlu0 %3343, %v2052_v39   ;;  %v1819_v36 = vadd.f32 %v1818_v54, %v5128_v49  ;;  %v798_v39 = vld [vmem:[%s4065_s6 + $0x278] sm:$0xff] }
 0x161   : > { %v1163_v60 = vrot.slane %v1162_v7, 1  ;;  %v5227_v40 = vpop.eup %3467  ;;  %v1837_v26 = vrot.slane %v1836_v62, 4  ;;  %v1845_v33 = vadd.f32 %v1844_v35, %v1843_v59  ;;  %v1174_v38 = vsel %vm975_vm0, %v5203_v47, -inf }
 0x162   : > { %v1779_v9 = vadd.f32 %v6909_v17, %v5074_v56  ;;  %6910 = vst [vmem:[#allocation8_spill] sm:$0xff] %v5227_v40  ;;  %2218 = vperm.xlu1 %3344, %v2042_v2   ;;  %v6911_v28 = vrot.slane %v5076_v22, 1  ;;  %v1175_v37 = vmax.f32 %v1173_v63, %v1174_v38  ;;  %v2054_v49 = vmul.f32 %v5144_v8, %v4618_v43  ;;  %v6912_v2 = vld [vmem:[#allocation10_spill] sm:$0xff] }
 0x163   : > { %v5232_v16 = vpop.xlane.xlu1 %649  ;;  %v5237_v56 = vmax.f32 %v1162_v7, %v1163_v60  ;;  %3473 = vpow2.f32 %v1562_v3  ;;  %v1564_v59 = vmul.f32 1.442695, %v1374_v31  ;;  %v1176_v35 = vsel %vm975_vm0, %v5222_v46, -inf  ;;  %v800_v31 = vld [vmem:[%s4065_s6 + $0x288] sm:$0xff] }
 0x164   : > { %v1800_v20 = vadd.f32 %v6911_v28, %v5076_v22  ;;  %v5242_v54 = vpop.xlane.xlu0 %647  ;;  %v2044_v17 = vmul.f32 %v4790_v12, %v6912_v2  ;;  %v1375_v22 = vsub.f32 %v4958_v19, %v5069_v10  ;;  %v1846_v7 = vsel %vm975_vm0, %v5227_v40, 0.0  ;;  %2273 = vperm.xlu0 %3343, %v2054_v49  }
 0x165   : > { %v1376_v63 = vsub.f32 %v4970_v41, %v5237_v56  ;;  %v1377_v43 = vsub.f32 %v4961_v61, %v5237_v56  ;;  %v5257_v3 = vpop.eup %3469  ;;  %v1820_v60 = vrot.slane %v1819_v36, 1  ;;  %v1838_v38 = vadd.f32 %v1837_v26, %v1836_v62 }
 0x166   : > { %6913 = vst [vmem:[#allocation17_spill] sm:$0xff] %v5257_v3  ;;  %v1847_v28 = vadd.f32 %v1846_v7, %v1845_v33  ;;  %v5260_v2 = vadd.f32 %v798_v39, %v5038_v1  ;;  %2228 = vperm.xlu1 %3344, %v2044_v17   ;;  %3475 = vrcp.f32 %v1779_v9  ;;  %v1378_v41 = vsub.f32 %v5013_v51, %v5237_v56  ;;  %v799_v9 = vld [vmem:[%s4065_s6 + $0x280] sm:$0xff]  ;;  %v801_v7 = vld [vmem:[%s4065_s6 + $0x290] sm:$0xff] }
 0x167   : > { %v5262_v19 = vpop.xlane.xlu1 %653  ;;  %v1177_v10 = vmax.f32 %v1175_v37, %v1176_v35  ;;  %v5268_v49 = vpop.eup %3471  ;;  %3477 = vpow2.f32 %v1564_v59  ;;  %v1568_v40 = vmul.f32 1.442695, %v1376_v63  ;;  %v1570_v26 = vmul.f32 1.442695, %v1377_v43 }
 0x168   : > { %v5266_v61 = vpop.xlane.xlu0 %651  ;;  %6914 = vst [vmem:[#allocation9_spill] sm:$0xff] %v5268_v49  ;;  %v5271_v1 = vadd.f32 %v800_v31, %v5058_v34  ;;  %3479 = vrcp.f32 %v1800_v20  ;;  %v1566_v62 = vmul.f32 1.442695, %v1375_v22  ;;  %v1848_v33 = vsel %vm975_vm0, %v5257_v3, 0.0  ;;  %v802_v22 = vld [vmem:[%s4065_s6 + $0x298] sm:$0xff] }
 0x169   : > { %v5276_v51 = vadd.f32 %v1820_v60, %v1819_v36  ;;  %v1839_v39 = vrot.slane %v1838_v38, 2  ;;  %v1849_v37 = vadd.f32 %v1848_v33, %v1847_v28  ;;  %v1178_v59 = vsel %vm975_vm0, %v5260_v2, -inf  ;;  %v6915_v60 = vld [vmem:[#allocation12_spill] sm:$0xff] }
 0x16a   : > { %v1379_v17 = vsub.f32 %v5020_v48, %v5237_v56  ;;  %3481 = vpow2.f32 %v1568_v40  ;;  %v1572_v34 = vmul.f32 1.442695, %v1378_v41  ;;  %v1179_v20 = vmax.f32 %v1177_v10, %v1178_v59 }
 0x16b   : > { %v5280_v35 = vpop.xlane.xlu1 %657  ;;  %3483 = vpow2.f32 %v1570_v26  ;;  %v1187_v36 = vsel %vm975_vm0, %v5271_v1, -inf  ;;  %v5291_v43 = vadd.f32 %v799_v9, %v5060_v53  ;;  %v2056_v31 = vmul.f32 %v5144_v8, %v4640_v57 }
 0x16c   : > { %v5286_v63 = vpop.xlane.xlu0 %655  ;;  %3485 = vpow2.f32 %v1566_v62  ;;  %v1850_v48 = vsel %vm975_vm0, %v5268_v49, 0.0  ;;  %v1180_v40 = vrot.slane %v1179_v20, 4  ;;  %v2046_v28 = vmul.f32 %v4790_v12, %v6915_v60 }
 0x16d   : > { %v5299_v41 = vpop.eup %3473  ;;  %v5301_v10 = vadd.f32 %v1839_v39, %v1838_v38  ;;  %v1186_v53 = vsel %vm975_vm0, %v5291_v43, -inf  ;;  %2283 = vperm.xlu0 %3343, %v2056_v31   ;;  %v5306_v26 = vadd.f32 %v802_v22, %v5092_v5  ;;  %v5309_v57 = vadd.f32 %v801_v7, %v5094_v45  ;;  %v803_v39 = vld [vmem:[%s4065_s6 + $0x2a0] sm:$0xff]  ;;  %v804_v31 = vld [vmem:[%s4065_s6 + $0x2a8] sm:$0xff] }
 0x16e   : > { %6916 = vst [vmem:[#allocation10_spill] sm:$0xff] %v5299_v41  ;;  %v1851_v33 = vadd.f32 %v1850_v48, %v1849_v37  ;;  %v1380_v9 = vsub.f32 %v5045_v25, %v5237_v56  ;;  %v1181_v59 = vmax.f32 %v1179_v20, %v1180_v40  ;;  %v1188_v38 = vmax.f32 %v1186_v53, %v1187_v36  ;;  %v805_v53 = vld [vmem:[%s4065_s6 + $0x2b0] sm:$0xff] }
 0x16f   : > { %v5311_v62 = vpop.xlane.xlu1 %661  ;;  %2238 = vperm.xlu1 %3344, %v2046_v28   ;;  %3487 = vpow2.f32 %v1572_v34  ;;  %v1574_v5 = vmul.f32 1.442695, %v1379_v17  ;;  %v1189_v45 = vsel %vm975_vm0, %v5309_v57, -inf  ;;  %v2058_v22 = vmul.f32 %v5144_v8, %v4664_v30  ;;  %v6918_v30 = vld [vmem:[#allocation14_spill] sm:$0xff] }
 0x170   : > { %v5316_v60 = vpop.xlane.xlu0 %659  ;;  %v5322_v37 = vpop.eup %3475  ;;  %v1852_v25 = vsel %vm975_vm0, %v5299_v41, 0.0  ;;  %v1381_v20 = vsub.f32 %v5063_v55, %v5237_v56  ;;  %v1182_v7 = vrot.slane %v1181_v59, 2  ;;  %v1190_v36 = vmax.f32 %v1188_v38, %v1189_v45 }
 0x171   : > { %v5329_v34 = vpop.eup %3477  ;;  %v1382_v17 = vsub.f32 %v5090_v11, %v5237_v56  ;;  %v1191_v48 = vsel %vm975_vm0, %v5306_v26, -inf  ;;  %2293 = vperm.xlu0 %3343, %v2058_v22   ;;  %v2048_v40 = vmul.f32 %v4790_v12, %v6918_v30  ;;  %v5338_v28 = vadd.f32 %v803_v39, %v5123_v23 }
 0x172   : > { %6917 = vst [vmem:[#allocation12_spill] sm:$0xff] %v5329_v34  ;;  %v5343_v38 = vpop.eup %3479  ;;  %v1853_v45 = vadd.f32 %v1852_v25, %v1851_v33  ;;  %v1576_v49 = vmul.f32 1.442695, %v1380_v9  ;;  %v1183_v41 = vmax.f32 %v1181_v59, %v1182_v7  ;;  %v1192_v3 = vmax.f32 %v1190_v36, %v1191_v48  ;;  %v6920_v36 = vld [vmem:[#allocation16_spill] sm:$0xff] }
 0x173   : > { %v5341_v55 = vpop.xlane.xlu1 %665  ;;  %3489 = vpow2.f32 %v1574_v5  ;;  %v5346_v11 = vadd.f32 %v804_v31, %v5121_v52  ;;  %2248 = vperm.xlu1 %3344, %v2048_v40   ;;  %v1193_v12 = vsel %vm975_vm0, %v5338_v28, -inf  ;;  %v2061_v23 = vmul.f32 %v5322_v37, %v4729_v0 }
 0x174   : > { %v5352_v39 = vpop.xlane.xlu0 %663  ;;  %v5354_v22 = vpop.eup %3481  ;;  %v1854_v33 = vsel %vm975_vm0, %v5329_v34, 0.0  ;;  %v1184_v9 = vrot.slane %v1183_v41, 1  ;;  %v1194_v59 = vmax.f32 %v1192_v3, %v1193_v12  ;;  %v5359_v5 = vadd.f32 %v805_v53, %v5154_v4 }
 0x175   : > { %6919 = vst [vmem:[#allocation14_spill] sm:$0xff] %v5354_v22  ;;  %v5361_v52 = vpop.eup %3483  ;;  %v1841_v25 = vrot.slane %v5301_v10, 1  ;;  %v1383_v0 = vsub.f32 %v5107_v42, %v5237_v56  ;;  %v1578_v7 = vmul.f32 1.442695, %v1381_v20  ;;  %2303 = vperm.xlu0 %3343, %v2061_v23   ;;  %v2051_v31 = vmul.f32 %v5144_v8, %v6920_v36  ;;  %v806_v20 = vld [vmem:[%s4065_s6 + $0x2b8] sm:$0xff]  ;;  %v808_v23 = vld [vmem:[%s4065_s6 + $0x2c8] sm:$0xff] }
 0x176   : > { %v5370_v3 = vpop.eup %3485  ;;  %v1580_v4 = vmul.f32 1.442695, %v1382_v17  ;;  %v1864_v30 = vsel %vm975_vm0, %v5354_v22, 0.0  ;;  %v1865_v40 = vsel %vm975_vm0, %v5361_v52, 0.0  ;;  %v5376_v53 = vmax.f32 %v1183_v41, %v1184_v9 }
 0x177   : > { %v5368_v48 = vpop.xlane.xlu1 %669  ;;  %v1855_v42 = vadd.f32 %v1854_v33, %v1853_v45  ;;  %3491 = vpow2.f32 %v1576_v49  ;;  %v1195_v56 = vsel %vm975_vm0, %v5346_v11, -inf  ;;  %2258 = vperm.xlu1 %3344, %v2051_v31   ;;  %v2063_v12 = vmul.f32 %v5322_v37, %v4762_v58 }
 0x178   : > { %v1384_v17 = vsub.f32 %v5159_v6, %v5376_v53  ;;  %v1385_v36 = vsub.f32 %v5133_v18, %v5376_v53  ;;  %v1196_v22 = vmax.f32 %v1194_v59, %v1195_v56  ;;  %v1197_v41 = vsel %vm975_vm0, %v5359_v5, -inf  ;;  %v5398_v9 = vpop.xlane.xlu0 %667 }
 0x179   : > { %v5390_v49 = vpop.eup %3487  ;;  %v1866_v45 = vadd.f32 %v1865_v40, %v1864_v30  ;;  %v1386_v33 = vsub.f32 %v5173_v50, %v5376_v53  ;;  %v1387_v58 = vsub.f32 %v5170_v27, %v5376_v53  ;;  %2313 = vperm.xlu0 %3343, %v2063_v12   ;;  %v2053_v6 = vmul.f32 %v5144_v8, %v4607_v29 }
 0x17a   : > { %6921 = vst [vmem:[#allocation16_spill] sm:$0xff] %v5390_v49  ;;  %v5403_v59 = vadd.f32 %v1841_v25, %v5301_v10  ;;  %v1856_v31 = vsel %vm975_vm0, %v5370_v3, 0.0  ;;  %v5408_v50 = vadd.f32 %v806_v20, %v5152_v44  ;;  %v5411_v27 = vadd.f32 %v808_v23, %v5179_v13  ;;  %v807_v44 = vld [vmem:[%s4065_s6 + $0x2c0] sm:$0xff] }
 0x17b   : > { %v5400_v18 = vpop.xlane.xlu1 %673  ;;  %v5413_v30 = vadd.f32 %v1856_v31, %v1855_v42  ;;  %3493 = vpow2.f32 %v1578_v7  ;;  %v1582_v29 = vmul.f32 1.442695, %v1383_v0  ;;  %v1388_v40 = vsub.f32 %v5197_v15, %v5376_v53  ;;  %2268 = vperm.xlu1 %3344, %v2053_v6   ;;  %v6922_v6 = vld [vmem:[#allocation18_spill] sm:$0xff] }
 0x17c   : > { %v1867_v10 = vsel %vm975_vm0, %v5390_v49, 0.0  ;;  %v1584_v25 = vmul.f32 1.442695, %v1384_v17  ;;  %v1586_v56 = vmul.f32 1.442695, %v1385_v36  ;;  %v1198_v12 = vmax.f32 %v1196_v22, %v1197_v41  ;;  %v810_v41 = vld [vmem:[%s4065_s6 + $0x2d8] sm:$0xff] }
 0x17d   : > { %v5420_v20 = vpop.eup %3489  ;;  %3495 = vpow2.f32 %v1580_v4  ;;  %v1868_v13 = vadd.f32 %v1867_v10, %v1866_v45  ;;  %v1588_v42 = vmul.f32 1.442695, %v1386_v33  ;;  %v1590_v7 = vmul.f32 1.442695, %v1387_v58  ;;  %v809_v45 = vld [vmem:[%s4065_s6 + $0x2d0] sm:$0xff]  ;;  %v5435_v33 = vpop.xlane.xlu0 %671 }
 0x17e   : > { %v1389_v15 = vsub.f32 %v5203_v47, %v5376_v53  ;;  %3497 = vpow2.f32 %v1584_v25  ;;  %v1199_v23 = vsel %vm975_vm0, %v5408_v50, -inf  ;;  %v1208_v22 = vsel %vm975_vm0, %v5411_v27, -inf }
 0x17f   : > { %v5422_v0 = vpop.xlane.xlu1 %677  ;;  %3499 = vpow2.f32 %v1586_v56  ;;  %v1592_v17 = vmul.f32 1.442695, %v1388_v40  ;;  %v1200_v36 = vmax.f32 %v1198_v12, %v1199_v23  ;;  %v5431_v4 = vadd.f32 %v807_v44, %v5188_v24  ;;  %v811_v23 = vld [vmem:[%s4065_s6 + $0x2e0] sm:$0xff] }
 0x180   : > { %v1869_v47 = vsel %vm975_vm0, %v5420_v20, 0.0  ;;  %3501 = vpow2.f32 %v1588_v42  ;;  %v2065_v58 = vmul.f32 %v5322_v37, %v4792_v14  ;;  %v2055_v31 = vmul.f32 %v5144_v8, %v6922_v6 }
 0x181   : > { %v5443_v10 = vpop.eup %3491  ;;  %v1870_v40 = vadd.f32 %v1869_v47, %v1868_v13  ;;  %3503 = vpow2.f32 %v1590_v7  ;;  %v1201_v24 = vrot.slane %v1200_v36, 4  ;;  %v1207_v25 = vsel %vm975_vm0, %v5431_v4, -inf }
 0x182   : > { %6923 = vst [vmem:[#allocation18_spill] sm:$0xff] %v5443_v10  ;;  %3505 = vrcp.f32 %v5276_v51  ;;  %v1390_v12 = vsub.f32 %v5222_v46, %v5376_v53  ;;  %2323 = vperm.xlu0 %3343, %v2065_v58   ;;  %v5453_v14 = vadd.f32 %v810_v41, %v5205_v21  ;;  %2278 = vperm.xlu1 %3344, %v2055_v31   ;;  %v1594_v13 = vmul.f32 1.442695, %v1389_v15  ;;  %v6924_v46 = vld [vmem:[#allocation28_spill] sm:$0xff]  ;;  %v6925_v21 = vld [vmem:[#allocation19_spill] sm:$0xff] }
 0x183   : > { %v5447_v56 = vpop.xlane.xlu1 %681  ;;  %v5456_v44 = vadd.f32 %v809_v45, %v5215_v32  ;;  %3507 = vpow2.f32 %v1592_v17  ;;  %v1202_v42 = vmax.f32 %v1200_v36, %v1201_v24  ;;  %v1209_v7 = vmax.f32 %v1207_v25, %v1208_v22  ;;  %v5470_v17 = vpop.xlane.xlu0 %675  ;;  %v812_v24 = vld [vmem:[%s4065_s6 + $0x2e8] sm:$0xff] }
 0x184   : > { %v1858_v47 = vrot.slane %v5413_v30, 4  ;;  %v2067_v58 = vmul.f32 %v5322_v37, %v6924_v46  ;;  %v2057_v41 = vmul.f32 %v5144_v8, %v6925_v21  ;;  %3509 = vpow2.f32 %v1582_v29  ;;  %v6929_v21 = vld [vmem:[#allocation25_spill] sm:$0xff] }
 0x185   : > { %v1210_v51 = vsel %vm975_vm0, %v5456_v44, -inf  ;;  %v5466_v6 = vpop.eup %3493  ;;  %v1871_v32 = vsel %vm975_vm0, %v5443_v10, 0.0  ;;  %v1203_v15 = vrot.slane %v1202_v42, 2  ;;  %v1391_v31 = vsub.f32 %v5260_v2, %v5376_v53 }
 0x186   : > { %6926 = vst [vmem:[#allocation28_spill] sm:$0xff] %v5466_v6  ;;  %v1211_v22 = vmax.f32 %v1209_v7, %v1210_v51  ;;  %v1872_v45 = vadd.f32 %v1871_v32, %v1870_v40  ;;  %v1212_v8 = vsel %vm975_vm0, %v5453_v14, -inf  ;;  %2333 = vperm.xlu0 %3343, %v2067_v58   ;;  %2288 = vperm.xlu1 %3344, %v2057_v41   ;;  %3511 = vpow2.f32 %v1594_v13  ;;  %v6930_v41 = vld [vmem:[#allocation20_spill] sm:$0xff] }
 0x187   : > { %v5472_v36 = vpop.xlane.xlu1 %685  ;;  %v5480_v29 = vadd.f32 %v811_v23, %v5242_v54  ;;  %v5482_v25 = vpop.eup %3495  ;;  %v1596_v7 = vmul.f32 1.442695, %v1390_v12  ;;  %v1204_v51 = vmax.f32 %v1202_v42, %v1203_v15  ;;  %v1859_v2 = vadd.f32 %v1858_v47, %v5413_v30  ;;  %v813_v23 = vld [vmem:[%s4065_s6 + $0x2f0] sm:$0xff] }
 0x188   : > { %6927 = vst [vmem:[#allocation19_spill] sm:$0xff] %v5482_v25  ;;  %v1213_v46 = vmax.f32 %v1211_v22, %v1212_v8  ;;  %v5484_v40 = vpop.eup %3497  ;;  %v2070_v58 = vmul.f32 %v5343_v38, %v6929_v21  ;;  %v2060_v54 = vmul.f32 %v5322_v37, %v6930_v41  ;;  %v1873_v12 = vsel %vm975_vm0, %v5466_v6, 0.0 }
 0x189   : > { %6928 = vst [vmem:[#allocation45_spill] sm:$0xff] %v5484_v40  ;;  %v1214_v53 = vsel %vm975_vm0, %v5480_v29, -inf  ;;  %v5494_v32 = vpop.eup %3499  ;;  %v1885_v13 = vsel %vm975_vm0, %v5484_v40, 0.0  ;;  %v1205_v42 = vrot.slane %v1204_v51, 1  ;;  %v5501_v30 = vadd.f32 %v812_v24, %v5232_v16  ;;  %v5514_v24 = vpop.xlane.xlu0 %679 }
 0x18a   : > { %6931 = vst [vmem:[#allocation25_spill] sm:$0xff] %v5494_v32  ;;  %v5503_v47 = vpop.eup %3501  ;;  %v1874_v15 = vadd.f32 %v1873_v12, %v1872_v45  ;;  %v1598_v22 = vmul.f32 1.442695, %v1391_v31  ;;  %v1886_v8 = vsel %vm975_vm0, %v5494_v32, 0.0  ;;  %v1215_v21 = vmax.f32 %v1213_v46, %v1214_v53  ;;  %2343 = vperm.xlu0 %3343, %v2070_v58   ;;  %2298 = vperm.xlu1 %3344, %v2060_v54   ;;  %v814_v53 = vld [vmem:[%s4065_s6 + $0x2f8] sm:$0xff]  ;;  %v815_v32 = vld [vmem:[%s4065_s6 + $0x300] sm:$0xff] }
 0x18b   : > { %6932 = vst [vmem:[#allocation20_spill] sm:$0xff] %v5503_v47  ;;  %v5507_v41 = vpop.eup %3503  ;;  %3513 = vpow2.f32 %v1596_v7  ;;  %v1887_v10 = vadd.f32 %v1886_v8, %v1885_v13  ;;  %v5509_v40 = vmax.f32 %v1204_v51, %v1205_v42  ;;  %v5512_v16 = vadd.f32 %v813_v23, %v5266_v61  ;;  %v5516_v45 = vpop.xlane.xlu1 %689  ;;  %v6934_v7 = vld [vmem:[#allocation27_spill] sm:$0xff]  ;;  %v6935_v51 = vld [vmem:[#allocation21_spill] sm:$0xff] }
 0x18c   : > { %6933 = vst [vmem:[#allocation46_spill] sm:$0xff] %v5507_v41  ;;  %v5518_v31 = vpop.eup %3505  ;;  %v1860_v12 = vrot.slane %v1859_v2, 2  ;;  %v1888_v46 = vsel %vm975_vm0, %v5503_v47, 0.0  ;;  %v2072_v58 = vmul.f32 %v5343_v38, %v6934_v7  ;;  %v2062_v54 = vmul.f32 %v5322_v37, %v6935_v51  ;;  %v816_v47 = vld [vmem:[%s4065_s6 + $0x308] sm:$0xff] }
 0x18d   : > { %v5527_v61 = vpop.eup %3507  ;;  %v1875_v23 = vsel %vm975_vm0, %v5482_v25, 0.0  ;;  %v1889_v13 = vadd.f32 %v1888_v46, %v1887_v10  ;;  %v1392_v42 = vsub.f32 %v5291_v43, %v5509_v40  ;;  %v1216_v8 = vsel %vm975_vm0, %v5501_v30, -inf }
 0x18e   : > { %6936 = vst [vmem:[#allocation27_spill] sm:$0xff] %v5527_v61  ;;  %3515 = vpow2.f32 %v1598_v22  ;;  %v1890_v7 = vsel %vm975_vm0, %v5507_v41, 0.0  ;;  %v1393_v51 = vsub.f32 %v5271_v1, %v5509_v40  ;;  %v1217_v49 = vmax.f32 %v1215_v21, %v1216_v8  ;;  %2353 = vperm.xlu0 %3343, %v2072_v58   ;;  %2308 = vperm.xlu1 %3344, %v2062_v54   ;;  %v5541_v25 = vpop.eup %3509  ;;  %v817_v8 = vld [vmem:[%s4065_s6 + $0x310] sm:$0xff] }
 0x18f   : > { %6937 = vst [vmem:[#allocation21_spill] sm:$0xff] %v5541_v25  ;;  %v1876_v10 = vadd.f32 %v1875_v23, %v1874_v15  ;;  %v1891_v46 = vadd.f32 %v1890_v7, %v1889_v13  ;;  %v5544_v43 = vadd.f32 %v814_v53, %v5262_v19  ;;  %v1218_v22 = vsel %vm975_vm0, %v5512_v16, -inf  ;;  %v5563_v23 = vpop.xlane.xlu1 %693 }
 0x190   : > { %3517 = vrcp.f32 %v5403_v59  ;;  %v1892_v41 = vsel %vm975_vm0, %v5527_v61, 0.0  ;;  %v1394_v1 = vsub.f32 %v5309_v57, %v5509_v40  ;;  %v5554_v21 = vadd.f32 %v816_v47, %v5280_v35  ;;  %v5556_v58 = vpop.eup %3511  ;;  %v5561_v59 = vpop.xlane.xlu0 %683 }
 0x191   : > { %6938 = vst [vmem:[#allocation47_spill] sm:$0xff] %v5556_v58  ;;  %v1893_v15 = vadd.f32 %v1892_v41, %v1891_v46  ;;  %v1600_v54 = vmul.f32 1.442695, %v1392_v42  ;;  %v1602_v19 = vmul.f32 1.442695, %v1393_v51  ;;  %v5559_v53 = vadd.f32 %v815_v32, %v5286_v63 }
 0x192   : > { %v5565_v13 = vadd.f32 %v1860_v12, %v1859_v2  ;;  %v1877_v35 = vsel %vm975_vm0, %v5541_v25, 0.0  ;;  %v1395_v57 = vsub.f32 %v5306_v26, %v5509_v40  ;;  %v1219_v47 = vmax.f32 %v1217_v49, %v1218_v22  ;;  %v818_v12 = vld [vmem:[%s4065_s6 + $0x318] sm:$0xff] }
 0x193   : > { %v5571_v41 = vadd.f32 %v1877_v35, %v1876_v10  ;;  %3519 = vpow2.f32 %v1600_v54  ;;  %v1220_v63 = vsel %vm975_vm0, %v5544_v43, -inf  ;;  %v1894_v32 = vsel %vm975_vm0, %v5556_v58, 0.0  ;;  %v6940_v10 = vld [vmem:[#allocation30_spill] sm:$0xff] }
 0x194   : > { %3521 = vpow2.f32 %v1602_v19  ;;  %v1604_v42 = vmul.f32 1.442695, %v1394_v1  ;;  %v1221_v2 = vmax.f32 %v1219_v47, %v1220_v63  ;;  %v1895_v51 = vadd.f32 %v1894_v32, %v1893_v15  ;;  %v6941_v19 = vld [vmem:[#allocation22_spill] sm:$0xff] }
 0x195   : > { %v5579_v7 = vpop.eup %3513  ;;  %v1229_v26 = vsel %vm975_vm0, %v5554_v21, -inf  ;;  %v1228_v49 = vsel %vm975_vm0, %v5559_v53, -inf  ;;  %v2074_v46 = vmul.f32 %v5343_v38, %v6940_v10  ;;  %v1862_v22 = vrot.slane %v5565_v13, 1  ;;  %v5599_v10 = vpop.xlane.xlu0 %687 }
 0x196   : > { %6939 = vst [vmem:[#allocation48_spill] sm:$0xff] %v5579_v7  ;;  %v1606_v54 = vmul.f32 1.442695, %v1395_v57  ;;  %v1222_v1 = vrot.slane %v1221_v2, 4  ;;  %v2064_v35 = vmul.f32 %v5322_v37, %v6941_v19  ;;  %v1879_v47 = vrot.slane %v5571_v41, 4  ;;  %v5601_v57 = vpop.xlane.xlu1 %697 }
 0x197   : > { %v1396_v15 = vsub.f32 %v5338_v28, %v5509_v40  ;;  %2363 = vperm.xlu0 %3343, %v2074_v46   ;;  %v5594_v63 = vadd.f32 %v818_v12, %v5311_v62  ;;  %v5597_v32 = vadd.f32 %v817_v8, %v5316_v60  ;;  %v1896_v19 = vsel %vm975_vm0, %v5579_v7, 0.0  ;;  %v819_v46 = vld [vmem:[%s4065_s6 + $0x320] sm:$0xff]  ;;  %v6943_v8 = vld [vmem:[#allocation32_spill] sm:$0xff] }
 0x198   : > { %v5603_v61 = vpop.eup %3515  ;;  %3523 = vpow2.f32 %v1604_v42  ;;  %v1223_v58 = vmax.f32 %v1221_v2, %v1222_v1  ;;  %v1230_v28 = vmax.f32 %v1228_v49, %v1229_v26  ;;  %2318 = vperm.xlu1 %3344, %v2064_v35   ;;  %v1897_v62 = vadd.f32 %v1896_v19, %v1895_v51  ;;  %v820_v42 = vld [vmem:[%s4065_s6 + $0x328] sm:$0xff]  ;;  %v6944_v2 = vld [vmem:[#allocation23_spill] sm:$0xff] }
 0x199   : > { %6942 = vst [vmem:[#allocation30_spill] sm:$0xff] %v5603_v61  ;;  %v1397_v60 = vsub.f32 %v5346_v11, %v5509_v40  ;;  %v1231_v12 = vsel %vm975_vm0, %v5597_v32, -inf  ;;  %v2076_v34 = vmul.f32 %v5343_v38, %v6943_v8  ;;  %3525 = vpow2.f32 %v1606_v54  ;;  %v821_v8 = vld [vmem:[%s4065_s6 + $0x330] sm:$0xff] }
 0x19a   : > { %v5614_v25 = vpop.eup %3517  ;;  %v1224_v6 = vrot.slane %v1223_v58, 2  ;;  %v1232_v7 = vmax.f32 %v1230_v28, %v1231_v12  ;;  %v2066_v26 = vmul.f32 %v5322_v37, %v6944_v2  ;;  %v1898_v51 = vsel %vm975_vm0, %v5603_v61, 0.0 }
 0x19b   : > { %v1608_v11 = vmul.f32 1.442695, %v1396_v15  ;;  %v1233_v49 = vsel %vm975_vm0, %v5594_v63, -inf  ;;  %2373 = vperm.xlu0 %3343, %v2076_v34   ;;  %v5624_v1 = vadd.f32 %v819_v46, %v5352_v39  ;;  %v1398_v54 = vsub.f32 %v5359_v5, %v5509_v40  ;;  %v6946_v39 = vld [vmem:[#allocation34_spill] sm:$0xff]  ;;  %v5640_v5 = vpop.xlane.xlu0 %691 }
 0x19c   : > { %v1399_v35 = vsub.f32 %v5408_v50, %v5509_v40  ;;  %v1225_v19 = vmax.f32 %v1223_v58, %v1224_v6  ;;  %2328 = vperm.xlu1 %3344, %v2066_v26   ;;  %v1234_v37 = vmax.f32 %v1232_v7, %v1233_v49  ;;  %v1610_v12 = vmul.f32 1.442695, %v1397_v60  ;;  %v5642_v50 = vpop.xlane.xlu1 %701  ;;  %v6948_v7 = vld [vmem:[#allocation24_spill] sm:$0xff] }
 0x19d   : > { %v5630_v28 = vpop.eup %3519  ;;  %v5633_v15 = vadd.f32 %v820_v42, %v5341_v55  ;;  %v1235_v34 = vsel %vm975_vm0, %v5624_v1, -inf  ;;  %v2079_v46 = vmul.f32 %v5518_v31, %v6946_v39  ;;  %v5647_v40 = vadd.f32 %v1862_v22, %v5565_v13 }
 0x19e   : > { %6945 = vst [vmem:[#allocation22_spill] sm:$0xff] %v5630_v28  ;;  %v5644_v6 = vpop.eup %3521  ;;  %v1899_v58 = vadd.f32 %v1898_v51, %v1897_v62  ;;  %v1226_v55 = vrot.slane %v1225_v19, 1  ;;  %v2069_v60 = vmul.f32 %v5343_v38, %v6948_v7  ;;  %3527 = vpow2.f32 %v1608_v11  ;;  %v822_v62 = vld [vmem:[%s4065_s6 + $0x338] sm:$0xff] }
 0x19f   : > { %6947 = vst [vmem:[#allocation32_spill] sm:$0xff] %v5644_v6  ;;  %v1906_v42 = vsel %vm975_vm0, %v5630_v28, 0.0  ;;  %v1907_v2 = vsel %vm975_vm0, %v5644_v6, 0.0  ;;  %v1236_v26 = vmax.f32 %v1234_v37, %v1235_v34  ;;  %2383 = vperm.xlu0 %3343, %v2079_v46   ;;  %v1880_v49 = vadd.f32 %v1879_v47, %v5571_v41  ;;  %v6949_v7 = vld [vmem:[#allocation36_spill] sm:$0xff]  ;;  %v824_v34 = vld [vmem:[%s4065_s6 + $0x348] sm:$0xff] }
 0x1a0   : > { %v1612_v13 = vmul.f32 1.442695, %v1398_v54  ;;  %v5656_v22 = vmax.f32 %v1225_v19, %v1226_v55  ;;  %2338 = vperm.xlu1 %3344, %v2069_v60   ;;  %v5660_v51 = vadd.f32 %v821_v8, %v5398_v9  ;;  %3529 = vpow2.f32 %v1610_v12  ;;  %v6951_v9 = vld [vmem:[#allocation26_spill] sm:$0xff] }
 0x1a1   : > { %v1614_v11 = vmul.f32 1.442695, %v1399_v35  ;;  %v1237_v39 = vsel %vm975_vm0, %v5633_v15, -inf  ;;  %v2081_v37 = vmul.f32 %v5518_v31, %v6949_v7  ;;  %v1908_v41 = vadd.f32 %v1907_v2, %v1906_v42  ;;  %v823_v35 = vld [vmem:[%s4065_s6 + $0x340] sm:$0xff]  ;;  %v5681_v42 = vpop.xlane.xlu0 %695  ;;  %v5683_v2 = vpop.xlane.xlu1 %705 }
 0x1a2   : > { %v5667_v46 = vpop.eup %3523  ;;  %v1400_v47 = vsub.f32 %v5431_v4, %v5656_v22  ;;  %v1401_v54 = vsub.f32 %v5411_v27, %v5656_v22  ;;  %v2071_v19 = vmul.f32 %v5343_v38, %v6951_v9  ;;  %v1900_v12 = vrot.slane %v1899_v58, 4 }
 0x1a3   : > { %6950 = vst [vmem:[#allocation23_spill] sm:$0xff] %v5667_v46  ;;  %v1402_v8 = vsub.f32 %v5456_v44, %v5656_v22  ;;  %v5679_v55 = vadd.f32 %v822_v62, %v5368_v48  ;;  %v1238_v60 = vmax.f32 %v1236_v26, %v1237_v39  ;;  %2393 = vperm.xlu0 %3343, %v2081_v37   ;;  %v5685_v4 = vpop.eup %3525  ;;  %3531 = vpow2.f32 %v1612_v13 }
 0x1a4   : > { %6952 = vst [vmem:[#allocation34_spill] sm:$0xff] %v5685_v4  ;;  %v1403_v27 = vsub.f32 %v5453_v14, %v5656_v22  ;;  %v1239_v7 = vsel %vm975_vm0, %v5660_v51, -inf  ;;  %v5692_v44 = vadd.f32 %v824_v34, %v5400_v18  ;;  %2348 = vperm.xlu1 %3344, %v2071_v19   ;;  %v1881_v48 = vrot.slane %v1880_v49, 2  ;;  %v826_v19 = vld [vmem:[%s4065_s6 + $0x358] sm:$0xff] }
 0x1a5   : > { %3533 = vpow2.f32 %v1614_v11  ;;  %v1909_v26 = vsel %vm975_vm0, %v5667_v46, 0.0  ;;  %v5697_v62 = vadd.f32 %v823_v35, %v5435_v33  ;;  %v1616_v39 = vmul.f32 1.442695, %v1400_v47  ;;  %v825_v47 = vld [vmem:[%s4065_s6 + $0x350] sm:$0xff] }
 0x1a6   : > { %v1910_v13 = vadd.f32 %v1909_v26, %v1908_v41  ;;  %v1618_v14 = vmul.f32 1.442695, %v1401_v54  ;;  %v1620_v37 = vmul.f32 1.442695, %v1402_v8  ;;  %v5699_v9 = vadd.f32 %v1900_v12, %v1899_v58  ;;  %v6954_v12 = vld [vmem:[#allocation38_spill] sm:$0xff] }
 0x1a7   : > { %v1911_v18 = vsel %vm975_vm0, %v5685_v4, 0.0  ;;  %v1241_v34 = vsel %vm975_vm0, %v5679_v55, -inf  ;;  %v1240_v11 = vmax.f32 %v1238_v60, %v1239_v7  ;;  %v1404_v46 = vsub.f32 %v5480_v29, %v5656_v22  ;;  %v5717_v60 = vpop.xlane.xlu0 %699  ;;  %v5719_v29 = vpop.xlane.xlu1 %709 }
 0x1a8   : > { %3535 = vpow2.f32 %v1616_v39  ;;  %v1622_v33 = vmul.f32 1.442695, %v1403_v27  ;;  %v1250_v41 = vsel %vm975_vm0, %v5692_v44, -inf  ;;  %v5711_v54 = vpop.eup %3527  ;;  %v1249_v35 = vsel %vm975_vm0, %v5697_v62, -inf }
 0x1a9   : > { %6953 = vst [vmem:[#allocation24_spill] sm:$0xff] %v5711_v54  ;;  %3537 = vpow2.f32 %v1618_v14  ;;  %v1242_v58 = vmax.f32 %v1240_v11, %v1241_v34  ;;  %v2083_v8 = vmul.f32 %v5518_v31, %v6954_v12  ;;  %v5721_v27 = vadd.f32 %v1881_v48, %v1880_v49  ;;  %v6956_v11 = vld [vmem:[#allocation29_spill] sm:$0xff] }
 0x1aa   : > { %v1912_v7 = vadd.f32 %v1911_v18, %v1910_v13  ;;  %3539 = vpow2.f32 %v1620_v37  ;;  %v5724_v26 = vadd.f32 %v826_v19, %v5422_v0  ;;  %v5726_v39 = vpop.eup %3529  ;;  %v1902_v14 = vrot.slane %v5699_v9, 2  ;;  %v828_v37 = vld [vmem:[%s4065_s6 + $0x368] sm:$0xff]  ;;  %v827_v18 = vld [vmem:[%s4065_s6 + $0x360] sm:$0xff] }
 0x1ab   : > { %6955 = vst [vmem:[#allocation36_spill] sm:$0xff] %v5726_v39  ;;  %v1243_v34 = vrot.slane %v1242_v58, 4  ;;  %2403 = vperm.xlu0 %3343, %v2083_v8   ;;  %v2073_v12 = vmul.f32 %v5343_v38, %v6956_v11  ;;  %v5732_v28 = vadd.f32 %v825_v47, %v5470_v17  ;;  %v1913_v49 = vsel %vm975_vm0, %v5711_v54, 0.0  ;;  %v6957_v11 = vld [vmem:[#allocation40_spill] sm:$0xff] }
 0x1ac   : > { %v1405_v0 = vsub.f32 %v5501_v30, %v5656_v22  ;;  %v1624_v48 = vmul.f32 1.442695, %v1404_v46  ;;  %v1251_v13 = vmax.f32 %v1249_v35, %v1250_v41  ;;  %3541 = vpow2.f32 %v1622_v33  ;;  %v829_v41 = vld [vmem:[%s4065_s6 + $0x370] sm:$0xff] }
 0x1ad   : > { %v1244_v19 = vmax.f32 %v1242_v58, %v1243_v34  ;;  %2358 = vperm.xlu1 %3344, %v2073_v12   ;;  %v1252_v8 = vsel %vm975_vm0, %v5732_v28, -inf  ;;  %v2085_v17 = vmul.f32 %v5518_v31, %v6957_v11  ;;  %v5744_v47 = vpop.eup %3531  ;;  %v1914_v54 = vadd.f32 %v1913_v49, %v1912_v7  ;;  %v6959_v34 = vld [vmem:[#allocation31_spill] sm:$0xff]  ;;  %v5761_v49 = vpop.xlane.xlu0 %703 }
 0x1ae   : > { %6958 = vst [vmem:[#allocation26_spill] sm:$0xff] %v5744_v47  ;;  %v1915_v4 = vsel %vm975_vm0, %v5726_v39, 0.0  ;;  %v1254_v30 = vsel %vm975_vm0, %v5724_v26, -inf  ;;  %v1253_v46 = vmax.f32 %v1251_v13, %v1252_v8  ;;  %v5754_v35 = vadd.f32 %v828_v37, %v5447_v56  ;;  %v5763_v11 = vpop.xlane.xlu1 %713  ;;  %v6960_v37 = vld [vmem:[#allocation11_spill] sm:$0xff] }
 0x1af   : > { %v5751_v33 = vpop.eup %3533  ;;  %v1245_v58 = vrot.slane %v1244_v19, 2  ;;  %2413 = vperm.xlu0 %3343, %v2085_v17   ;;  %v2075_v12 = vmul.f32 %v5343_v38, %v6959_v34  ;;  %v5759_v7 = vadd.f32 %v827_v18, %v5514_v24  ;;  %v1406_v13 = vsub.f32 %v5512_v16, %v5656_v22 }
 0x1b0   : > { %3543 = vpow2.f32 %v1624_v48  ;;  %v1626_v8 = vmul.f32 1.442695, %v1405_v0  ;;  %v1255_v39 = vmax.f32 %v1253_v46, %v1254_v30  ;;  %v2088_v38 = vmul.f32 %v5614_v25, %v6960_v37 }
 0x1b1   : > { %v1246_v17 = vmax.f32 %v1244_v19, %v1245_v58  ;;  %2368 = vperm.xlu1 %3344, %v2075_v12   ;;  %v1256_v56 = vsel %vm975_vm0, %v5759_v7, -inf  ;;  %v5772_v24 = vadd.f32 %v829_v41, %v5561_v59  ;;  %v1883_v34 = vrot.slane %v5721_v27, 1  ;;  %v6963_v59 = vld [vmem:[#allocation33_spill] sm:$0xff] }
 0x1b2   : > { %v5774_v18 = vpop.eup %3535  ;;  %v1903_v16 = vadd.f32 %v1902_v14, %v5699_v9  ;;  %v1916_v0 = vadd.f32 %v1915_v4, %v1914_v54  ;;  %v1257_v48 = vmax.f32 %v1255_v39, %v1256_v56  ;;  %v1258_v58 = vsel %vm975_vm0, %v5754_v35, -inf  ;;  %v830_v54 = vld [vmem:[%s4065_s6 + $0x378] sm:$0xff]  ;;  %v5799_v6 = vpop.xlane.xlu1 %717 }
 0x1b3   : > { %6961 = vst [vmem:[#allocation38_spill] sm:$0xff] %v5774_v18  ;;  %v5778_v19 = vpop.eup %3537  ;;  %v1927_v30 = vsel %vm975_vm0, %v5774_v18, 0.0  ;;  %v1247_v46 = vrot.slane %v1246_v17, 1  ;;  %2423 = vperm.xlu0 %3343, %v2088_v38   ;;  %v2078_v41 = vmul.f32 %v5518_v31, %v6963_v59  ;;  %v1407_v4 = vsub.f32 %v5544_v43, %v5656_v22  ;;  %v6965_v38 = vld [vmem:[#allocation6_spill] sm:$0xff]  ;;  %v5797_v18 = vpop.xlane.xlu0 %707 }
 0x1b4   : > { %6962 = vst [vmem:[#allocation29_spill] sm:$0xff] %v5778_v19  ;;  %v5786_v12 = vpop.eup %3539  ;;  %3545 = vpow2.f32 %v1626_v8  ;;  %v1928_v9 = vsel %vm975_vm0, %v5778_v19, 0.0  ;;  %v1259_v39 = vmax.f32 %v1257_v48, %v1258_v58  ;;  %v1628_v14 = vmul.f32 1.442695, %v1406_v13  ;;  %v832_v8 = vld [vmem:[%s4065_s6 + $0x388] sm:$0xff]  ;;  %v831_v19 = vld [vmem:[%s4065_s6 + $0x380] sm:$0xff] }
 0x1b5   : > { %6964 = vst [vmem:[#allocation40_spill] sm:$0xff] %v5786_v12  ;;  %v1929_v56 = vadd.f32 %v1928_v9, %v1927_v30  ;;  %2378 = vperm.xlu1 %3344, %v2078_v41   ;;  %v1260_v37 = vsel %vm975_vm0, %v5772_v24, -inf  ;;  %v2090_v59 = vmul.f32 %v5614_v25, %v6965_v38  ;;  %v1917_v43 = vsel %vm975_vm0, %v5744_v47, 0.0  ;;  %v6966_v9 = vld [vmem:[#allocation35_spill] sm:$0xff] }
 0x1b6   : > { %v1930_v22 = vsel %vm975_vm0, %v5786_v12, 0.0  ;;  %v5805_v13 = vmax.f32 %v1246_v17, %v1247_v46  ;;  %v5808_v48 = vpop.eup %3541  ;;  %v1918_v30 = vadd.f32 %v1917_v43, %v1916_v0  ;;  %v5811_v41 = vadd.f32 %v830_v54, %v5472_v36  ;;  %v833_v43 = vld [vmem:[%s4065_s6 + $0x390] sm:$0xff] }
 0x1b7   : > { %v1931_v58 = vadd.f32 %v1930_v22, %v1929_v56  ;;  %2433 = vperm.xlu0 %3343, %v2090_v59   ;;  %v2080_v38 = vmul.f32 %v5518_v31, %v6966_v9  ;;  %3547 = vrcp.f32 %v5647_v40  ;;  %v1630_v47 = vmul.f32 1.442695, %v1407_v4  ;;  %v5838_v56 = vpop.permute.xlu1 %2183 }
 0x1b8   : > { %v1261_v61 = vmax.f32 %v1259_v39, %v1260_v37  ;;  %v1884_v17 = vadd.f32 %v1883_v34, %v5721_v27  ;;  %v1904_v46 = vrot.slane %v1903_v16, 1  ;;  %3549 = vpow2.f32 %v1628_v14  ;;  %v5836_v14 = vpop.xlane.xlu0 %711  ;;  %6967 = vst [vmem:[#allocation31_spill] sm:$0xff] %v5838_v56 }
 0x1b9   : > { %v5819_v12 = vadd.f32 %v832_v8, %v5516_v45  ;;  %2388 = vperm.xlu1 %3344, %v2080_v38   ;;  %v1919_v36 = vsel %vm975_vm0, %v5751_v33, 0.0  ;;  %v1932_v54 = vsel %vm975_vm0, %v5808_v48, 0.0  ;;  %v1408_v40 = vsub.f32 %v5559_v53, %v5805_v13 }
 0x1ba   : > { %v5821_v0 = vpop.eup %3543  ;;  %v5830_v27 = vadd.f32 %v831_v19, %v5599_v10  ;;  %v1920_v34 = vadd.f32 %v1919_v36, %v1918_v30  ;;  %v1933_v45 = vadd.f32 %v1932_v54, %v1931_v58  ;;  %v1409_v4 = vsub.f32 %v5554_v21, %v5805_v13  ;;  %v834_v19 = vld [vmem:[%s4065_s6 + $0x398] sm:$0xff]  ;;  %v6969_v36 = vld [vmem:[#allocation37_spill] sm:$0xff] }
 0x1bb   : > { %v1262_v39 = vsel %vm975_vm0, %v5811_v41, -inf  ;;  %3551 = vpow2.f32 %v1630_v47  ;;  %v1905_v59 = vadd.f32 %v1904_v46, %v1903_v16  ;;  %v1934_v53 = vsel %vm975_vm0, %v5821_v0, 0.0  ;;  %v6968_v47 = vld [vmem:[#allocation43_spill] sm:$0xff] }
 0x1bc   : > { %v1263_v37 = vmax.f32 %v1261_v61, %v1262_v39  ;;  %3553 = vrcp.f32 %v1884_v17  ;;  %v1271_v10 = vsel %vm975_vm0, %v5819_v12, -inf  ;;  %v1632_v22 = vmul.f32 1.442695, %v1408_v40 }
 0x1bd   : > { %v1270_v30 = vsel %vm975_vm0, %v5830_v27, -inf  ;;  %v2092_v61 = vmul.f32 %v5614_v25, %v6968_v47  ;;  %v1921_v16 = vrot.slane %v1920_v34, 4  ;;  %v1935_v58 = vadd.f32 %v1934_v53, %v1933_v45  ;;  %v5869_v53 = vpop.xlane.xlu0 %715 }
 0x1be   : > { %v5846_v21 = vpop.eup %3545  ;;  %v1264_v8 = vrot.slane %v1263_v37, 4  ;;  %v1410_v9 = vsub.f32 %v5597_v32, %v5805_v13  ;;  %v1634_v38 = vmul.f32 1.442695, %v1409_v4  ;;  %v5855_v46 = vadd.f32 %v834_v19, %v5563_v23  ;;  %v5871_v23 = vpop.permute.xlu1 %2188 }
 0x1bf   : > { %2443 = vperm.xlu0 %3343, %v2092_v61   ;;  %v2082_v54 = vmul.f32 %v5518_v31, %v6969_v36  ;;  %v5860_v40 = vadd.f32 %v833_v43, %v5640_v5  ;;  %v1936_v39 = vsel %vm975_vm0, %v5846_v21, 0.0  ;;  %v1411_v45 = vsub.f32 %v5594_v63, %v5805_v13  ;;  %6970 = vst [vmem:[#allocation11_spill] sm:$0xff] %v5871_v23 }
 0x1c0   : > { %v1265_v17 = vmax.f32 %v1263_v37, %v1264_v8  ;;  %v1412_v32 = vsub.f32 %v5624_v1, %v5805_v13  ;;  %v1272_v4 = vmax.f32 %v1270_v30, %v1271_v10  ;;  %v835_v37 = vld [vmem:[%s4065_s6 + $0x3a0] sm:$0xff]  ;;  %3555 = vpow2.f32 %v1632_v22  ;;  %v6972_v22 = vld [vmem:[#allocation39_spill] sm:$0xff] }
 0x1c1   : > { %v5873_v19 = vpop.eup %3547  ;;  %2398 = vperm.xlu1 %3344, %v2082_v54   ;;  %v1273_v43 = vsel %vm975_vm0, %v5860_v40, -inf  ;;  %v6971_v8 = vld [vmem:[#allocation13_spill] sm:$0xff]  ;;  %v1937_v1 = vadd.f32 %v1936_v39, %v1935_v58  ;;  %3557 = vpow2.f32 %v1634_v38  ;;  %v1636_v10 = vmul.f32 1.442695, %v1410_v9  ;;  %v836_v38 = vld [vmem:[%s4065_s6 + $0x3a8] sm:$0xff] }
 0x1c2   : > { %v1266_v5 = vrot.slane %v1265_v17, 2  ;;  %v2094_v63 = vmul.f32 %v5614_v25, %v6971_v8  ;;  %v5879_v47 = vpop.eup %3549  ;;  %v1274_v30 = vmax.f32 %v1272_v4, %v1273_v43  ;;  %v1275_v36 = vsel %vm975_vm0, %v5855_v46, -inf  ;;  %v837_v8 = vld [vmem:[%s4065_s6 + $0x3b0] sm:$0xff] }
 0x1c3   : > { %v2084_v54 = vmul.f32 %v5518_v31, %v6972_v22  ;;  %v5886_v23 = vadd.f32 %v835_v37, %v5681_v42  ;;  %3559 = vrcp.f32 %v1905_v59  ;;  %v1922_v56 = vadd.f32 %v1921_v16, %v1920_v34  ;;  %v6973_v42 = vld [vmem:[#allocation15_spill] sm:$0xff]  ;;  %v6975_v22 = vld [vmem:[#allocation5_spill] sm:$0xff] }
 0x1c4   : > { %v1267_v61 = vmax.f32 %v1265_v17, %v1266_v5  ;;  %2453 = vperm.xlu0 %3343, %v2094_v63   ;;  %v1413_v58 = vsub.f32 %v5633_v15, %v5805_v13  ;;  %v1276_v9 = vmax.f32 %v1274_v30, %v1275_v36  ;;  %v1938_v4 = vsel %vm975_vm0, %v5879_v47, 0.0 }
 0x1c5   : > { %v5893_v17 = vpop.eup %3551  ;;  %2408 = vperm.xlu1 %3344, %v2084_v54   ;;  %v1277_v31 = vsel %vm975_vm0, %v5886_v23, -inf  ;;  %v2097_v34 = vmul.f32 %v5873_v19, %v6973_v42  ;;  %v1939_v15 = vadd.f32 %v1938_v4, %v1937_v1  ;;  %v1414_v16 = vsub.f32 %v5660_v51, %v5805_v13 }
 0x1c6   : > { %v1268_v5 = vrot.slane %v1267_v61, 1  ;;  %v5901_v59 = vpop.eup %3553  ;;  %v1638_v37 = vmul.f32 1.442695, %v1411_v45  ;;  %v1640_v43 = vmul.f32 1.442695, %v1412_v32  ;;  %3561 = vpow2.f32 %v1636_v10 }
 0x1c7   : > { %v5891_v39 = vpop.permute.xlu0 %2178  ;;  %v5911_v36 = vadd.f32 %v836_v38, %v5601_v57  ;;  %v2087_v54 = vmul.f32 %v5614_v25, %v6975_v22  ;;  %v1923_v1 = vrot.slane %v1922_v56, 2  ;;  %v1940_v51 = vsel %vm975_vm0, %v5893_v17, 0.0 }
 0x1c8   : > { %v5908_v30 = vmax.f32 %v1267_v61, %v1268_v5  ;;  %2463 = vperm.xlu0 %3343, %v2097_v34   ;;  %v1642_v45 = vmul.f32 1.442695, %v1413_v58  ;;  %v1278_v32 = vmax.f32 %v1276_v9, %v1277_v31  ;;  %v5922_v57 = vadd.f32 %v837_v8, %v5717_v60  ;;  %v6976_v61 = vld [vmem:[#allocation17_spill] sm:$0xff]  ;;  %v840_v8 = vld [vmem:[%s4065_s6 + $0x3c8] sm:$0xff] }
 0x1c9   : > { %v5906_v63 = vpop.permute.xlu1 %2193  ;;  %2418 = vperm.xlu1 %3344, %v2087_v54   ;;  %v2099_v38 = vmul.f32 %v5873_v19, %v6976_v61  ;;  %v1415_v5 = vsub.f32 %v5679_v55, %v5805_v13  ;;  %3563 = vpow2.f32 %v1638_v37  ;;  %v1644_v58 = vmul.f32 1.442695, %v1414_v16  ;;  %v6977_v34 = vld [vmem:[#allocation41_spill] sm:$0xff] }
 0x1ca   : > { %6974 = vst [vmem:[#allocation33_spill] sm:$0xff] %v5906_v63  ;;  %v1416_v4 = vsub.f32 %v5697_v62, %v5908_v30  ;;  %v1417_v10 = vsub.f32 %v5692_v44, %v5908_v30  ;;  %v1418_v9 = vsub.f32 %v5732_v28, %v5908_v30  ;;  %v838_v62 = vld [vmem:[%s4065_s6 + $0x3b8] sm:$0xff]  ;;  %v5933_v44 = vpop.eup %3555  ;;  %v1941_v42 = vadd.f32 %v1940_v51, %v1939_v15 }
 0x1cb   : > { %v5931_v31 = vpop.permute.xlu0 %2223  ;;  %3565 = vpow2.f32 %v1640_v43  ;;  %v1279_v60 = vsel %vm975_vm0, %v5911_v36, -inf  ;;  %v2089_v55 = vmul.f32 %v5614_v25, %v6977_v34  ;;  %v5941_v16 = vpop.eup %3557  ;;  %v5943_v28 = vadd.f32 %v1923_v1, %v1922_v56  ;;  %v839_v1 = vld [vmem:[%s4065_s6 + $0x3c0] sm:$0xff] }
 0x1cc   : > { %2473 = vperm.xlu0 %3343, %v2099_v38   ;;  %3567 = vpow2.f32 %v1642_v45  ;;  %v1280_v37 = vmax.f32 %v1278_v32, %v1279_v60  ;;  %v1648_v22 = vmul.f32 1.442695, %v1416_v4  ;;  %v1650_v15 = vmul.f32 1.442695, %v1417_v10 }
 0x1cd   : > { %v5939_v13 = vpop.permute.xlu1 %2198  ;;  %v5947_v43 = vadd.f32 %v838_v62, %v5642_v50  ;;  %v1281_v54 = vsel %vm975_vm0, %v5922_v57, -inf  ;;  %2428 = vperm.xlu1 %3344, %v2089_v55   ;;  %v5951_v51 = vpop.eup %3559  ;;  %3569 = vpow2.f32 %v1644_v58  ;;  %v1419_v61 = vsub.f32 %v5724_v26, %v5908_v30 }
 0x1ce   : > { %6978 = vst [vmem:[#allocation6_spill] sm:$0xff] %v5939_v13  ;;  %v1652_v56 = vmul.f32 1.442695, %v1418_v9  ;;  %v1942_v45 = vrot.slane %v1941_v42, 4  ;;  %v1646_v32 = vmul.f32 1.442695, %v1415_v5  ;;  %3571 = vpow2.f32 %v1648_v22 }
 0x1cf   : > { %v5957_v4 = vadd.f32 %v840_v8, %v5683_v2  ;;  %v1948_v50 = vsel %vm975_vm0, %v5933_v44, 0.0  ;;  %v1949_v10 = vsel %vm975_vm0, %v5941_v16, 0.0  ;;  %3573 = vpow2.f32 %v1650_v15  ;;  %v5963_v58 = vpop.permute.xlu0 %2233  ;;  %v842_v22 = vld [vmem:[%s4065_s6 + $0x3d8] sm:$0xff]  ;;  %v841_v15 = vld [vmem:[%s4065_s6 + $0x3d0] sm:$0xff] }
 0x1d0   : > { %v1282_v38 = vmax.f32 %v1280_v37, %v1281_v54  ;;  %6979 = vst [vmem:[#allocation35_spill] sm:$0xff] %v5963_v58  ;;  %v5965_v26 = vpop.eup %3561  ;;  %v1420_v2 = vsub.f32 %v5759_v7, %v5908_v30  ;;  %v1283_v9 = vsel %vm975_vm0, %v5947_v43, -inf  ;;  %v5973_v62 = vadd.f32 %v839_v1, %v5761_v49  ;;  %v6981_v37 = vld [vmem:[#allocation10_spill] sm:$0xff] }
 0x1d1   : > { %v5975_v60 = vpop.permute.xlu1 %2203  ;;  %3575 = vpow2.f32 %v1652_v56  ;;  %v1654_v34 = vmul.f32 1.442695, %v1419_v61  ;;  %v2101_v8 = vmul.f32 %v5873_v19, %v6981_v37  ;;  %v1950_v54 = vadd.f32 %v1949_v10, %v1948_v50  ;;  %v6982_v49 = vld [vmem:[#allocation42_spill] sm:$0xff]  ;;  %v843_v50 = vld [vmem:[%s4065_s6 + $0x3e0] sm:$0xff] }
 0x1d2   : > { %6980 = vst [vmem:[#allocation43_spill] sm:$0xff] %v5975_v60  ;;  %v1284_v55 = vmax.f32 %v1282_v38, %v1283_v9  ;;  %v1292_v7 = vsel %vm975_vm0, %v5957_v4, -inf  ;;  %v1291_v5 = vsel %vm975_vm0, %v5973_v62, -inf  ;;  %v2091_v1 = vmul.f32 %v5614_v25, %v6982_v49 }
 0x1d3   : > { %v5987_v60 = vpop.eup %3563  ;;  %v5989_v56 = vadd.f32 %v1942_v45, %v1941_v42  ;;  %3577 = vpow2.f32 %v1646_v32  ;;  %v1951_v61 = vsel %vm975_vm0, %v5965_v26, 0.0  ;;  %2483 = vperm.xlu0 %3343, %v2101_v8   ;;  %v1421_v9 = vsub.f32 %v5754_v35, %v5908_v30 }
 0x1d4   : > { %v1285_v38 = vrot.slane %v1284_v55, 4  ;;  %v1656_v37 = vmul.f32 1.442695, %v1420_v2  ;;  %v5999_v58 = vadd.f32 %v842_v22, %v5719_v29  ;;  %2438 = vperm.xlu1 %3344, %v2091_v1   ;;  %v6002_v42 = vadd.f32 %v841_v15, %v5797_v18  ;;  %v6984_v29 = vld [vmem:[#allocation44_spill] sm:$0xff] }
 0x1d5   : > { %v5994_v10 = vpop.eup %3565  ;;  %3579 = vpow2.f32 %v1654_v34  ;;  %v1293_v49 = vmax.f32 %v1291_v5, %v1292_v7  ;;  %v2103_v8 = vmul.f32 %v5873_v19, %v5370_v3  ;;  %v1952_v63 = vadd.f32 %v1951_v61, %v1950_v54 }
 0x1d6   : > { %v6004_v45 = vpop.eup %3567  ;;  %v1286_v32 = vmax.f32 %v1284_v55, %v1285_v38  ;;  %v1294_v35 = vsel %vm975_vm0, %v6002_v42, -inf  ;;  %v2093_v2 = vmul.f32 %v5614_v25, %v6984_v29  ;;  %v6015_v18 = vadd.f32 %v843_v50, %v5836_v14  ;;  %v844_v38 = vld [vmem:[%s4065_s6 + $0x3e8] sm:$0xff]  ;;  %v845_v29 = vld [vmem:[%s4065_s6 + $0x3f0] sm:$0xff] }
 0x1d7   : > { %v6008_v13 = vpop.permute.xlu0 %2243  ;;  %v6019_v34 = vpop.eup %3569  ;;  %v1953_v3 = vsel %vm975_vm0, %v5987_v60, 0.0  ;;  %v1422_v5 = vsub.f32 %v5772_v24, %v5908_v30  ;;  %v1295_v15 = vmax.f32 %v1293_v49, %v1294_v35  ;;  %2493 = vperm.xlu0 %3343, %v2103_v8   ;;  %v1423_v25 = vsub.f32 %v5811_v41, %v5908_v30 }
 0x1d8   : > { %6983 = vst [vmem:[#allocation37_spill] sm:$0xff] %v6008_v13  ;;  %v1287_v55 = vrot.slane %v1286_v32, 2  ;;  %v6025_v54 = vpop.eup %3571  ;;  %3581 = vpow2.f32 %v1656_v37  ;;  %v1658_v14 = vmul.f32 1.442695, %v1421_v9  ;;  %v1296_v7 = vsel %vm975_vm0, %v5999_v58, -inf  ;;  %2448 = vperm.xlu1 %3344, %v2093_v2   ;;  %v6987_v37 = vld [vmem:[#allocation7_spill] sm:$0xff] }
 0x1d9   : > { %v6017_v22 = vpop.permute.xlu1 %2208  ;;  %v6031_v1 = vpop.eup %3573  ;;  %v1969_v24 = vsel %vm975_vm0, %v6025_v54, 0.0  ;;  %v1297_v50 = vmax.f32 %v1295_v15, %v1296_v7  ;;  %v2106_v49 = vmul.f32 %v5901_v59, %v5361_v52  ;;  %v1954_v41 = vadd.f32 %v1953_v3, %v1952_v63 }
 0x1da   : > { %6985 = vst [vmem:[#allocation13_spill] sm:$0xff] %v6017_v22  ;;  %v1288_v61 = vmax.f32 %v1286_v32, %v1287_v55  ;;  %v1970_v30 = vsel %vm975_vm0, %v6031_v1, 0.0  ;;  %v1298_v9 = vsel %vm975_vm0, %v6015_v18, -inf  ;;  %v2096_v35 = vmul.f32 %v5873_v19, %v6987_v37 }
 0x1db   : > { %v6038_v8 = vpop.permute.xlu0 %2253  ;;  %v6049_v2 = vpop.eup %3575  ;;  %v1955_v52 = vsel %vm975_vm0, %v5994_v10, 0.0  ;;  %v1660_v55 = vmul.f32 1.442695, %v1422_v5  ;;  %v1971_v63 = vadd.f32 %v1970_v30, %v1969_v24  ;;  %2503 = vperm.xlu0 %3343, %v2106_v49   ;;  %v1957_v15 = vsel %vm975_vm0, %v6004_v45, 0.0  ;;  %v846_v24 = vld [vmem:[%s4065_s6 + $0x3f8] sm:$0xff] }
 0x1dc   : > { %6986 = vst [vmem:[#allocation39_spill] sm:$0xff] %v6038_v8  ;;  %v1289_v3 = vrot.slane %v1288_v61, 1  ;;  %v6057_v7 = vsel %vm975_vm0, %v6019_v34, 0.0  ;;  %3583 = vpow2.f32 %v1658_v14  ;;  %v6060_v37 = vadd.f32 %v844_v38, %v5763_v11  ;;  %2458 = vperm.xlu1 %3344, %v2096_v35   ;;  %v6989_v11 = vld [vmem:[#allocation8_spill] sm:$0xff] }
 0x1dd   : > { %v6047_v32 = vpop.permute.xlu1 %2213  ;;  %v6062_v8 = vpop.eup %3577  ;;  %v1299_v5 = vmax.f32 %v1297_v50, %v1298_v9  ;;  %v6068_v49 = vadd.f32 %v845_v29, %v5869_v53  ;;  %v2108_v30 = vmul.f32 %v5901_v59, %v5420_v20  ;;  %v1956_v22 = vadd.f32 %v1955_v52, %v1954_v41 }
 0x1de   : > { %6988 = vst [vmem:[#allocation15_spill] sm:$0xff] %v6047_v32  ;;  %v6064_v32 = vmax.f32 %v1288_v61, %v1289_v3  ;;  %v1662_v13 = vmul.f32 1.442695, %v1423_v25  ;;  %v1972_v14 = vsel %vm975_vm0, %v6049_v2, 0.0  ;;  %v2098_v38 = vmul.f32 %v5873_v19, %v6989_v11 }
 0x1df   : > { %v6076_v35 = vpop.permute.xlu0 %2263  ;;  %v6078_v61 = vpop.eup %3579  ;;  %3585 = vpow2.f32 %v1660_v55  ;;  %v1973_v50 = vadd.f32 %v1972_v14, %v1971_v63  ;;  %2513 = vperm.xlu0 %3343, %v2108_v30   ;;  %v1300_v29 = vsel %vm975_vm0, %v6060_v37, -inf  ;;  %v6093_v52 = vadd.f32 %v846_v24, %v5799_v6  ;;  %v6991_v63 = vld [vmem:[#allocation28_spill] sm:$0xff] }
 0x1e0   : > { %6990 = vst [vmem:[#allocation5_spill] sm:$0xff] %v6078_v61  ;;  %v1424_v53 = vsub.f32 %v5830_v27, %v6064_v32  ;;  %v1425_v20 = vsub.f32 %v5819_v12, %v6064_v32  ;;  %v1426_v41 = vsub.f32 %v5860_v40, %v6064_v32  ;;  %v1427_v9 = vsub.f32 %v5855_v46, %v6064_v32 }
 0x1e1   : > { %v6084_v25 = vpop.permute.xlu1 %2218  ;;  %2468 = vperm.xlu1 %3344, %v2098_v38   ;;  %v1428_v27 = vsub.f32 %v5886_v23, %v6064_v32  ;;  %v1301_v12 = vmax.f32 %v1299_v5, %v1300_v29  ;;  %v1302_v55 = vsel %vm975_vm0, %v6068_v49, -inf  ;;  %v2110_v40 = vmul.f32 %v5901_v59, %v6991_v63 }
 0x1e2   : > { %v6101_v3 = vpop.eup %3581  ;;  %v1974_v46 = vsel %vm975_vm0, %v6078_v61, 0.0  ;;  %v1429_v6 = vsub.f32 %v5911_v36, %v6064_v32  ;;  %v1664_v24 = vmul.f32 1.442695, %v1424_v53  ;;  %v1666_v30 = vmul.f32 1.442695, %v1425_v20  ;;  %v6992_v53 = vld [vmem:[#allocation9_spill] sm:$0xff] }
 0x1e3   : > { %3587 = vpow2.f32 %v1662_v13  ;;  %v1975_v14 = vadd.f32 %v1974_v46, %v1973_v50  ;;  %v1668_v23 = vmul.f32 1.442695, %v1426_v41  ;;  %v1670_v5 = vmul.f32 1.442695, %v1427_v9  ;;  %2523 = vperm.xlu0 %3343, %v2110_v40   ;;  %v6111_v63 = vpop.permute.xlu0 %2273 }
 0x1e4   : > { %v1958_v11 = vadd.f32 %v1957_v15, %v1956_v22  ;;  %v1430_v38 = vsub.f32 %v5922_v57, %v6064_v32  ;;  %3589 = vpow2.f32 %v1664_v24  ;;  %v1304_v29 = vsel %vm975_vm0, %v6093_v52, -inf  ;;  %v6994_v15 = vld [vmem:[#allocation21_spill] sm:$0xff] }
 0x1e5   : > { %3591 = vpow2.f32 %v1666_v30  ;;  %v1672_v61 = vmul.f32 1.442695, %v1428_v27  ;;  %v1303_v36 = vmax.f32 %v1301_v12, %v1302_v55  ;;  %v2100_v13 = vmul.f32 %v5873_v19, %v6992_v53  ;;  %v6115_v50 = vpop.permute.xlu1 %2228 }
 0x1e6   : > { %v6117_v20 = vpop.eup %3583  ;;  %v1976_v22 = vsel %vm975_vm0, %v6101_v3, 0.0  ;;  %3593 = vpow2.f32 %v1668_v23  ;;  %v1674_v57 = vmul.f32 1.442695, %v1429_v6  ;;  %v2112_v41 = vmul.f32 %v5901_v59, %v6994_v15  ;;  %v6997_v23 = vld [vmem:[#allocation12_spill] sm:$0xff] }
 0x1e7   : > { %6993 = vst [vmem:[#allocation17_spill] sm:$0xff] %v6117_v20  ;;  %v1977_v9 = vadd.f32 %v1976_v22, %v1975_v14  ;;  %v1431_v27 = vsub.f32 %v5947_v43, %v6064_v32  ;;  %3595 = vpow2.f32 %v1670_v5  ;;  %v1305_v12 = vmax.f32 %v1303_v36, %v1304_v29  ;;  %2478 = vperm.xlu1 %3344, %v2100_v13   ;;  %v6998_v5 = vld [vmem:[#allocation25_spill] sm:$0xff] }
 0x1e8   : > { %v6995_v55 = vrot.slane %v5943_v28, 1  ;;  %v1944_v46 = vrot.slane %v5989_v56, 2  ;;  %v1960_v24 = vadd.f32 %v6057_v7, %v1958_v11  ;;  %2533 = vperm.xlu0 %3343, %v2112_v41   ;;  %3597 = vpow2.f32 %v1672_v61 }
 0x1e9   : > { %v6130_v6 = vpop.eup %3585  ;;  %v1676_v30 = vmul.f32 1.442695, %v1430_v38  ;;  %v1306_v14 = vrot.slane %v1305_v12, 4  ;;  %v2102_v43 = vmul.f32 %v5873_v19, %v6997_v23  ;;  %v1978_v32 = vsel %vm975_vm0, %v6117_v20, 0.0 }
 0x1ea   : > { %v1926_v40 = vadd.f32 %v6995_v55, %v5943_v28  ;;  %6996 = vst [vmem:[#allocation41_spill] sm:$0xff] %v6130_v6  ;;  %3599 = vpow2.f32 %v1674_v57  ;;  %v2115_v28 = vmul.f32 %v5951_v51, %v6998_v5  ;;  %v1961_v7 = vsel %vm975_vm0, %v6062_v8, 0.0  ;;  %v7001_v57 = vld [vmem:[#allocation14_spill] sm:$0xff] }
 0x1eb   : > { %v1979_v11 = vadd.f32 %v1978_v32, %v1977_v9  ;;  %v1678_v36 = vmul.f32 1.442695, %v1431_v27  ;;  %v1307_v61 = vmax.f32 %v1305_v12, %v1306_v14  ;;  %2488 = vperm.xlu1 %3344, %v2102_v43   ;;  %v1945_v19 = vadd.f32 %v1944_v46, %v5989_v56  ;;  %v7002_v27 = vld [vmem:[#allocation46_spill] sm:$0xff] }
 0x1ec   : > { %v6138_v29 = vpop.permute.xlu0 %2283  ;;  %3601 = vrcp.f32 %v1926_v40  ;;  %v1962_v53 = vadd.f32 %v1961_v7, %v1960_v24  ;;  %2543 = vperm.xlu0 %3343, %v2115_v28   ;;  %v2105_v15 = vmul.f32 %v5901_v59, %v7001_v57  ;;  %v1980_v9 = vsel %vm975_vm0, %v6130_v6, 0.0  ;;  %v7007_v57 = vld [vmem:[#allocation47_spill] sm:$0xff] }
 0x1ed   : > { %6999 = vst [vmem:[#allocation10_spill] sm:$0xff] %v6138_v29  ;;  %v6145_v13 = vpop.eup %3587  ;;  %3603 = vpow2.f32 %v1676_v30  ;;  %v1308_v22 = vrot.slane %v1307_v61, 2  ;;  %v2117_v12 = vmul.f32 %v5951_v51, %v7002_v27  ;;  %v1981_v40 = vadd.f32 %v1980_v9, %v1979_v11  ;;  %v7006_v11 = vld [vmem:[#allocation16_spill] sm:$0xff] }
 0x1ee   : > { %v6142_v38 = vpop.permute.xlu1 %2238  ;;  %v6149_v41 = vpop.eup %3589  ;;  %3605 = vpow2.f32 %v1678_v36  ;;  %v1946_v14 = vrot.slane %v1945_v19, 1  ;;  %v1963_v23 = vrot.slane %v1962_v53, 4  ;;  %v2107_v36 = vmul.f32 %v5901_v59, %v7006_v11 }
 0x1ef   : > { %7000 = vst [vmem:[#allocation42_spill] sm:$0xff] %v6142_v38  ;;  %v6157_v56 = vpop.eup %3591  ;;  %v1990_v46 = vsel %vm975_vm0, %v6149_v41, 0.0  ;;  %v1309_v24 = vmax.f32 %v1307_v61, %v1308_v22  ;;  %2498 = vperm.xlu1 %3344, %v2105_v15   ;;  %v1982_v61 = vsel %vm975_vm0, %v6145_v13, 0.0  ;;  %v2119_v15 = vmul.f32 %v5951_v51, %v7007_v57 }
 0x1f0   : > { %v6155_v55 = vpop.permute.xlu0 %2293  ;;  %v6161_v30 = vpop.eup %3593  ;;  %v1991_v43 = vsel %vm975_vm0, %v6157_v56, 0.0  ;;  %2553 = vperm.xlu0 %3343, %v2117_v12   ;;  %v1983_v27 = vadd.f32 %v1982_v61, %v1981_v40  ;;  %v1947_v11 = vadd.f32 %v1946_v14, %v1945_v19 }
 0x1f1   : > { %7003 = vst [vmem:[#allocation44_spill] sm:$0xff] %v6155_v55  ;;  %v6167_v5 = vpop.eup %3595  ;;  %v1992_v28 = vadd.f32 %v1991_v43, %v1990_v46  ;;  %v1310_v7 = vrot.slane %v1309_v24, 1  ;;  %v1993_v22 = vsel %vm975_vm0, %v6161_v30, 0.0  ;;  %v1964_v55 = vadd.f32 %v1963_v23, %v1962_v53 }
 0x1f2   : > { %v6165_v32 = vpop.permute.xlu1 %2248  ;;  %7005 = vst [vmem:[#allocation8_spill] sm:$0xff] %v6167_v5  ;;  %v6177_v9 = vpop.eup %3597  ;;  %3607 = vrcp.f32 %v1947_v11 }
 0x1f3   : > { %7004 = vst [vmem:[#allocation7_spill] sm:$0xff] %v6165_v32  ;;  %v1994_v12 = vadd.f32 %v1993_v22, %v1992_v28  ;;  %v6179_v20 = vmax.f32 %v1309_v24, %v1310_v7  ;;  %2508 = vperm.xlu1 %3344, %v2107_v36   ;;  %v1995_v32 = vsel %vm975_vm0, %v6167_v5, 0.0  ;;  %v7009_v28 = vld [vmem:[#allocation18_spill] sm:$0xff]  ;;  %v1997_v19 = vsel %vm975_vm0, %v6177_v9, 0.0 }
 0x1f4   : > { %v6181_v46 = vpop.permute.xlu0 %2303  ;;  %v6183_v43 = vpop.eup %3599  ;;  %2563 = vperm.xlu0 %3343, %v2119_v15   ;;  %v2109_v24 = vmul.f32 %v5901_v59, %v7009_v28  ;;  %v7010_v7 = vld [vmem:[#allocation30_spill] sm:$0xff] }
 0x1f5   : > { %7008 = vst [vmem:[#allocation28_spill] sm:$0xff] %v6183_v43  ;;  %v1996_v57 = vadd.f32 %v1995_v32, %v1994_v12  ;;  %v1432_v40 = vsub.f32 %v5973_v62, %v6179_v20  ;;  %v2121_v36 = vmul.f32 %v5951_v51, %v7010_v7  ;;  %v1433_v53 = vsub.f32 %v5957_v4, %v6179_v20 }
 0x1f6   : > { %v6187_v29 = vpop.permute.xlu1 %2258  ;;  %v6195_v61 = vpop.eup %3601  ;;  %v1434_v14 = vsub.f32 %v6002_v42, %v6179_v20  ;;  %v1435_v62 = vsub.f32 %v5999_v58, %v6179_v20  ;;  %v1984_v32 = vrot.slane %v1983_v27, 4  ;;  %v1999_v15 = vsel %vm975_vm0, %v6183_v43, 0.0 }
 0x1f7   : > { %v6205_v23 = vpop.eup %3603  ;;  %v1998_v22 = vadd.f32 %v1997_v19, %v1996_v57  ;;  %v1436_v12 = vsub.f32 %v6015_v18, %v6179_v20  ;;  %2518 = vperm.xlu1 %3344, %v2109_v24   ;;  %v1680_v28 = vmul.f32 1.442695, %v1432_v40  ;;  %v1682_v4 = vmul.f32 1.442695, %v1433_v53  ;;  %v7011_v57 = vld [vmem:[#allocation19_spill] sm:$0xff]  ;;  %v7012_v40 = vld [vmem:[#allocation32_spill] sm:$0xff] }
 0x1f8   : > { %v1684_v7 = vmul.f32 1.442695, %v1434_v14  ;;  %2573 = vperm.xlu0 %3343, %v2121_v36   ;;  %v6211_v42 = vpop.eup %3605  ;;  %v1437_v58 = vsub.f32 %v6060_v37, %v6179_v20  ;;  %v1686_v6 = vmul.f32 1.442695, %v1435_v62  ;;  %v2111_v19 = vmul.f32 %v5901_v59, %v7011_v57  ;;  %v6217_v43 = vpop.permute.xlu0 %2313  ;;  %v7013_v62 = vld [vmem:[#allocation45_spill] sm:$0xff]  ;;  %v7014_v57 = vld [vmem:[#allocation34_spill] sm:$0xff] }
 0x1f9   : > { %v2000_v5 = vadd.f32 %v1999_v15, %v1998_v22  ;;  %v1965_v18 = vrot.slane %v1964_v55, 2  ;;  %v2001_v11 = vsel %vm975_vm0, %v6205_v23, 0.0  ;;  %3609 = vpow2.f32 %v1680_v28 }
 0x1fa   : > { %v6219_v38 = vpop.permute.xlu1 %2268  ;;  %v2124_v24 = vmul.f32 %v6195_v61, %v7012_v40  ;;  %v1438_v37 = vsub.f32 %v6068_v49, %v6179_v20  ;;  %3611 = vpow2.f32 %v1682_v4  ;;  %v1688_v53 = vmul.f32 1.442695, %v1436_v12 }
 0x1fb   : > { %v2002_v36 = vadd.f32 %v2001_v11, %v2000_v5  ;;  %2528 = vperm.xlu1 %3344, %v2111_v19   ;;  %v1985_v59 = vadd.f32 %v1984_v32, %v1983_v27  ;;  %v2003_v14 = vsel %vm975_vm0, %v6211_v42, 0.0  ;;  %3613 = vpow2.f32 %v1684_v7 }
 0x1fc   : > { %2583 = vperm.xlu0 %3343, %v2124_v24   ;;  %v2114_v22 = vmul.f32 %v5951_v51, %v7013_v62  ;;  %v1439_v28 = vsub.f32 %v6093_v52, %v6179_v20  ;;  %3615 = vpow2.f32 %v1686_v6  ;;  %v1690_v5 = vmul.f32 1.442695, %v1437_v58  ;;  %v7016_v52 = vld [vmem:[#allocation20_spill] sm:$0xff]  ;;  %v6241_v6 = vpop.eup %3607 }
 0x1fd   : > { %v2004_v15 = vadd.f32 %v2003_v14, %v2002_v36  ;;  %v2126_v49 = vmul.f32 %v6195_v61, %v7014_v57  ;;  %3617 = vpow2.f32 %v1688_v53  ;;  %v1692_v27 = vmul.f32 1.442695, %v1438_v37  ;;  %v7017_v58 = vld [vmem:[#allocation36_spill] sm:$0xff] }
 0x1fe   : > { %v1966_v7 = vadd.f32 %v1965_v18, %v1964_v55  ;;  %v1986_v19 = vrot.slane %v1985_v59, 2  ;;  %3619 = vpow2.f32 %v1690_v5  ;;  %v1694_v40 = vmul.f32 1.442695, %v1439_v28 }
 0x1ff   : > { %v2005_v12 = vrot.slane %v2004_v15, 4  ;;  %2538 = vperm.xlu1 %3344, %v2114_v22   ;;  %v2116_v20 = vmul.f32 %v5951_v51, %v7016_v52  ;;  %v2128_v24 = vmul.f32 %v6195_v61, %v7017_v58  ;;  %3621 = vpow2.f32 %v1692_v27 }
 0x200   : > { %2593 = vperm.xlu0 %3343, %v2126_v49   ;;  %v1967_v18 = vrot.slane %v1966_v7, 1  ;;  %v1987_v62 = vadd.f32 %v1986_v19, %v1985_v59  ;;  %3623 = vpow2.f32 %v1694_v40 }
 0x201   : > { %v6235_v32 = vpop.permute.xlu0 %2323  ;;  %v6237_v4 = vpop.permute.xlu1 %2278  ;;  %v2006_v11 = vadd.f32 %v2005_v12, %v2004_v15  ;;  %v7019_v15 = vld [vmem:[#allocation27_spill] sm:$0xff]  ;;  %v2130_v12 = vmul.f32 %v6195_v61, %v5751_v33 }
 0x202   : > { %7015 = vst [vmem:[#allocation9_spill] sm:$0xff] %v6235_v32  ;;  %v2118_v28 = vmul.f32 %v5951_v51, %v7019_v15 }
 0x203   : > { %v2007_v36 = vrot.slane %v2006_v11, 2  ;;  %2548 = vperm.xlu1 %3344, %v2116_v20   ;;  %v6249_v55 = vpop.eup %3609  ;;  %v1968_v20 = vadd.f32 %v1967_v18, %v1966_v7 }
 0x204   : > { %2603 = vperm.xlu0 %3343, %v2128_v24   ;;  %v6251_v14 = vpop.eup %3611  ;;  %v2011_v22 = vsel %vm975_vm0, %v6249_v55, 0.0  ;;  %v7021_v24 = vld [vmem:[#allocation48_spill] sm:$0xff] }
 0x205   : > { %v6245_v37 = vpop.permute.xlu0 %2333  ;;  %v6247_v53 = vpop.permute.xlu1 %2288  ;;  %v2008_v57 = vadd.f32 %v2007_v36, %v2006_v11  ;;  %v2012_v49 = vsel %vm975_vm0, %v6251_v14, 0.0  ;;  %v1988_v11 = vrot.slane %v1987_v62, 1  ;;  %v2120_v36 = vmul.f32 %v5951_v51, %v7021_v24 }
 0x206   : > { %7018 = vst [vmem:[#allocation21_spill] sm:$0xff] %v6245_v37  ;;  %v6257_v5 = vpop.eup %3613  ;;  %v2013_v52 = vadd.f32 %v2012_v49, %v2011_v22  ;;  %3625 = vrcp.f32 %v1968_v20 }
 0x207   : > { %v6263_v27 = vpop.eup %3615  ;;  %2558 = vperm.xlu1 %3344, %v2118_v28   ;;  %v2014_v59 = vsel %vm975_vm0, %v6257_v5, 0.0  ;;  %v2009_v33 = vrot.slane %v2008_v57, 1  ;;  %v7022_v28 = vld [vmem:[#allocation29_spill] sm:$0xff]  ;;  %v1989_v51 = vadd.f32 %v1988_v11, %v1987_v62  ;;  %v2137_v11 = vmul.f32 %v6241_v6, %v5846_v21 }
 0x208   : > { %7020 = vst [vmem:[#allocation12_spill] sm:$0xff] %v6263_v27  ;;  %2613 = vperm.xlu0 %3343, %v2130_v12   ;;  %v6269_v40 = vpop.eup %3617  ;;  %v2015_v58 = vadd.f32 %v2014_v59, %v2013_v52  ;;  %v2016_v22 = vsel %vm975_vm0, %v6263_v27, 0.0  ;;  %v2133_v49 = vmul.f32 %v6241_v6, %v7022_v28  ;;  %v7023_v59 = vld [vmem:[#allocation22_spill] sm:$0xff] }
 0x209   : > { %v6267_v19 = vpop.permute.xlu0 %2343  ;;  %v6273_v15 = vpop.permute.xlu1 %2298  ;;  %v2018_v7 = vsel %vm975_vm0, %v6269_v40, 0.0  ;;  %v2123_v24 = vmul.f32 %v6195_v61, %v7023_v59  ;;  %v2010_v27 = vadd.f32 %v2009_v33, %v2008_v57  ;;  %3627 = vrcp.f32 %v1989_v51  ;;  %v7024_v57 = vld [vmem:[#allocation23_spill] sm:$0xff]  ;;  %v7025_v59 = vld [vmem:[#allocation24_spill] sm:$0xff] }
 0x20a   : > { %v6279_v12 = vpop.eup %3619  ;;  %v2017_v37 = vadd.f32 %v2016_v22, %v2015_v58  ;;  %v2135_v58 = vmul.f32 %v6241_v6, %v5808_v48  ;;  %v2125_v20 = vmul.f32 %v6195_v61, %v7024_v57  ;;  %v2127_v51 = vmul.f32 %v6195_v61, %v7025_v59 }
 0x20b   : > { %2568 = vperm.xlu1 %3344, %v2120_v36   ;;  %v6283_v18 = vpop.eup %3621  ;;  %v2020_v28 = vsel %vm975_vm0, %v6279_v12, 0.0  ;;  %3629 = vrcp.f32 %v2010_v27  ;;  %v2139_v27 = vmul.f32 %v6241_v6, %v5893_v17 }
 0x20c   : > { %2623 = vperm.xlu0 %3343, %v2133_v49   ;;  %v2019_v52 = vadd.f32 %v2018_v7, %v2017_v37  ;;  %v6293_v22 = vpop.eup %3623  ;;  %v2022_v37 = vsel %vm975_vm0, %v6283_v18, 0.0 }
 0x20d   : > { %v6291_v36 = vpop.permute.xlu0 %2353  ;;  %v6295_v32 = vpop.permute.xlu1 %2308  ;;  %v2024_v48 = vsel %vm975_vm0, %v6293_v22, 0.0 }
 0x20e   : > { %v2021_v49 = vadd.f32 %v2020_v28, %v2019_v52 }
 0x20f   : > { %2578 = vperm.xlu1 %3344, %v2123_v24  }
 0x210   : > { %2633 = vperm.xlu0 %3343, %v2135_v58   ;;  %v2023_v62 = vadd.f32 %v2022_v37, %v2021_v49  ;;  %v3626_v28 = vpop.eup %3625  ;;  %v7026_v37 = vld [vmem:[#allocation26_spill] sm:$0xff] }
 0x212   : > { %v2025_v33 = vadd.f32 %v2024_v48, %v2023_v62  ;;  %v2129_v62 = vmul.f32 %v6195_v61, %v7026_v37  ;;  %v7028_v37 = vld [vmem:[#allocation40_spill] sm:$0xff] }
 0x213   : > { %2588 = vperm.xlu1 %3344, %v2125_v20   ;;  %v2142_v20 = vmul.f32 %v3626_v28, %v5941_v16  ;;  %v6320_v48 = vpop.eup %3627 }
 0x214   : > { %2643 = vperm.xlu0 %3343, %v2137_v11   ;;  %v2026_v52 = vrot.slane %v2025_v33, 4  ;;  %v6333_v16 = vmul.f32 %v6320_v48, %v6145_v13  ;;  %v2136_v13 = vmul.f32 %v6241_v6, %v5821_v0  ;;  %v2141_v0 = vmul.f32 %v3626_v28, %v5933_v44 }
 0x215   : > { %v6322_v59 = vpop.eup %3629 }
 0x216   : > { %v6305_v7 = vpop.permute.xlu0 %2363  ;;  %v2027_v58 = vadd.f32 %v2026_v52, %v2025_v33  ;;  %v7027_v52 = vld [vmem:[#allocation38_spill] sm:$0xff] }
 0x217   : > { %v6309_v24 = vpop.permute.xlu1 %2318  ;;  %2598 = vperm.xlu1 %3344, %v2127_v51   ;;  %v2132_v51 = vmul.f32 %v6241_v6, %v7027_v52 }
 0x218   : > { %2653 = vperm.xlu0 %3343, %v2139_v27   ;;  %v2028_v21 = vrot.slane %v2027_v58, 2  ;;  %v2144_v27 = vmul.f32 %v3626_v28, %v5987_v60 }
 0x21a   : > { %v6313_v49 = vpop.permute.xlu0 %2373  ;;  %v2029_v11 = vadd.f32 %v2028_v21, %v2027_v58  ;;  %v6337_v58 = vmul.f32 %v6322_v59, %v6211_v42  ;;  %v2148_v42 = vmul.f32 %v3626_v28, %v6062_v8  ;;  %v2160_v8 = vmul.f32 %v6322_v59, %v6157_v56 }
 0x21b   : > { %v6317_v57 = vpop.permute.xlu1 %2328  ;;  %2608 = vperm.xlu1 %3344, %v2129_v62   ;;  %v2134_v62 = vmul.f32 %v6241_v6, %v7028_v37  ;;  %v2145_v56 = vmul.f32 %v3626_v28, %v5994_v10 }
 0x21c   : > { %2663 = vperm.xlu0 %3343, %v2142_v20   ;;  %v2030_v33 = vrot.slane %v2029_v11, 1  ;;  %v2146_v20 = vmul.f32 %v3626_v28, %v6004_v45  ;;  %v2151_v45 = vmul.f32 %v6320_v48, %v6031_v1 }
 0x21e   : > { %v6324_v17 = vpop.permute.xlu0 %2383  ;;  %v2031_v21 = vadd.f32 %v2030_v33, %v2029_v11  ;;  %v2138_v33 = vmul.f32 %v6241_v6, %v5879_v47  ;;  %v2143_v47 = vmul.f32 %v3626_v28, %v5965_v26  ;;  %v3634_v26 = vld [vmem:[%s3912_s30] sm:$0xff] }
 0x21f   : > { %v6329_v61 = vpop.permute.xlu1 %2338  ;;  %2618 = vperm.xlu1 %3344, %v2132_v51  }
 0x220   : > { %2673 = vperm.xlu0 %3343, %v2144_v27   ;;  %3631 = vrcp.f32 %v2031_v21 }
 0x222   : > { %v6342_v52 = vpop.permute.xlu0 %2393 }
 0x223   : > { %2628 = vperm.xlu1 %3344, %v2134_v62   ;;  %v6344_v60 = vpop.permute.xlu1 %2348  ;;  %v2161_v62 = vmul.f32 %v6322_v59, %v6161_v30 }
 0x224   : > { %2683 = vperm.xlu0 %3343, %v2146_v20  }
 0x227   : > { %2638 = vperm.xlu1 %3344, %v2136_v13   ;;  %v2816_v13 = vmul.f32 %v3634_v26, %v5891_v39 }
 0x228   : > { %2693 = vperm.xlu0 %3343, %v2148_v42  }
 0x22a   : > { %v6349_v11 = vpop.permute.xlu0 %2403  ;;  %v6364_v37 = vpop.eup %3631 }
 0x22b   : > { %2648 = vperm.xlu1 %3344, %v2138_v33   ;;  %v2168_v6 = vmul.f32 %v6364_v37, %v6249_v55  ;;  %v2147_v55 = vmul.f32 %v3626_v28, %v6019_v34  ;;  %v3635_v33 = vld [vmem:[%s3912_s30 + $0x8] sm:$0xff]  ;;  %v2170_v30 = vmul.f32 %v6364_v37, %v6257_v5  ;;  %v2150_v34 = vmul.f32 %v6320_v48, %v6025_v54 }
 0x22c   : > { %v6355_v51 = vpop.permute.xlu1 %2358  ;;  %2703 = vperm.xlu0 %3343, %v2151_v45   ;;  %v7029_v45 = vld [vmem:[#allocation31_spill] sm:$0xff]  ;;  %v3638_v5 = vld [vmem:[%s3912_s30 + $0x48] sm:$0xff] }
 0x22d   : > { %v2817_v10 = vmul.f32 %v3635_v33, %v7029_v45  ;;  %v2825_v26 = vmul.f32 %v3638_v5, %v5931_v31  ;;  %v3641_v45 = vld [vmem:[%s3912_s30 + $0x18] sm:$0xff]  ;;  %v3644_v5 = vld [vmem:[%s3912_s30 + $0xc0] sm:$0xff] }
 0x22e   : > { %v6357_v27 = vpop.permute.xlu0 %2413 }
 0x22f   : > { %2658 = vperm.xlu1 %3344, %v2141_v0   ;;  %v2944_v0 = vadd.f32 %v2817_v10, %v2816_v13  ;;  %v3639_v13 = vld [vmem:[%s3912_s30 + $0x50] sm:$0xff]  ;;  %v7031_v10 = vld [vmem:[#allocation33_spill] sm:$0xff] }
 0x230   : > { %v6362_v21 = vpop.permute.xlu1 %2368  ;;  %2743 = vperm.xlu0 %3343, %v2160_v8   ;;  %v3636_v8 = vld [vmem:[%s3912_s30 + $0x40] sm:$0xff] }
 0x231   : > { %v2824_v39 = vmul.f32 %v3636_v8, %v6084_v25  ;;  %v3640_v25 = vld [vmem:[%s3912_s30 + $0x80] sm:$0xff]  ;;  %v3642_v8 = vld [vmem:[%s3912_s30 + $0x88] sm:$0xff] }
 0x232   : > { %v6367_v1 = vpop.permute.xlu0 %2423  ;;  %v2832_v54 = vmul.f32 %v3640_v25, %v6187_v29  ;;  %v2833_v31 = vmul.f32 %v3642_v8, %v6076_v35  ;;  %v2159_v29 = vmul.f32 %v6322_v59, %v6149_v41  ;;  %v7032_v35 = vld [vmem:[#allocation6_spill] sm:$0xff]  ;;  %v3648_v8 = vld [vmem:[%s3912_s30 + $0xd0] sm:$0xff] }
 0x233   : > { %2668 = vperm.xlu1 %3344, %v2143_v47   ;;  %v3637_v47 = vld [vmem:[%s3912_s30 + $0x10] sm:$0xff] }
 0x234   : > { %v6371_v44 = vpop.permute.xlu1 %2378  ;;  %2778 = vperm.xlu0 %3343, %v2168_v6   ;;  %v7030_v6 = vld [vmem:[#allocation11_spill] sm:$0xff]  ;;  %v2970_v25 = vadd.f32 %v2833_v31, %v2832_v54 }
 0x236   : > { %v6376_v20 = vpop.permute.xlu0 %2433 }
 0x237   : > { %2678 = vperm.xlu1 %3344, %v2145_v56   ;;  %v2818_v56 = vmul.f32 %v3637_v47, %v7030_v6  ;;  %v2957_v47 = vadd.f32 %v2825_v26, %v2824_v39  ;;  %v3643_v6 = vld [vmem:[%s3912_s30 + $0x90] sm:$0xff] }
 0x238   : > { %2748 = vperm.xlu0 %3343, %v2161_v62   ;;  %v6381_v42 = vpop.permute.xlu1 %2388  ;;  %v2154_v62 = vmul.f32 %v6320_v48, %v6101_v3 }
 0x239   : > { %v2945_v3 = vadd.f32 %v2944_v0, %v2818_v56  ;;  %v2163_v0 = vmul.f32 %v6322_v59, %v6177_v9  ;;  %v3645_v56 = vld [vmem:[%s3912_s30 + $0x20] sm:$0xff] }
 0x23a   : > { %v6421_v39 = vmul.f32 %v3645_v56, %v7032_v35  ;;  %v3653_v35 = vld [vmem:[%s3912_s30 + $0x110] sm:$0xff] }
 0x23b   : > { %2688 = vperm.xlu1 %3344, %v2147_v55   ;;  %v2826_v55 = vmul.f32 %v3639_v13, %v6115_v50  ;;  %v2834_v50 = vmul.f32 %v3643_v6, %v6219_v38  ;;  %v2840_v13 = vmul.f32 %v3644_v5, %v6273_v15  ;;  %v7033_v38 = vld [vmem:[#allocation35_spill] sm:$0xff]  ;;  %v3647_v15 = vld [vmem:[%s3912_s30 + $0xc8] sm:$0xff]  ;;  %v2842_v6 = vmul.f32 %v3648_v8, %v6295_v32  ;;  %v3649_v5 = vld [vmem:[%s3912_s30 + $0x100] sm:$0xff] }
 0x23c   : > { %2788 = vperm.xlu0 %3343, %v2170_v30   ;;  %v2819_v30 = vmul.f32 %v3641_v45, %v7031_v10  ;;  %v2841_v9 = vmul.f32 %v3647_v15, %v6181_v46  ;;  %v2848_v56 = vmul.f32 %v3649_v5, %v6329_v61  ;;  %v2152_v46 = vmul.f32 %v6320_v48, %v6049_v2  ;;  %v3655_v2 = vld [vmem:[%s3912_s30 + $0x148] sm:$0xff]  ;;  %v3656_v15 = vld [vmem:[%s3912_s30 + $0x150] sm:$0xff] }
 0x23d   : > { %v2958_v41 = vadd.f32 %v2957_v47, %v2826_v55  ;;  %v3650_v55 = vld [vmem:[%s3912_s30 + $0x98] sm:$0xff]  ;;  %v2971_v31 = vadd.f32 %v2970_v25, %v2834_v50  ;;  %v3652_v47 = vld [vmem:[%s3912_s30 + $0x108] sm:$0xff]  ;;  %v2850_v61 = vmul.f32 %v3653_v35, %v6344_v60  ;;  %v3654_v50 = vld [vmem:[%s3912_s30 + $0x60] sm:$0xff]  ;;  %v2857_v25 = vmul.f32 %v3655_v2, %v6324_v17 }
 0x23e   : > { %v6391_v28 = vpop.permute.xlu0 %2443  ;;  %v6427_v10 = vadd.f32 %v2945_v3, %v2819_v30  ;;  %v2835_v54 = vmul.f32 %v3650_v55, %v6111_v63  ;;  %v3651_v30 = vld [vmem:[%s3912_s30 + $0x140] sm:$0xff]  ;;  %v2849_v32 = vmul.f32 %v3652_v47, %v6267_v19  ;;  %v2858_v19 = vmul.f32 %v3656_v15, %v6381_v42 }
 0x23f   : > { %2698 = vperm.xlu1 %3344, %v2150_v34   ;;  %v2856_v3 = vmul.f32 %v3651_v30, %v6371_v44  ;;  %v3658_v55 = vld [vmem:[%s3912_s30 + $0x180] sm:$0xff]  ;;  %v2169_v42 = vmul.f32 %v6364_v37, %v6251_v14 }
 0x240   : > { %v6403_v33 = vpop.permute.xlu1 %2398  ;;  %2718 = vperm.xlu0 %3343, %v2154_v62   ;;  %v3646_v62 = vld [vmem:[%s3912_s30 + $0x58] sm:$0xff]  ;;  %v2996_v5 = vadd.f32 %v2849_v32, %v2848_v56  ;;  %v2972_v30 = vadd.f32 %v2971_v31, %v2835_v54  ;;  %v7036_v32 = vld [vmem:[#allocation41_spill] sm:$0xff] }
 0x241   : > { %v2827_v26 = vmul.f32 %v3646_v62, %v7033_v38  ;;  %v7034_v62 = vld [vmem:[#allocation42_spill] sm:$0xff]  ;;  %v3009_v47 = vadd.f32 %v2857_v25, %v2856_v3  ;;  %v3663_v31 = vld [vmem:[%s3912_s30 + $0x118] sm:$0xff] }
 0x242   : > { %v2828_v44 = vmul.f32 %v3654_v50, %v7034_v62  ;;  %v2997_v50 = vadd.f32 %v2996_v5, %v2850_v61  ;;  %v7037_v62 = vld [vmem:[#allocation37_spill] sm:$0xff]  ;;  %v2851_v14 = vmul.f32 %v3663_v31, %v6291_v36  ;;  %v3673_v31 = vld [vmem:[%s3912_s30 + $0xb0] sm:$0xff] }
 0x243   : > { %v6413_v34 = vpop.permute.xlu0 %2453  ;;  %2738 = vperm.xlu1 %3344, %v2159_v29   ;;  %v2983_v29 = vadd.f32 %v2841_v9, %v2840_v13  ;;  %v2959_v38 = vadd.f32 %v2958_v41, %v2827_v26  ;;  %v3657_v13 = vld [vmem:[%s3912_s30 + $0x28] sm:$0xff]  ;;  %v3659_v41 = vld [vmem:[%s3912_s30 + $0xa0] sm:$0xff]  ;;  %v3010_v3 = vadd.f32 %v3009_v47, %v2858_v19  ;;  %v3667_v19 = vld [vmem:[%s3912_s30 + $0x158] sm:$0xff]  ;;  %v2165_v47 = vmul.f32 %v6322_v59, %v6205_v23 }
 0x244   : > { %v6425_v45 = vpop.permute.xlu1 %2408  ;;  %2758 = vperm.xlu0 %3343, %v2163_v0   ;;  %v2172_v0 = vmul.f32 %v6364_v37, %v6269_v40  ;;  %v7035_v40 = vld [vmem:[#allocation43_spill] sm:$0xff]  ;;  %v2836_v17 = vmul.f32 %v3659_v41, %v6237_v4  ;;  %v3664_v61 = vld [vmem:[%s3912_s30 + $0xe0] sm:$0xff]  ;;  %v2859_v5 = vmul.f32 %v3667_v19, %v6342_v52  ;;  %v2998_v41 = vadd.f32 %v2997_v50, %v2851_v14  ;;  %v3672_v50 = vld [vmem:[%s3912_s30 + $0x198] sm:$0xff] }
 0x245   : > { %v6457_v9 = vmul.f32 %v3657_v13, %v7035_v40  ;;  %v2984_v8 = vadd.f32 %v2983_v29, %v2842_v6  ;;  %v3661_v6 = vld [vmem:[%s3912_s30 + $0x188] sm:$0xff]  ;;  %v2156_v29 = vmul.f32 %v6320_v48, %v7036_v32  ;;  %v2960_v54 = vadd.f32 %v2959_v38, %v2828_v44  ;;  %v3671_v32 = vld [vmem:[%s3912_s30 + $0x30] sm:$0xff] }
 0x246   : > { %v2865_v56 = vmul.f32 %v3661_v6, %v6367_v1  ;;  %v2844_v1 = vmul.f32 %v3664_v61, %v6309_v24  ;;  %v3666_v38 = vld [vmem:[%s3912_s30 + $0xa8] sm:$0xff]  ;;  %v2973_v36 = vadd.f32 %v2972_v30, %v2836_v17  ;;  %v3670_v6 = vld [vmem:[%s3912_s30 + $0x160] sm:$0xff]  ;;  %v2867_v23 = vmul.f32 %v3672_v50, %v6376_v20  ;;  %v3677_v19 = vld [vmem:[%s3912_s30 + $0xf0] sm:$0xff] }
 0x247   : > { %v6447_v63 = vpop.permute.xlu0 %2463  ;;  %2708 = vperm.xlu1 %3344, %v2152_v46   ;;  %v3660_v46 = vld [vmem:[%s3912_s30 + $0xd8] sm:$0xff]  ;;  %v7038_v13 = vld [vmem:[#allocation10_spill] sm:$0xff]  ;;  %v2860_v52 = vmul.f32 %v3670_v6, %v6403_v33  ;;  %v2174_v20 = vmul.f32 %v6364_v37, %v6283_v18 }
 0x248   : > { %v2419_v60 = vpop.permute.xlu1 %2418  ;;  %2798 = vperm.xlu0 %3343, %v2172_v0   ;;  %v2843_v35 = vmul.f32 %v3660_v46, %v6217_v43  ;;  %v3662_v0 = vld [vmem:[%s3912_s30 + $0x68] sm:$0xff]  ;;  %v2837_v40 = vmul.f32 %v3666_v38, %v7038_v13  ;;  %v3669_v46 = vld [vmem:[%s3912_s30 + $0x70] sm:$0xff]  ;;  %v7042_v33 = vld [vmem:[#allocation8_spill] sm:$0xff] }
 0x249   : > { %v2864_v26 = vmul.f32 %v3658_v55, %v2419_v60  ;;  %v2829_v4 = vmul.f32 %v3662_v0, %v7037_v62  ;;  %v3665_v60 = vld [vmem:[%s3912_s30 + $0x190] sm:$0xff]  ;;  %v7039_v55 = vld [vmem:[#allocation5_spill] sm:$0xff]  ;;  %v2947_v62 = vadd.f32 %v6427_v10, %v6421_v39  ;;  %v2162_v14 = vmul.f32 %v6322_v59, %v7042_v33 }
 0x24a   : > { %v2985_v2 = vadd.f32 %v2984_v8, %v2843_v35  ;;  %v2153_v24 = vmul.f32 %v6320_v48, %v7039_v55  ;;  %v3668_v8 = vld [vmem:[%s3912_s30 + $0x120] sm:$0xff]  ;;  %v7040_v35 = vld [vmem:[#allocation7_spill] sm:$0xff] }
 0x24b   : > { %2783 = vperm.xlu1 %3344, %v2169_v42   ;;  %v3022_v25 = vadd.f32 %v2865_v56, %v2864_v26  ;;  %v6476_v15 = vpop.permute.xlu0 %2473  ;;  %v2852_v26 = vmul.f32 %v3668_v8, %v6355_v51  ;;  %v2830_v17 = vmul.f32 %v3669_v46, %v7040_v35  ;;  %v2961_v30 = vadd.f32 %v2960_v54, %v2829_v4  ;;  %v3679_v8 = vld [vmem:[%s3912_s30 + $0x168] sm:$0xff] }
 0x24c   : > { %v2429_v43 = vpop.permute.xlu1 %2428  ;;  %2728 = vperm.xlu0 %3343, %v2156_v29   ;;  %v3011_v56 = vadd.f32 %v3010_v3, %v2859_v5  ;;  %v7041_v29 = vld [vmem:[#allocation13_spill] sm:$0xff]  ;;  %v2986_v51 = vadd.f32 %v2985_v2, %v2844_v1  ;;  %v2838_v4 = vmul.f32 %v3673_v31, %v6247_v53  ;;  %v2974_v54 = vadd.f32 %v2973_v36, %v2837_v40  ;;  %v3674_v3 = vld [vmem:[%s3912_s30 + $0xe8] sm:$0xff]  ;;  %v3675_v53 = vld [vmem:[%s3912_s30 + $0x38] sm:$0xff] }
 0x24d   : > { %v2866_v44 = vmul.f32 %v3665_v60, %v2429_v43  ;;  %v2822_v0 = vmul.f32 %v3671_v32, %v7041_v29  ;;  %v7043_v43 = vld [vmem:[#allocation9_spill] sm:$0xff]  ;;  %v2999_v1 = vadd.f32 %v2998_v41, %v2852_v26  ;;  %v2948_v10 = vadd.f32 %v2947_v62, %v6457_v9  ;;  %v3676_v40 = vld [vmem:[%s3912_s30 + $0x128] sm:$0xff]  ;;  %v7045_v41 = vld [vmem:[#allocation12_spill] sm:$0xff] }
 0x24e   : > { %v2845_v61 = vmul.f32 %v3674_v3, %v7043_v43  ;;  %v3012_v38 = vadd.f32 %v3011_v56, %v2860_v52  ;;  %v2853_v36 = vmul.f32 %v3676_v40, %v6305_v7  ;;  %v2846_v5 = vmul.f32 %v3677_v19, %v6317_v57  ;;  %v3678_v9 = vld [vmem:[%s3912_s30 + $0x1a0] sm:$0xff]  ;;  %v3680_v7 = vld [vmem:[%s3912_s30 + $0x130] sm:$0xff]  ;;  %v3681_v35 = vld [vmem:[%s3912_s30 + $0x1a8] sm:$0xff] }
 0x24f   : > { %v3023_v42 = vadd.f32 %v3022_v25, %v2866_v44  ;;  %2713 = vperm.xlu1 %3344, %v2153_v24   ;;  %v7044_v25 = vld [vmem:[#allocation15_spill] sm:$0xff]  ;;  %v2962_v44 = vadd.f32 %v2961_v30, %v2830_v17  ;;  %v2975_v24 = vadd.f32 %v2974_v54, %v2838_v4  ;;  %v2861_v26 = vmul.f32 %v3679_v8, %v6349_v11  ;;  %v3682_v11 = vld [vmem:[%s3912_s30 + $0x78] sm:$0xff] }
 0x250   : > { %2768 = vperm.xlu0 %3343, %v2165_v47   ;;  %v2823_v60 = vmul.f32 %v3675_v53, %v7044_v25  ;;  %v2987_v18 = vadd.f32 %v2986_v51, %v2845_v61  ;;  %v2171_v47 = vmul.f32 %v6364_v37, %v7045_v41  ;;  %v2854_v57 = vmul.f32 %v3680_v7, %v6362_v21  ;;  %v7046_v56 = vld [vmem:[#allocation39_spill] sm:$0xff]  ;;  %v3684_v21 = vld [vmem:[%s3912_s30 + $0xb8] sm:$0xff]  ;;  %v3691_v41 = vld [vmem:[%s3912_s30 + $0x1c8] sm:$0xff] }
 0x251   : > { %v3024_v39 = vadd.f32 %v3023_v42, %v2867_v23  ;;  %v2175_v42 = vmul.f32 %v6364_v37, %v6293_v22  ;;  %v3000_v46 = vadd.f32 %v2999_v1, %v2853_v36  ;;  %v2869_v17 = vmul.f32 %v3681_v35, %v6391_v28  ;;  %v3683_v29 = vld [vmem:[%s3912_s30 + $0x170] sm:$0xff]  ;;  %v7047_v23 = vld [vmem:[#allocation44_spill] sm:$0xff] }
 0x252   : > { %v6505_v2 = vpop.permute.xlu0 %2483  ;;  %v2949_v52 = vadd.f32 %v2948_v10, %v2822_v0  ;;  %v2831_v32 = vmul.f32 %v3682_v11, %v7046_v56  ;;  %v2862_v22 = vmul.f32 %v3683_v29, %v6425_v45  ;;  %v3013_v51 = vadd.f32 %v3012_v38, %v2861_v26  ;;  %v3685_v28 = vld [vmem:[%s3912_s30 + $0x1b0] sm:$0xff]  ;;  %v3686_v43 = vld [vmem:[%s3912_s30 + $0xf8] sm:$0xff]  ;;  %v7049_v45 = vld [vmem:[#allocation21_spill] sm:$0xff] }
 0x253   : > { %2753 = vperm.xlu1 %3344, %v2162_v14   ;;  %v2439_v13 = vpop.permute.xlu1 %2438  ;;  %v2839_v62 = vmul.f32 %v3684_v21, %v7047_v23  ;;  %v2988_v31 = vadd.f32 %v2987_v18, %v2846_v5  ;;  %v7048_v14 = vld [vmem:[#allocation17_spill] sm:$0xff]  ;;  %v2847_v61 = vmul.f32 %v3686_v43, %v7049_v45  ;;  %v3687_v25 = vld [vmem:[%s3912_s30 + $0x138] sm:$0xff]  ;;  %v3692_v35 = vld [vmem:[%s3912_s30 + $0x1d0] sm:$0xff] }
 0x254   : > { %2808 = vperm.xlu0 %3343, %v2174_v20   ;;  %v2868_v55 = vmul.f32 %v3678_v9, %v2439_v13  ;;  %v2950_v0 = vadd.f32 %v2949_v52, %v2823_v60  ;;  %v2963_v33 = vadd.f32 %v2962_v44, %v2831_v32  ;;  %v2155_v3 = vmul.f32 %v6320_v48, %v7048_v14  ;;  %v3688_v13 = vld [vmem:[%s3912_s30 + $0x1c0] sm:$0xff]  ;;  %v3689_v19 = vld [vmem:[%s3912_s30 + $0x178] sm:$0xff] }
 0x255   : > { %v2976_v1 = vadd.f32 %v2975_v24, %v2839_v62  ;;  %v3001_v20 = vadd.f32 %v3000_v46, %v2854_v57  ;;  %v3014_v10 = vadd.f32 %v3013_v51, %v2862_v22  ;;  %v2855_v60 = vmul.f32 %v3687_v25, %v6313_v49  ;;  %v7050_v18 = vld [vmem:[#allocation28_spill] sm:$0xff]  ;;  %v3696_v25 = vld [vmem:[%s3912_s30 + $0x1f0] sm:$0xff] }
 0x256   : > { %v3025_v30 = vadd.f32 %v3024_v39, %v2868_v55  ;;  %v6527_v6 = vpop.permute.xlu0 %2493  ;;  %v2989_v44 = vadd.f32 %v2988_v31, %v2847_v61  ;;  %v2951_v40 = vrot.slane %v2950_v0, 4  ;;  %v2964_v36 = vrot.slane %v2963_v33, 4  ;;  %v3690_v8 = vld [vmem:[%s3912_s30 + $0x1b8] sm:$0xff] }
 0x257   : > { %2793 = vperm.xlu1 %3344, %v2171_v47   ;;  %v2449_v50 = vpop.permute.xlu1 %2448  ;;  %v2863_v5 = vmul.f32 %v3689_v19, %v6357_v27  ;;  %v2164_v9 = vmul.f32 %v6322_v59, %v7050_v18  ;;  %v2977_v55 = vrot.slane %v2976_v1, 4  ;;  %v3002_v24 = vadd.f32 %v3001_v20, %v2855_v60  ;;  %v3693_v29 = vld [vmem:[%s3912_s30 + $0x1d8] sm:$0xff] }
 0x258   : > { %2813 = vperm.xlu0 %3343, %v2175_v42   ;;  %v2870_v4 = vmul.f32 %v3685_v28, %v2449_v50  ;;  %v3026_v54 = vadd.f32 %v3025_v30, %v2869_v17  ;;  %v2871_v26 = vmul.f32 %v3690_v8, %v6413_v34  ;;  %v2873_v49 = vmul.f32 %v3691_v41, %v6447_v63 }
 0x259   : > { %v3015_v42 = vadd.f32 %v3014_v10, %v2863_v5  ;;  %v2990_v57 = vrot.slane %v2989_v44, 4  ;;  %v2965_v59 = vadd.f32 %v2964_v36, %v2963_v33  ;;  %v2173_v30 = vmul.f32 %v6364_v37, %v6279_v12 }
 0x25a   : > { %v6540_v39 = vpop.permute.xlu0 %2503  ;;  %v3027_v38 = vadd.f32 %v3026_v54, %v2870_v4  ;;  %v2952_v52 = vadd.f32 %v2951_v40, %v2950_v0  ;;  %v2978_v34 = vadd.f32 %v2977_v55, %v2976_v1  ;;  %v3003_v11 = vrot.slane %v3002_v24, 4  ;;  %v3694_v4 = vld [vmem:[%s3912_s30 + $0x1e0] sm:$0xff]  ;;  %v3697_v40 = vld [vmem:[%s3912_s30 + $0x1f8] sm:$0xff] }
 0x25b   : > { %2723 = vperm.xlu1 %3344, %v2155_v3   ;;  %v2459_v53 = vpop.permute.xlu1 %2458  ;;  %v3016_v32 = vrot.slane %v3015_v42, 4  ;;  %v2875_v22 = vmul.f32 %v3693_v29, %v6476_v15  ;;  %v2991_v51 = vadd.f32 %v2990_v57, %v2989_v44  ;;  %v2966_v21 = vrot.slane %v2965_v59, 2  ;;  %v3695_v3 = vld [vmem:[%s3912_s30 + $0x1e8] sm:$0xff] }
 0x25c   : > { %v2872_v48 = vmul.f32 %v3688_v13, %v2459_v53  ;;  %v3028_v46 = vadd.f32 %v3027_v38, %v2871_v26  ;;  %v2953_v62 = vrot.slane %v2952_v52, 2  ;;  %v2979_v31 = vrot.slane %v2978_v34, 2 }
 0x25d   : > { %v3004_v12 = vadd.f32 %v3003_v11, %v3002_v24  ;;  %v3017_v28 = vadd.f32 %v3016_v32, %v3015_v42  ;;  %v2992_v33 = vrot.slane %v2991_v51, 2  ;;  %v2967_v14 = vadd.f32 %v2966_v21, %v2965_v59  ;;  %v3698_v24 = vld [vmem:[%s3912_s30 + $0x208] sm:$0xff] }
 0x25e   : > { %v6553_v47 = vpop.permute.xlu0 %2513  ;;  %v3035_v27 = vadd.f32 %v2873_v49, %v2872_v48  ;;  %v3029_v50 = vrot.slane %v3028_v46, 4  ;;  %v2877_v43 = vmul.f32 %v3695_v3, %v6505_v2  ;;  %v2954_v61 = vadd.f32 %v2953_v62, %v2952_v52  ;;  %v3700_v52 = vld [vmem:[%s3912_s30 + $0x210] sm:$0xff] }
 0x25f   : > { %2763 = vperm.xlu1 %3344, %v2164_v9   ;;  %v2980_v1 = vadd.f32 %v2979_v31, %v2978_v34  ;;  %v3005_v20 = vrot.slane %v3004_v12, 2  ;;  %v3018_v53 = vrot.slane %v3017_v28, 2  ;;  %v2993_v38 = vadd.f32 %v2992_v33, %v2991_v51 }
 0x260   : > { %v2469_v7 = vpop.permute.xlu1 %2468  ;;  %v3030_v15 = vadd.f32 %v3029_v50, %v3028_v46  ;;  %v2968_v48 = vrot.slane %v2967_v14, 1  ;;  %v2879_v2 = vmul.f32 %v3697_v40, %v6527_v6  ;;  %v2955_v19 = vrot.slane %v2954_v61, 1 }
 0x261   : > { %v2874_v17 = vmul.f32 %v3692_v35, %v2469_v7  ;;  %v2981_v5 = vrot.slane %v2980_v1, 1  ;;  %v3006_v18 = vadd.f32 %v3005_v20, %v3004_v12  ;;  %v3019_v55 = vadd.f32 %v3018_v53, %v3017_v28  ;;  %v3702_v28 = vld [vmem:[%s3912_s30 + $0x220] sm:$0xff]  ;;  %v3704_v53 = vld [vmem:[%s3912_s30 + $0x230] sm:$0xff] }
 0x262   : > { %v6558_v56 = vpop.permute.xlu0 %2523  ;;  %v3031_v13 = vrot.slane %v3030_v15, 2  ;;  %v2881_v8 = vmul.f32 %v3698_v24, %v6540_v39  ;;  %v2994_v42 = vrot.slane %v2993_v38, 1  ;;  %v2969_v57 = vadd.f32 %v2968_v48, %v2967_v14  ;;  %v3703_v14 = vld [vmem:[%s3912_s30 + $0x228] sm:$0xff] }
 0x263   : > { %v3036_v63 = vadd.f32 %v3035_v27, %v2874_v17  ;;  %2803 = vperm.xlu1 %3344, %v2173_v30   ;;  %v2956_v27 = vadd.f32 %v2955_v19, %v2954_v61  ;;  %v2982_v35 = vadd.f32 %v2981_v5, %v2980_v1  ;;  %v3007_v17 = vrot.slane %v3006_v18, 1 }
 0x264   : > { %v3032_v7 = vadd.f32 %v3031_v13, %v3030_v15  ;;  %v3020_v39 = vrot.slane %v3019_v55, 1  ;;  %v2885_v3 = vmul.f32 %v3703_v14, %v6558_v56  ;;  %v3705_v56 = vld [vmem:[%s3912_s30 + $0x238] sm:$0xff]  ;;  %v3716_v14 = vld [vmem:[%s3912_s30 + $0x290] sm:$0xff] }
 0x265   : > { %v3037_v23 = vadd.f32 %v3036_v63, %v2875_v22  ;;  %v2995_v63 = vadd.f32 %v2994_v42, %v2993_v38  ;;  %v3169_v29 = vsel %vm3168_vm1, %v2969_v57, %v2956_v27  ;;  %v3701_v22 = vld [vmem:[%s3912_s30 + $0x218] sm:$0xff]  ;;  %v3008_v62 = vadd.f32 %v3007_v17, %v3006_v18  ;;  %v3707_v18 = vld [vmem:[%s3912_s30 + $0x240] sm:$0xff]  ;;  %v3711_v17 = vld [vmem:[%s3912_s30 + $0x268] sm:$0xff] }
 0x266   : > { %v2479_v37 = vpop.permute.xlu1 %2478  ;;  %v3033_v32 = vrot.slane %v3032_v7, 1  ;;  %v2883_v51 = vmul.f32 %v3701_v22, %v6553_v47  ;;  %v3021_v12 = vadd.f32 %v3020_v39, %v3019_v55 }
 0x267   : > { %v2876_v54 = vmul.f32 %v3694_v4, %v2479_v37  ;;  %2733 = vperm.xlu1 %3344, %v6333_v16   ;;  %v6564_v0 = vpop.permute.xlu0 %2533 }
 0x268   : > { %v3034_v47 = vadd.f32 %v3033_v32, %v3032_v7  ;;  %v2887_v13 = vmul.f32 %v3705_v56, %v6564_v0  ;;  %v3719_v56 = vld [vmem:[%s3912_s30 + $0x2a8] sm:$0xff] }
 0x269   : > { %v3038_v45 = vadd.f32 %v3037_v23, %v2876_v54  ;;  %v3171_v23 = vsel %vm3170_vm2, %v2982_v35, %v3169_v29  ;;  %v3713_v29 = vld [vmem:[%s3912_s30 + $0x278] sm:$0xff] }
 0x26a   : > { %v2489_v10 = vpop.permute.xlu1 %2488  ;;  %v3173_v15 = vsel %vm3172_vm3, %v2995_v63, %v3171_v23  ;;  %v3714_v23 = vld [vmem:[%s3912_s30 + $0x288] sm:$0xff] }
 0x26b   : > { %v2878_v60 = vmul.f32 %v3696_v25, %v2489_v10  ;;  %v3039_v44 = vadd.f32 %v3038_v45, %v2877_v43  ;;  %2773 = vperm.xlu1 %3344, %v6337_v58   ;;  %v6570_v16 = vpop.permute.xlu0 %2543  ;;  %v3699_v58 = vld [vmem:[%s3912_s30 + $0x200] sm:$0xff]  ;;  %v3175_v61 = vsel %vm3174_vm4, %v3008_v62, %v3173_v15 }
 0x26c   : > { %v3177_v20 = vsel %vm3176_vm5, %v3021_v12, %v3175_v61 }
 0x26d   : > { %v3040_v36 = vadd.f32 %v3039_v44, %v2878_v60  ;;  %v3179_v38 = vsel %vm3178_vm6, %v3034_v47, %v3177_v20 }
 0x26e   : > { %v2499_v9 = vpop.permute.xlu1 %2498 }
 0x26f   : > { %v3041_v26 = vadd.f32 %v3040_v36, %v2879_v2  ;;  %v2880_v41 = vmul.f32 %v3699_v58, %v2499_v9  ;;  %v6577_v49 = vpop.permute.xlu0 %2553  ;;  %v3706_v36 = vld [vmem:[%s3912_s30 + $0x248] sm:$0xff] }
 0x270   : > { %v2889_v19 = vmul.f32 %v3706_v36, %v6570_v16 }
 0x271   : > { %v3042_v46 = vrot.slane %v3041_v26, 4  ;;  %v3048_v6 = vadd.f32 %v2881_v8, %v2880_v41  ;;  %v3708_v8 = vld [vmem:[%s3912_s30 + $0x250] sm:$0xff]  ;;  %v3709_v41 = vld [vmem:[%s3912_s30 + $0x258] sm:$0xff] }
 0x272   : > { %v2509_v59 = vpop.permute.xlu1 %2508  ;;  %v2891_v42 = vmul.f32 %v3709_v41, %v6577_v49 }
 0x273   : > { %v3043_v30 = vadd.f32 %v3042_v46, %v3041_v26  ;;  %v2882_v34 = vmul.f32 %v3700_v52, %v2509_v59  ;;  %v6580_v11 = vpop.permute.xlu0 %2563 }
 0x274   : > { %v2893_v59 = vmul.f32 %v3711_v17, %v6580_v11  ;;  %v3715_v11 = vld [vmem:[%s3912_s30 + $0x280] sm:$0xff] }
 0x275   : > { %v3044_v50 = vrot.slane %v3043_v30, 2  ;;  %v3049_v21 = vadd.f32 %v3048_v6, %v2882_v34  ;;  %v3710_v6 = vld [vmem:[%s3912_s30 + $0x260] sm:$0xff]  ;;  %v3712_v34 = vld [vmem:[%s3912_s30 + $0x270] sm:$0xff] }
 0x276   : > { %v2519_v31 = vpop.permute.xlu1 %2518 }
 0x277   : > { %v3045_v37 = vadd.f32 %v3044_v50, %v3043_v30  ;;  %v2884_v4 = vmul.f32 %v3702_v28, %v2519_v31  ;;  %v3050_v54 = vadd.f32 %v3049_v21, %v2883_v51  ;;  %v2574_v33 = vpop.permute.xlu0 %2573 }
 0x278   : > { %v2895_v22 = vmul.f32 %v3713_v29, %v2574_v33 }
 0x279   : > { %v3046_v43 = vrot.slane %v3045_v37, 1  ;;  %v3051_v45 = vadd.f32 %v3050_v54, %v2884_v4 }
 0x27a   : > { %v2529_v1 = vpop.permute.xlu1 %2528 }
 0x27b   : > { %v3047_v10 = vadd.f32 %v3046_v43, %v3045_v37  ;;  %v2886_v25 = vmul.f32 %v3704_v53, %v2529_v1  ;;  %v3052_v60 = vadd.f32 %v3051_v45, %v2885_v3  ;;  %v2584_v44 = vpop.permute.xlu0 %2583  ;;  %v3717_v43 = vld [vmem:[%s3912_s30 + $0x298] sm:$0xff] }
 0x27c   : > { %v2897_v62 = vmul.f32 %v3714_v23, %v2584_v44 }
 0x27d   : > { %v3053_v48 = vadd.f32 %v3052_v60, %v2886_v25  ;;  %v3181_v40 = vsel %vm3180_vm7, %v3047_v10, %v3179_v38  ;;  %v3718_v25 = vld [vmem:[%s3912_s30 + $0x2a0] sm:$0xff] }
 0x27e   : > { %v2539_v2 = vpop.permute.xlu1 %2538  ;;  %3191 = vst [vmem:[%s6600_s11] sm:$0xff] %v3181_v40 }
 0x27f   : > { %v3054_v5 = vadd.f32 %v3053_v48, %v2887_v13  ;;  %v2888_v9 = vmul.f32 %v3707_v18, %v2539_v2  ;;  %v2594_v55 = vpop.permute.xlu0 %2593 }
 0x280   : > { %v2899_v45 = vmul.f32 %v3717_v43, %v2594_v55  ;;  %v3726_v43 = vld [vmem:[%s3912_s30 + $0x2d0] sm:$0xff] }
 0x281   : > { %v3061_v24 = vadd.f32 %v2889_v19, %v2888_v9  ;;  %v3055_v46 = vrot.slane %v3054_v5, 4 }
 0x282   : > { %v2549_v0 = vpop.permute.xlu1 %2548 }
 0x283   : > { %v2890_v26 = vmul.f32 %v3708_v8, %v2549_v0  ;;  %v2604_v58 = vpop.permute.xlu0 %2603  ;;  %v3056_v52 = vadd.f32 %v3055_v46, %v3054_v5  ;;  %v3720_v5 = vld [vmem:[%s3912_s30 + $0x2b0] sm:$0xff] }
 0x284   : > { %v2901_v13 = vmul.f32 %v3719_v56, %v2604_v58  ;;  %v3728_v56 = vld [vmem:[%s3912_s30 + $0x2d8] sm:$0xff] }
 0x285   : > { %v3062_v7 = vadd.f32 %v3061_v24, %v2890_v26  ;;  %v3057_v21 = vrot.slane %v3056_v52, 2  ;;  %v3721_v24 = vld [vmem:[%s3912_s30 + $0x2b8] sm:$0xff] }
 0x286   : > { %v2559_v57 = vpop.permute.xlu1 %2558 }
 0x287   : > { %v2892_v16 = vmul.f32 %v3710_v6, %v2559_v57  ;;  %v3063_v27 = vadd.f32 %v3062_v7, %v2891_v42  ;;  %v2614_v35 = vpop.permute.xlu0 %2613  ;;  %v3058_v15 = vadd.f32 %v3057_v21, %v3056_v52 }
 0x288   : > { %v2903_v0 = vmul.f32 %v3721_v24, %v2614_v35 }
 0x289   : > { %v3064_v39 = vadd.f32 %v3063_v27, %v2892_v16  ;;  %v3059_v10 = vrot.slane %v3058_v15, 1 }
 0x28a   : > { %v2569_v30 = vpop.permute.xlu1 %2568 }
 0x28b   : > { %v2894_v63 = vmul.f32 %v3712_v34, %v2569_v30  ;;  %v3065_v32 = vadd.f32 %v3064_v39, %v2893_v59  ;;  %v6613_v49 = vpop.permute.xlu0 %2623  ;;  %v3060_v36 = vadd.f32 %v3059_v10, %v3058_v15  ;;  %v3724_v15 = vld [vmem:[%s3912_s30 + $0x2c8] sm:$0xff] }
 0x28d   : > { %v3066_v51 = vadd.f32 %v3065_v32, %v2894_v63 }
 0x28e   : > { %v2579_v50 = vpop.permute.xlu1 %2578 }
 0x28f   : > { %v3067_v31 = vadd.f32 %v3066_v51, %v2895_v22  ;;  %v2896_v12 = vmul.f32 %v3715_v11, %v2579_v50  ;;  %v6618_v37 = vpop.permute.xlu0 %2633  ;;  %v3722_v11 = vld [vmem:[%s3912_s30 + $0x2c0] sm:$0xff] }
 0x291   : > { %v3068_v28 = vrot.slane %v3067_v31, 4  ;;  %v3074_v4 = vadd.f32 %v2897_v62, %v2896_v12 }
 0x292   : > { %v2589_v54 = vpop.permute.xlu1 %2588 }
 0x293   : > { %v3069_v47 = vadd.f32 %v3068_v28, %v3067_v31  ;;  %v2898_v33 = vmul.f32 %v3716_v14, %v2589_v54  ;;  %v6621_v3 = vpop.permute.xlu0 %2643  ;;  %v3723_v28 = vld [vmem:[%s3912_s30 + $0x300] sm:$0xff]  ;;  %v3725_v14 = vld [vmem:[%s3912_s30 + $0x308] sm:$0xff] }
 0x295   : > { %v3070_v61 = vrot.slane %v3069_v47, 2  ;;  %v3075_v1 = vadd.f32 %v3074_v4, %v2898_v33 }
 0x296   : > { %v2599_v20 = vpop.permute.xlu1 %2598 }
 0x297   : > { %v3071_v53 = vadd.f32 %v3070_v61, %v3069_v47  ;;  %v2900_v60 = vmul.f32 %v3718_v25, %v2599_v20  ;;  %v3076_v44 = vadd.f32 %v3075_v1, %v2899_v45  ;;  %v6625_v38 = vpop.permute.xlu0 %2653  ;;  %v2905_v47 = vmul.f32 %v3724_v15, %v6613_v49  ;;  %v3727_v61 = vld [vmem:[%s3912_s30 + $0x310] sm:$0xff]  ;;  %v3729_v49 = vld [vmem:[%s3912_s30 + $0x318] sm:$0xff] }
 0x298   : > { %v3741_v15 = vld [vmem:[%s3912_s30 + $0x350] sm:$0xff] }
 0x299   : > { %v3072_v48 = vrot.slane %v3071_v53, 1  ;;  %v3077_v40 = vadd.f32 %v3076_v44, %v2900_v60 }
 0x29a   : > { %v2609_v2 = vpop.permute.xlu1 %2608 }
 0x29b   : > { %v3073_v19 = vadd.f32 %v3072_v48, %v3071_v53  ;;  %v2902_v18 = vmul.f32 %v3720_v5, %v2609_v2  ;;  %v3078_v9 = vadd.f32 %v3077_v40, %v2901_v13  ;;  %v2664_v55 = vpop.permute.xlu0 %2663  ;;  %v2907_v13 = vmul.f32 %v3728_v56, %v6618_v37 }
 0x29c   : > { %v2913_v33 = vmul.f32 %v3725_v14, %v2664_v55 }
 0x29d   : > { %v3182_v8 = vsel %vm3168_vm1, %v3073_v19, %v3060_v36  ;;  %v3079_v26 = vadd.f32 %v3078_v9, %v2902_v18  ;;  %v3730_v36 = vld [vmem:[%s3912_s30 + $0x2e0] sm:$0xff] }
 0x29e   : > { %v2619_v41 = vpop.permute.xlu1 %2618  ;;  %v3731_v18 = vld [vmem:[%s3912_s30 + $0x320] sm:$0xff] }
 0x29f   : > { %v3080_v42 = vadd.f32 %v3079_v26, %v2903_v0  ;;  %v2674_v7 = vpop.permute.xlu0 %2673  ;;  %v2904_v12 = vmul.f32 %v3722_v11, %v2619_v41  ;;  %v3732_v26 = vld [vmem:[%s3912_s30 + $0x2e8] sm:$0xff] }
 0x2a0   : > { %v2915_v48 = vmul.f32 %v3729_v49, %v2674_v7  ;;  %v2909_v41 = vmul.f32 %v3732_v26, %v6621_v3  ;;  %v3738_v3 = vld [vmem:[%s3912_s30 + $0x348] sm:$0xff] }
 0x2a1   : > { %v3081_v57 = vrot.slane %v3080_v42, 4  ;;  %v3087_v10 = vadd.f32 %v2905_v47, %v2904_v12  ;;  %v3751_v26 = vld [vmem:[%s3912_s30 + $0x368] sm:$0xff] }
 0x2a2   : > { %v2629_v46 = vpop.permute.xlu1 %2628 }
 0x2a3   : > { %v3082_v58 = vadd.f32 %v3081_v57, %v3080_v42  ;;  %v2684_v6 = vpop.permute.xlu0 %2683  ;;  %v2906_v45 = vmul.f32 %v3726_v43, %v2629_v46  ;;  %v3733_v42 = vld [vmem:[%s3912_s30 + $0x328] sm:$0xff]  ;;  %v3734_v46 = vld [vmem:[%s3912_s30 + $0x2f0] sm:$0xff] }
 0x2a4   : > { %v2917_v7 = vmul.f32 %v3733_v42, %v2684_v6  ;;  %v3739_v6 = vld [vmem:[%s3912_s30 + $0x3c0] sm:$0xff] }
 0x2a5   : > { %v3083_v16 = vrot.slane %v3082_v58, 2  ;;  %v3088_v60 = vadd.f32 %v3087_v10, %v2906_v45  ;;  %v3745_v10 = vld [vmem:[%s3912_s30 + $0x338] sm:$0xff] }
 0x2a6   : > { %v2639_v27 = vpop.permute.xlu1 %2638 }
 0x2a7   : > { %v3084_v17 = vadd.f32 %v3083_v16, %v3082_v58  ;;  %v6631_v59 = vpop.permute.xlu0 %2693  ;;  %v2908_v19 = vmul.f32 %v3730_v36, %v2639_v27  ;;  %v3089_v5 = vadd.f32 %v3088_v60, %v2907_v13  ;;  %v3735_v27 = vld [vmem:[%s3912_s30 + $0x330] sm:$0xff] }
 0x2a8   : > { %v3746_v60 = vld [vmem:[%s3912_s30 + $0x3d0] sm:$0xff] }
 0x2a9   : > { %v3085_v39 = vrot.slane %v3084_v17, 1  ;;  %v3090_v0 = vadd.f32 %v3089_v5, %v2908_v19  ;;  %v3748_v36 = vld [vmem:[%s3912_s30 + $0x390] sm:$0xff]  ;;  %v3749_v5 = vld [vmem:[%s3912_s30 + $0x398] sm:$0xff] }
 0x2aa   : > { %v2649_v30 = vpop.permute.xlu1 %2648 }
 0x2ab   : > { %v3086_v35 = vadd.f32 %v3085_v39, %v3084_v17  ;;  %v6633_v52 = vpop.permute.xlu0 %2703  ;;  %v2910_v58 = vmul.f32 %v3734_v46, %v2649_v30  ;;  %v3091_v16 = vadd.f32 %v3090_v0, %v2909_v41  ;;  %v3740_v30 = vld [vmem:[%s3912_s30 + $0x380] sm:$0xff] }
 0x2ac   : > { %v2921_v12 = vmul.f32 %v3738_v3, %v6633_v52  ;;  %v3743_v52 = vld [vmem:[%s3912_s30 + $0x358] sm:$0xff]  ;;  %v3752_v46 = vld [vmem:[%s3912_s30 + $0x3e0] sm:$0xff] }
 0x2ad   : > { %v6636_v34 = vsel %vm3170_vm2, %v3086_v35, %v3182_v8  ;;  %v3736_v35 = vld [vmem:[%s3912_s30 + $0x340] sm:$0xff]  ;;  %v3092_v14 = vadd.f32 %v3091_v16, %v2910_v58 }
 0x2ae   : > { %v2659_v63 = vpop.permute.xlu1 %2658  ;;  %v3753_v16 = vld [vmem:[%s3912_s30 + $0x3a0] sm:$0xff] }
 0x2af   : > { %v6638_v32 = vpop.permute.xlu0 %2743  ;;  %v2912_v4 = vmul.f32 %v3723_v28, %v2659_v63 }
 0x2b1   : > { %v3100_v53 = vadd.f32 %v2913_v33, %v2912_v4  ;;  %v3742_v33 = vld [vmem:[%s3912_s30 + $0x388] sm:$0xff] }
 0x2b2   : > { %v2669_v29 = vpop.permute.xlu1 %2668  ;;  %v2929_v43 = vmul.f32 %v3742_v33, %v6638_v32  ;;  %v3747_v32 = vld [vmem:[%s3912_s30 + $0x3d8] sm:$0xff] }
 0x2b3   : > { %v2779_v22 = vpop.permute.xlu0 %2778  ;;  %v2914_v1 = vmul.f32 %v3727_v61, %v2669_v29  ;;  %v3737_v29 = vld [vmem:[%s3912_s30 + $0x3c8] sm:$0xff] }
 0x2b4   : > { %v2936_v28 = vmul.f32 %v3739_v6, %v2779_v22  ;;  %v3744_v22 = vld [vmem:[%s3912_s30 + $0x2f8] sm:$0xff]  ;;  %v3756_v6 = vld [vmem:[%s3912_s30 + $0x370] sm:$0xff] }
 0x2b5   : > { %v3101_v44 = vadd.f32 %v3100_v53, %v2914_v1  ;;  %v2919_v53 = vmul.f32 %v3745_v10, %v6631_v59 }
 0x2b6   : > { %v2679_v51 = vpop.permute.xlu1 %2678 }
 0x2b7   : > { %v6640_v50 = vpop.permute.xlu0 %2748  ;;  %v2916_v9 = vmul.f32 %v3731_v18, %v2679_v51  ;;  %v3102_v55 = vadd.f32 %v3101_v44, %v2915_v48 }
 0x2b8   : > { %v2930_v19 = vmul.f32 %v3748_v36, %v6640_v50 }
 0x2b9   : > { %v3103_v8 = vadd.f32 %v3102_v55, %v2916_v9 }
 0x2ba   : > { %v2689_v21 = vpop.permute.xlu1 %2688 }
 0x2bb   : > { %v6642_v23 = vpop.permute.xlu0 %2788  ;;  %v2918_v17 = vmul.f32 %v3735_v27, %v2689_v21  ;;  %v3104_v39 = vadd.f32 %v3103_v8, %v2917_v7 }
 0x2bc   : > { %v2938_v44 = vmul.f32 %v3746_v60, %v6642_v23 }
 0x2be   : > { %v2699_v62 = vpop.permute.xlu1 %2698 }
 0x2bf   : > { %v6644_v31 = vpop.permute.xlu0 %2718  ;;  %v2920_v63 = vmul.f32 %v3736_v35, %v2699_v62  ;;  %v3105_v62 = vadd.f32 %v3104_v39, %v2918_v17  ;;  %v3754_v35 = vld [vmem:[%s3912_s30 + $0x3a8] sm:$0xff] }
 0x2c1   : > { %v3113_v45 = vadd.f32 %v2921_v12, %v2920_v63 }
 0x2c2   : > { %v2739_v54 = vpop.permute.xlu1 %2738 }
 0x2c3   : > { %v6653_v20 = vpop.permute.xlu0 %2758  ;;  %v2928_v4 = vmul.f32 %v3740_v30, %v2739_v54  ;;  %v2911_v54 = vmul.f32 %v3744_v22, %v6625_v38  ;;  %v3760_v22 = vld [vmem:[%s3912_s30 + $0x3b0] sm:$0xff] }
 0x2c4   : > { %v2932_v27 = vmul.f32 %v3753_v16, %v6653_v20 }
 0x2c5   : > { %v3126_v56 = vadd.f32 %v2929_v43, %v2928_v4  ;;  %v3093_v48 = vadd.f32 %v3092_v14, %v2911_v54  ;;  %v3759_v43 = vld [vmem:[%s3912_s30 + $0x378] sm:$0xff] }
 0x2c6   : > { %v2709_v25 = vpop.permute.xlu1 %2708 }
 0x2c7   : > { %v6658_v2 = vpop.permute.xlu0 %2798  ;;  %v2922_v21 = vmul.f32 %v3741_v15, %v2709_v25  ;;  %v3127_v0 = vadd.f32 %v3126_v56, %v2930_v19  ;;  %v3094_v42 = vrot.slane %v3093_v48, 4  ;;  %v3758_v15 = vld [vmem:[%s3912_s30 + $0x3f8] sm:$0xff] }
 0x2c8   : > { %v2940_v50 = vmul.f32 %v3752_v46, %v6658_v2 }
 0x2c9   : > { %v3114_v13 = vadd.f32 %v3113_v45, %v2922_v21  ;;  %v3095_v3 = vadd.f32 %v3094_v42, %v3093_v48 }
 0x2ca   : > { %v2784_v40 = vpop.permute.xlu1 %2783 }
 0x2cb   : > { %v6662_v37 = vpop.permute.xlu0 %2728  ;;  %v2937_v51 = vmul.f32 %v3737_v29, %v2784_v40  ;;  %v3106_v40 = vadd.f32 %v3105_v62, %v2919_v53  ;;  %v3755_v29 = vld [vmem:[%s3912_s30 + $0x3e8] sm:$0xff] }
 0x2cc   : > { %v2926_v2 = vmul.f32 %v3756_v6, %v6662_v37 }
 0x2cd   : > { %v3139_v61 = vadd.f32 %v2937_v51, %v2936_v28  ;;  %v3107_v7 = vrot.slane %v3106_v40, 4  ;;  %v3757_v28 = vld [vmem:[%s3912_s30 + $0x3f0] sm:$0xff] }
 0x2ce   : > { %v2714_v24 = vpop.permute.xlu1 %2713 }
 0x2cf   : > { %v6676_v47 = vpop.permute.xlu0 %2768  ;;  %v2923_v1 = vmul.f32 %v3743_v52, %v2714_v24  ;;  %v3140_v9 = vadd.f32 %v3139_v61, %v2938_v44  ;;  %v3750_v24 = vld [vmem:[%s3912_s30 + $0x360] sm:$0xff]  ;;  %v3108_v12 = vadd.f32 %v3107_v7, %v3106_v40  ;;  %v3096_v52 = vrot.slane %v3095_v3, 2  ;;  %v3761_v44 = vld [vmem:[%s3912_s30 + $0x3b8] sm:$0xff] }
 0x2d0   : > { %v2924_v23 = vmul.f32 %v3750_v24, %v6644_v31  ;;  %v2934_v54 = vmul.f32 %v3760_v22, %v6676_v47 }
 0x2d1   : > { %v3115_v38 = vadd.f32 %v3114_v13, %v2923_v1  ;;  %v3109_v1 = vrot.slane %v3108_v12, 2 }
 0x2d2   : > { %v2754_v57 = vpop.permute.xlu1 %2753 }
 0x2d3   : > { %v2931_v18 = vmul.f32 %v3749_v5, %v2754_v57  ;;  %v2809_v59 = vpop.permute.xlu0 %2808  ;;  %v3116_v58 = vadd.f32 %v3115_v38, %v2924_v23 }
 0x2d4   : > { %v2942_v30 = vmul.f32 %v3757_v28, %v2809_v59 }
 0x2d5   : > { %v3128_v57 = vadd.f32 %v3127_v0, %v2931_v18 }
 0x2d6   : > { %v2794_v11 = vpop.permute.xlu1 %2793 }
 0x2d7   : > { %v2939_v49 = vmul.f32 %v3747_v32, %v2794_v11  ;;  %v2814_v31 = vpop.permute.xlu0 %2813  ;;  %v3129_v4 = vadd.f32 %v3128_v57, %v2932_v27  ;;  %v3097_v32 = vadd.f32 %v3096_v52, %v3095_v3 }
 0x2d8   : > { %v2943_v21 = vmul.f32 %v3758_v15, %v2814_v31 }
 0x2d9   : > { %v3141_v8 = vadd.f32 %v3140_v9, %v2939_v49  ;;  %v3110_v49 = vadd.f32 %v3109_v1, %v3108_v12  ;;  %v3098_v18 = vrot.slane %v3097_v32, 1 }
 0x2da   : > { %v2724_v25 = vpop.permute.xlu1 %2723 }
 0x2db   : > { %v2925_v41 = vmul.f32 %v3751_v26, %v2724_v25  ;;  %v3142_v11 = vadd.f32 %v3141_v8, %v2940_v50  ;;  %v3111_v47 = vrot.slane %v3110_v49, 1  ;;  %v3099_v0 = vadd.f32 %v3098_v18, %v3097_v32 }
 0x2dd   : > { %v3117_v39 = vadd.f32 %v3116_v58, %v2925_v41  ;;  %v3112_v8 = vadd.f32 %v3111_v47, %v3110_v49  ;;  %v3184_v46 = vsel %vm3172_vm3, %v3099_v0, %v6636_v34 }
 0x2de   : > { %v2764_v55 = vpop.permute.xlu1 %2763 }
 0x2df   : > { %v2933_v63 = vmul.f32 %v3754_v35, %v2764_v55  ;;  %v3118_v61 = vadd.f32 %v3117_v39, %v2926_v2  ;;  %v3185_v50 = vsel %vm3174_vm4, %v3112_v8, %v3184_v46 }
 0x2e1   : > { %v3130_v62 = vadd.f32 %v3129_v4, %v2933_v63 }
 0x2e2   : > { %v2804_v17 = vpop.permute.xlu1 %2803 }
 0x2e3   : > { %v2941_v51 = vmul.f32 %v3755_v29, %v2804_v17  ;;  %v3131_v13 = vadd.f32 %v3130_v62, %v2934_v54 }
 0x2e5   : > { %v3143_v20 = vadd.f32 %v3142_v11, %v2941_v51 }
 0x2e6   : > { %v2734_v14 = vpop.permute.xlu1 %2733 }
 0x2e7   : > { %v3144_v33 = vadd.f32 %v3143_v20, %v2942_v30  ;;  %v2927_v45 = vmul.f32 %v3759_v43, %v2734_v14 }
 0x2e9   : > { %v3145_v10 = vadd.f32 %v3144_v33, %v2943_v21  ;;  %v3119_v37 = vadd.f32 %v3118_v61, %v2927_v45 }
 0x2ea   : > { %v2774_v53 = vpop.permute.xlu1 %2773 }
 0x2eb   : > { %v3146_v25 = vrot.slane %v3145_v10, 4  ;;  %v3120_v60 = vrot.slane %v3119_v37, 4  ;;  %v2935_v56 = vmul.f32 %v3761_v44, %v2774_v53 }
 0x2ed   : > { %v3147_v48 = vadd.f32 %v3146_v25, %v3145_v10  ;;  %v3121_v40 = vadd.f32 %v3120_v60, %v3119_v37  ;;  %v3132_v36 = vadd.f32 %v3131_v13, %v2935_v56 }
 0x2ef   : > { %v3148_v19 = vrot.slane %v3147_v48, 2  ;;  %v3122_v38 = vrot.slane %v3121_v40, 2  ;;  %v3133_v5 = vrot.slane %v3132_v36, 4 }
 0x2f1   : > { %v3123_v59 = vadd.f32 %v3122_v38, %v3121_v40  ;;  %v3134_v9 = vadd.f32 %v3133_v5, %v3132_v36  ;;  %v3149_v55 = vadd.f32 %v3148_v19, %v3147_v48 }
 0x2f3   : > { %v3124_v24 = vrot.slane %v3123_v59, 1  ;;  %v3135_v23 = vrot.slane %v3134_v9, 2  ;;  %v3150_v41 = vrot.slane %v3149_v55, 1 }
 0x2f5   : > { %v3136_v26 = vadd.f32 %v3135_v23, %v3134_v9  ;;  %v3125_v42 = vadd.f32 %v3124_v24, %v3123_v59  ;;  %v3151_v58 = vadd.f32 %v3150_v41, %v3149_v55 }
 0x2f7   : > { %v3137_v7 = vrot.slane %v3136_v26, 1  ;;  %v3186_v16 = vsel %vm3176_vm5, %v3125_v42, %v3185_v50 }
 0x2f9   : > { %v3138_v57 = vadd.f32 %v3137_v7, %v3136_v26 }
 0x2fb   : > { %v3187_v27 = vsel %vm3178_vm6, %v3138_v57, %v3186_v16 }
 0x2fc   : > { %v3188_v34 = vsel %vm3180_vm7, %v3151_v58, %v3187_v27 }
 0x2fd   : > { %3192 = vst [vmem:[%s6600_s11 + $0x8] sm:$0xff] %v3188_v34 }
 0x2fe   : > { %3775 = shalt.err (!%p3772_p3)
}
 0x2ff   : > { %s3776_s30 = scalar_lea.hbm %s6717_s25, 256  ;;  %s3780_s6 = scalar_lea.hbm %s6770_s3, 512 }
 0x300   : > { %p3777_p4 = scmp.ne.s32.totalorder %s6717_s25, %s3776_s30  ;;  %p3781_p9 = scmp.lt.u32.totalorder %s6717_s25, %s6770_s3 }
 0x301   : > { %p3782_p10 = scmp.lt.u32.totalorder %s3780_s6, %s3776_s30  ;;  %p3784_p12 = scmp.lt.u32.totalorder %s3776_s30, %s6717_s25 }
 0x302   : > { %p3778_p7 = pnand %p3777_p4, %p3888_p5 }
 0x303   : > { %p3783_p11 = por %p3782_p10, %p3781_p9 }
 0x304   : > { %p3779_p8 = pneg %p3778_p7 }
 0x305   : > { %p3785_p13 = por %p3784_p12, %p3783_p11 }
 0x307   : > { %p3786_p0 = pnand %p3785_p13, %p3779_p8 }
 0x309   : > { %3789 = shalt.err (!%p3786_p0)
}
 0x30a   : > { %s3828_s9 = smov 128   ;;  %s3829_s10 = smov 8  }
 0x30b   : > { %3301 = dma.vmem_to_hbm [thread:$0]  (%p3888_p5), %s6719_s19, 256, %s6717_s25, %s6726_s16, %s3828_s9, %s3828_s9, %s3829_s10  }
 0x30c PF: > { %p3307_p1 = scmp.ge.s32.totalorder %s3824_s15, 2  ;;  %s3222_s11 = sand.u32 1, %s3812_s12  }
 0x30d   : > { %s3223_s17 = scalar_lea.sflag [#allocation3], %s3222_s11 }
 0x30e   : > { %p3304_p2 = pnand %p3307_p1, %p3892_p6 }
 0x310   : > { %3807 = dma.done.wait (!%p3304_p2), %s3223_s17, 256  }
 0x311   : > { %3809 = vsyncadd (!%p3304_p2), %s3223_s17, 4294967040  ;;  %p13_p3 = scmp.ge.s32.totalorder %s3875_s18, 4   ;;  %s7051_s12 = smov %s3816_s13 }
 0x312   : > { %s7052_s13 = smov %s3820_s14  ;;  %s7053_s14 = smov %s3886_s21 }
 0x313   : > { %s7054_s15 = smov %s3875_s18  ;;  %15 = sbr.rel (!%p13_p3) target bundleno = 3 (0x3), region = 70 }
 0x31a   :  { %3228 = vsyncpa [#allocation3], 1 }
 0x31b   :  { %3230 = vsyncpa [#allocation3 + $0x1], 1 }

</bundles_post_ra>
